<compile_context>
chip_gen: v6e
topology: v6e:2x2x1
jax: 0.10.0
libtpu: 0.0.40
codegen_flags: <defaults>
</compile_context>

<pallas_src>
import math
from functools import partial

import numpy as np
import jax
import jax.numpy as jnp
from jax.experimental import pallas as pl
from jax.experimental.pallas import tpu as pltpu


# ------------------------- model dimensions (small config) ------------------
IN_CHANNELS = 4          # audio channels of x
CONCAT_CHANNELS = 2      # input_concat_cond channels
BASE_CH = 16             # UNet base channels
CH0 = BASE_CH * 1        # multiplier 1
CH1 = BASE_CH * 2        # multiplier 2
CMF = BASE_CH * 4        # context mapping features
GROUPS = 4               # resnet_groups
CONTEXT_FEATURES = 16    # global_cond feature dim

GN_EPS = 1e-5
LANES = 128              # packed parameter buffer width (one 128-lane segment)
ROW_ALIGN = 8            # sublane alignment of packed row blocks


# ------------------------------ parameter init ------------------------------

def init_params(key):
    keys = iter(jax.random.split(key, 64))

    def w(shape, scale=0.1):
        return scale * jax.random.normal(next(keys), shape, jnp.float32)

    def resnet(c_in, c_out):
        p = dict(
            gn1_g=jnp.ones((c_in,), jnp.float32),
            gn1_b=jnp.zeros((c_in,), jnp.float32),
            conv1_w=w((c_out, c_in, 3)), conv1_b=w((c_out,)),
            map_w=w((c_out, CMF)), map_b=w((c_out,)),
            gn2_g=jnp.ones((c_out,), jnp.float32),
            gn2_b=jnp.zeros((c_out,), jnp.float32),
            conv2_w=w((c_out, c_out, 3)), conv2_b=w((c_out,)),
        )
        if c_in != c_out:
            p['res_w'] = w((c_out, c_in, 1))
            p['res_b'] = w((c_out,))
        return p

    params = dict(
        to_time_w=w((CMF, BASE_CH)), to_time_b=w((CMF,)),
        to_feat_w=w((CMF, CONTEXT_FEATURES)), to_feat_b=w((CMF,)),
        map1_w=w((CMF, CMF)), map1_b=w((CMF,)),
        map2_w=w((CMF, CMF)), map2_b=w((CMF,)),
        to_in_w=w((CH0, IN_CHANNELS + CONCAT_CHANNELS, 3)), to_in_b=w((CH0,)),
        down_w=w((CH1, CH0, 5)), down_b=w((CH1,)),
        d_res=resnet(CH1, CH1),
        mid_res=resnet(CH1, CH1),
        u_res=resnet(2 * CH1, CH1),
        up_w=w((CH0, CH1, 3)), up_b=w((CH0,)),
        to_out_w=w((IN_CHANNELS, CH0, 3)), to_out_b=w((IN_CHANNELS,)),
    )
    # UNet1DCondWrapper.__init__: every model parameter is multiplied by 0.5.
    return jax.tree.map(lambda p: 0.5 * p, params)


# ------------------- host-side matmul-ready weight shapes --------------------

def _conv_mat(w, b):
    # im2col layout: column index = k * C_in + c_in ; bias as last column.
    c_out, c_in, k = w.shape
    wm = jnp.transpose(w, (0, 2, 1)).reshape(c_out, k * c_in)
    return jnp.concatenate([wm, b.reshape(c_out, 1)], axis=1)


def _lin_mat(w, b):
    return jnp.concatenate([w, b.reshape(-1, 1)], axis=1)


def _gn_mat(g, b):
    return jnp.concatenate([g.reshape(-1, 1), b.reshape(-1, 1)], axis=1)


# ------------------ host-side static selection / GN constants ----------------
# All selection matrices are block-diagonal over batch so the folded lane axis
# (column index = b*T + t) never mixes batches; conv zero-padding shows up as
# all-zero columns.  Integer arithmetic is used for the 'nearest' index maps.

def _tap_gathers(B, t_in, t_out, K, pad, stride=1, fuse_upsample=False):
    gs = []
    for k in range(K):
        g = np.zeros((B * t_in, B * t_out), np.float32)
        for b in range(B):
            for t in range(t_out):
                if fuse_upsample:
                    ts = t + k - pad                       # tap at output resolution
                    if 0 <= ts < t_out:
                        src = (ts * t_in) // t_out         # nearest x-up source
                        g[b * t_in + src, b * t_out + t] = 1.0
                else:
                    src = stride * t + k - pad
                    if 0 <= src < t_in:
                        g[b * t_in + src, b * t_out + t] = 1.0
        gs.append(g)
    return np.concatenate(gs, axis=1)                      # (B*t_in, K*B*t_out)


def _nearest_mat(B, t_in, t_out):
    g = np.zeros((B * t_in, B * t_out), np.float32)
    for b in range(B):
        for t in range(t_out):
            g[b * t_in + (t * t_in) // t_out, b * t_out + t] = 1.0
    return g


def _batch_sum_mat(B, t):
    bm = np.zeros((B * t, B), np.float32)
    for b in range(B):
        bm[b * t:(b + 1) * t, b] = 1.0
    return bm


def _gn_consts(C, t):
    # a2  (2G, 2C): per-(group,batch) mean of [x ; x*x] (block-diagonal halves)
    # at2 (2C, 2G): broadcast per-(group,batch) scale/shift back to channels
    cg = C // GROUPS
    a2 = np.zeros((2 * GROUPS, 2 * C), np.float32)
    at2 = np.zeros((2 * C, 2 * GROUPS), np.float32)
    for h in range(2):
        for g in range(GROUPS):
            a2[h * GROUPS + g, h * C + g * cg: h * C + (g + 1) * cg] = 1.0 / (cg * t)
            at2[h * C + g * cg: h * C + (g + 1) * cg, h * GROUPS + g] = 1.0
    return a2, at2


def make_consts(B, T, T_cond, has_cond):
    Th = T // 2
    c = {
        'c.g3_full': _tap_gathers(B, T, T, K=3, pad=1),
        'c.g5_down': _tap_gathers(B, T, Th, K=5, pad=2, stride=2),
        'c.g3_half': _tap_gathers(B, Th, Th, K=3, pad=1),
        'c.g3_up':   _tap_gathers(B, Th, T, K=3, pad=1, fuse_upsample=True),
        'c.bm':      _batch_sum_mat(B, Th),
        'c.bmt':     _batch_sum_mat(B, Th).T.copy(),
    }
    c['c.a2_%d' % CH1], c['c.at2_%d' % CH1] = _gn_consts(CH1, Th)
    c['c.a2_%d' % (2 * CH1)], c['c.at2_%d' % (2 * CH1)] = _gn_consts(2 * CH1, Th)
    if has_cond and T_cond != T:
        c['c.interp'] = _nearest_mat(B, T_cond, T)
    return c


# ----------------------- host-side parameter packing ------------------------
# One (rows, 128) f32 buffer = ONE parameter DMA.  Each matrix is a row block
# at an 8-aligned row offset, lanes anchored at 0, bias as its last column;
# matrices wider than 128 lanes are split into stacked 128-wide chunks and
# re-joined in vregs inside the kernel.  Static selection / GN constants live
# in the same buffer.

def pack_params(params, consts):
    mats = {
        'to_time': _lin_mat(params['to_time_w'], params['to_time_b']),
        'to_feat': _lin_mat(params['to_feat_w'], params['to_feat_b']),
        'map1': _lin_mat(params['map1_w'], params['map1_b']),
        'map2': _lin_mat(params['map2_w'], params['map2_b']),
        'to_in': _conv_mat(params['to_in_w'], params['to_in_b']),
        'down': _conv_mat(params['down_w'], params['down_b']),
        'up': _conv_mat(params['up_w'], params['up_b']),
        'to_out': _conv_mat(params['to_out_w'], params['to_out_b']),
    }
    for name in ('d_res', 'mid_res', 'u_res'):
        p = params[name]
        mats[name + '.gn1'] = _gn_mat(p['gn1_g'], p['gn1_b'])
        mats[name + '.conv1'] = _conv_mat(p['conv1_w'], p['conv1_b'])
        mats[name + '.map'] = _lin_mat(p['map_w'], p['map_b'])
        mats[name + '.gn2'] = _gn_mat(p['gn2_g'], p['gn2_b'])
        mats[name + '.conv2'] = _conv_mat(p['conv2_w'], p['conv2_b'])
        if 'res_w' in p:
            mats[name + '.res'] = _conv_mat(p['res_w'], p['res_b'])
    mats.update(consts)

    chunks, meta, row = [], {}, 0
    for name, m in mats.items():
        m = jnp.asarray(m, jnp.float32)
        r, cols = m.shape
        rp = -(-r // ROW_ALIGN) * ROW_ALIGN
        pieces = []
        for c0 in range(0, cols, LANES):
            cc = min(LANES, cols - c0)
            blk = jnp.zeros((rp, LANES), jnp.float32).at[:r, :cc].set(m[:, c0:c0 + cc])
            chunks.append(blk)
            pieces.append((row, r, cc))
            row += rp
        meta[name] = tuple(pieces)
    return jnp.concatenate(chunks, axis=0), meta


# ------------------------------ fused kernel --------------------------------

def _fused_unet_kernel(*refs, meta, B, T, T_cond, has_feat, has_cond,
                       out_rows, out_cols):
    it = iter(refs)
    temb_ref = next(it)                              # (BASE_CH, B) feature-major
    feat_ref = next(it) if has_feat else None        # (CONTEXT_FEATURES, B)
    cond_ref = next(it) if has_cond else None        # (CONCAT_CHANNELS, B*T_cond)
    x_ref = next(it)                                 # (IN_CHANNELS, B*T) batch on lanes
    p_ref = next(it)                                 # (rows, 128) packed params + consts
    o_ref = next(it)                                 # (out_rows, out_cols) padded output

    f32 = jnp.float32
    N, Nh = B * T, B * (T // 2)
    # TODO(synk): torch nn.GELU default is exact (erf); tanh-approx GELU used in-kernel.
    gelu = partial(jax.nn.gelu, approximate=True)

    def load(name):                                  # aligned row-block load(s)
        parts = [p_ref[off:off + r, 0:c] for off, r, c in meta[name]]
        return parts[0] if len(parts) == 1 else jnp.concatenate(parts, axis=1)

    def wb(name):                                    # weight / bias split in vregs
        m = load(name)
        return m[:, :-1], m[:, -1:]

    def linear(xin, name):                           # feature-major (F_in,n)->(F_out,n)
        w, b = wb(name)
        return jnp.dot(w, xin, preferred_element_type=f32) + b

    # ---- constants hoisted once from the single packed buffer ----
    g3_full = load('c.g3_full')
    g5_down = load('c.g5_down')
    g3_half = load('c.g3_half')
    g3_up = load('c.g3_up')
    bm = load('c.bm')                                # (Nh, B)  per-batch time sum
    bmt = load('c.bmt')                              # (B, Nh)  broadcast over time
    gn_c = {CH1: (load('c.a2_%d' % CH1), load('c.at2_%d' % CH1)),
            2 * CH1: (load('c.a2_%d' % (2 * CH1)), load('c.at2_%d' % (2 * CH1)))}

    def conv(xin, wname, gathers, K, n_out):
        # K block-diagonal tap gathers (padding / stride / upsample folded in
        # host-side) + one im2col MXU matmul for the whole batch.
        cols = jnp.concatenate(
            [jnp.dot(xin, gathers[:, k * n_out:(k + 1) * n_out],
                     preferred_element_type=f32) for k in range(K)], axis=0)
        w, b = wb(wname)
        return jnp.dot(w, cols, preferred_element_type=f32) + b

    def group_norm_silu(xin, name, silu=True):
        C = xin.shape[0]
        a2, at2 = gn_c[C]
        gb = load(name)                                      # (C, 2) gamma | beta
        r = jnp.concatenate([xin, xin * xin], axis=0)        # (2C, Nh)
        s = jnp.dot(r, bm, preferred_element_type=f32)       # per-(channel,batch) sums
        g = jnp.dot(a2, s, preferred_element_type=f32)       # (2G, B): mean ; mean(x^2)
        m, m2 = g[0:GROUPS], g[GROUPS:2 * GROUPS]
        inv = jax.lax.rsqrt(m2 - m * m + GN_EPS)
        st = jnp.concatenate([inv, -m * inv], axis=0)        # (2G, B): scale ; shift
        full = jnp.dot(jnp.dot(at2, st, preferred_element_type=f32), bmt,
                       preferred_element_type=f32)           # (2C, Nh) broadcast back
        y = (xin * full[0:C] + full[C:2 * C]) * gb[:, 0:1] + gb[:, 1:2]
        if silu:
            y = y * jax.nn.sigmoid(y)                        # SiLU fused
        return y

    def resnet(xin, prefix, mapping_b, has_proj):
        m_full = linear(mapping_b, prefix + '.map')          # (C_out, Nh)
        h = group_norm_silu(xin, prefix + '.gn1')
        h = conv(h, prefix + '.conv1', g3_half, 3, Nh)
        h = h + m_full
        h = group_norm_silu(h, prefix + '.gn2')
        h = conv(h, prefix + '.conv2', g3_half, 3, Nh)
        if has_proj:                                         # 1x1 residual projection
            w, b = wb(prefix + '.res')
            xin = jnp.dot(w, xin, preferred_element_type=f32) + b
        return h + xin

    # ---- mapping MLP, feature-major (CMF, B) ----
    mapping = gelu(linear(temb_ref[...], 'to_time'))
    if has_feat:
        mapping = mapping + gelu(linear(feat_ref[...], 'to_feat'))
    mapping = gelu(linear(mapping, 'map1'))
    mapping = gelu(linear(mapping, 'map2'))
    # silu + broadcast each batch's mapping column over its time lanes, ONCE.
    mapping_b = jnp.dot(jax.nn.silu(mapping), bmt, preferred_element_type=f32)  # (CMF, Nh)

    # ---- UNet body on a single (C, B*T) slab ----
    h = x_ref[...]                                           # (4, N)
    if has_cond:
        c = cond_ref[...]                                    # (2, B*T_cond)
        if T_cond != T:
            c = jnp.dot(c, load('c.interp'), preferred_element_type=f32)  # nearest interp
        h = jnp.concatenate([h, c], axis=0)                  # (6, N)

    h = conv(h, 'to_in', g3_full, 3, N)                      # (16, N)
    h = conv(h, 'down', g5_down, 5, Nh)                      # (32, Nh) stride-2 in gathers
    h = resnet(h, 'd_res', mapping_b, has_proj=False)
    skip = h
    h = resnet(h, 'mid_res', mapping_b, has_proj=False)
    h = jnp.concatenate([h, skip * (2.0 ** -0.5)], axis=0)   # (64, Nh) skip concat
    h = resnet(h, 'u_res', mapping_b, has_proj=True)         # (32, Nh)
    h = conv(h, 'up', g3_up, 3, N)                           # (16, N)  x2 nearest in gathers
    out = conv(h, 'to_out', g3_full, 3, N)                   # (4, N)

    # single dense (out_rows, out_cols) store; wrapper slices / reshapes.
    if out_rows > out.shape[0]:
        out = jnp.concatenate(
            [out, jnp.zeros((out_rows - out.shape[0], N), f32)], axis=0)
    if out_cols > N:
        out = jnp.concatenate(
            [out, jnp.zeros((out_rows, out_cols - N), f32)], axis=1)
    o_ref[...] = out


# ------------------------------ forward wrapper ------------------------------

def sinusoidal_embedding(t, dim):
    half = dim // 2
    scale = math.log(10000.0) / (half - 1)
    freqs = jnp.exp(-scale * jnp.arange(half, dtype=jnp.float32))
    ang = t.astype(jnp.float32)[:, None] * freqs[None, :]
    return jnp.concatenate([jnp.sin(ang), jnp.cos(ang)], axis=-1)


def unet1d_cond_wrapper_forward(params, x, t, *, input_concat_cond=None,
                                global_cond=None, **kwargs):
    """Mirrors UNet1DCondWrapper.forward; the whole UNet runs in ONE pallas_call."""
    B, _, T = x.shape
    B, T = int(B), int(T)
    has_feat = global_cond is not None
    has_cond = input_concat_cond is not None          # to_in expects concat channels
    T_cond = int(input_concat_cond.shape[2]) if has_cond else 0

    consts = make_consts(B, T, T_cond, has_cond)
    packed, meta = pack_params(params, consts)

    temb_t = sinusoidal_embedding(t, BASE_CH).T.astype(jnp.float32)        # (BASE_CH, B)
    x_slab = jnp.transpose(x.astype(jnp.float32), (1, 0, 2)).reshape(IN_CHANNELS, B * T)

    args = [temb_t]
    if has_feat:
        args.append(global_cond.astype(jnp.float32).T)                     # (F, B)
    if has_cond:
        args.append(jnp.transpose(input_concat_cond.astype(jnp.float32),
                                  (1, 0, 2)).reshape(CONCAT_CHANNELS, B * T_cond))
    args += [x_slab, packed]

    N = B * T
    out_rows = -(-IN_CHANNELS // ROW_ALIGN) * ROW_ALIGN
    out_cols = -(-N // LANES) * LANES

    kernel = partial(_fused_unet_kernel, meta=meta, B=B, T=T, T_cond=T_cond,
                     has_feat=has_feat, has_cond=has_cond,
                     out_rows=out_rows, out_cols=out_cols)
    vmem = pl.BlockSpec(memory_space=pltpu.MemorySpace.VMEM)
    raw = pl.pallas_call(
        kernel,
        out_shape=jax.ShapeDtypeStruct((out_rows, out_cols), jnp.float32),
        in_specs=[vmem] * len(args),
        out_specs=vmem,
    )(*args)
    out = raw[:IN_CHANNELS, :N].reshape(IN_CHANNELS, B, T)
    return jnp.transpose(out, (1, 0, 2))               # (B, C, T)


# ---------------------------------- main -------------------------------------

if __name__ == "__main__":
    key = jax.random.PRNGKey(0)
    k_p, k_x, k_c, k_g = jax.random.split(key, 4)

    B, T = 2, 16
    params = init_params(k_p)

    x = jax.random.normal(k_x, (B, IN_CHANNELS, T), jnp.float32)
    t = jnp.array([0.3, 0.7], jnp.float32)                       # diffusion timestep
    input_concat_cond = jax.random.normal(k_c, (B, CONCAT_CHANNELS, 8), jnp.float32)
    global_cond = jax.random.normal(k_g, (B, CONTEXT_FEATURES), jnp.float32)

    fwd = jax.jit(unet1d_cond_wrapper_forward)
    out = fwd(params, x, t,
              input_concat_cond=input_concat_cond,
              global_cond=global_cond)
    out = jax.block_until_ready(out)

    assert out.shape == (B, IN_CHANNELS, T), out.shape
    assert bool(jnp.all(jnp.isfinite(out)))
    print("KERNEL_OK")
</pallas_src>

<mosaic_0001>
module attributes {stable_mosaic.version = 11 : i64} {
  func.func @_fused_unet_kernel(%arg0: memref<16x2xf32, #tpu.memory_space<vmem>>, %arg1: memref<16x2xf32, #tpu.memory_space<vmem>>, %arg2: memref<2x16xf32, #tpu.memory_space<vmem>>, %arg3: memref<4x32xf32, #tpu.memory_space<vmem>>, %arg4: memref<1248x128xf32, #tpu.memory_space<vmem>>, %arg5: memref<8x128xf32, #tpu.memory_space<vmem>>) attributes {dimension_semantics = [], scalar_prefetch = 0 : i64, scratch_operands = 0 : i64, tpu.core_type = #tpu.core_type<tc>} {
    %c904 = arith.constant 904 : index
    %c0 = arith.constant 0 : index
    %0 = vector.load %arg4[%c904, %c0] : memref<1248x128xf32, #tpu.memory_space<vmem>>, vector<32x96xf32>
    %c936 = arith.constant 936 : index
    %c0_0 = arith.constant 0 : index
    %1 = vector.load %arg4[%c936, %c0_0] : memref<1248x128xf32, #tpu.memory_space<vmem>>, vector<32x80xf32>
    %c968 = arith.constant 968 : index
    %c0_1 = arith.constant 0 : index
    %2 = vector.load %arg4[%c968, %c0_1] : memref<1248x128xf32, #tpu.memory_space<vmem>>, vector<16x48xf32>
    %c984 = arith.constant 984 : index
    %c0_2 = arith.constant 0 : index
    %3 = vector.load %arg4[%c984, %c0_2] : memref<1248x128xf32, #tpu.memory_space<vmem>>, vector<16x96xf32>
    %c1000 = arith.constant 1000 : index
    %c0_3 = arith.constant 0 : index
    %4 = vector.load %arg4[%c1000, %c0_3] : memref<1248x128xf32, #tpu.memory_space<vmem>>, vector<16x2xf32>
    %c1016 = arith.constant 1016 : index
    %c0_4 = arith.constant 0 : index
    %5 = vector.load %arg4[%c1016, %c0_4] : memref<1248x128xf32, #tpu.memory_space<vmem>>, vector<2x16xf32>
    %c1024 = arith.constant 1024 : index
    %c0_5 = arith.constant 0 : index
    %6 = vector.load %arg4[%c1024, %c0_5] : memref<1248x128xf32, #tpu.memory_space<vmem>>, vector<8x64xf32>
    %c1032 = arith.constant 1032 : index
    %c0_6 = arith.constant 0 : index
    %7 = vector.load %arg4[%c1032, %c0_6] : memref<1248x128xf32, #tpu.memory_space<vmem>>, vector<64x8xf32>
    %c1096 = arith.constant 1096 : index
    %c0_7 = arith.constant 0 : index
    %8 = vector.load %arg4[%c1096, %c0_7] : memref<1248x128xf32, #tpu.memory_space<vmem>>, vector<8x128xf32>
    %c1104 = arith.constant 1104 : index
    %c0_8 = arith.constant 0 : index
    %9 = vector.load %arg4[%c1104, %c0_8] : memref<1248x128xf32, #tpu.memory_space<vmem>>, vector<128x8xf32>
    %c0_9 = arith.constant 0 : index
    %c0_10 = arith.constant 0 : index
    %10 = vector.load %arg0[%c0_9, %c0_10] : memref<16x2xf32, #tpu.memory_space<vmem>>, vector<16x2xf32>
    %c0_11 = arith.constant 0 : index
    %c0_12 = arith.constant 0 : index
    %11 = vector.load %arg4[%c0_11, %c0_12] : memref<1248x128xf32, #tpu.memory_space<vmem>>, vector<64x17xf32>
    %12 = vector.extract_strided_slice %11 {offsets = [0, 0], sizes = [64, 16], strides = [1, 1]} : vector<64x17xf32> to vector<64x16xf32>
    %13 = vector.extract_strided_slice %11 {offsets = [0, 16], sizes = [64, 1], strides = [1, 1]} : vector<64x17xf32> to vector<64x1xf32>
    %cst = arith.constant dense<0.000000e+00> : vector<64x2xf32>
    %14 = tpu.matmul %12, %10, %cst {dimension_numbers = #tpu.dot_dimension_numbers<[1], [0], [0], [1], [0, 0, 1, 1], [], []>} : vector<64x16xf32>, vector<16x2xf32>, vector<64x2xf32> -> vector<64x2xf32>
    %15 = vector.broadcast %13 : vector<64x1xf32> to vector<64x2xf32>
    %16 = arith.addf %14, %15 : vector<64x2xf32>
    %17 = arith.mulf %16, %16 : vector<64x2xf32>
    %18 = arith.mulf %16, %17 : vector<64x2xf32>
    %cst_13 = arith.constant 4.471500e-02 : f32
    %19 = vector.broadcast %cst_13 : f32 to vector<64x2xf32>
    %20 = arith.mulf %19, %18 : vector<64x2xf32>
    %21 = arith.addf %16, %20 : vector<64x2xf32>
    %cst_14 = arith.constant 0.797884583 : f32
    %22 = vector.broadcast %cst_14 : f32 to vector<64x2xf32>
    %23 = arith.mulf %22, %21 : vector<64x2xf32>
    %24 = math.tanh %23 : vector<64x2xf32>
    %cst_15 = arith.constant 1.000000e+00 : f32
    %25 = vector.broadcast %cst_15 : f32 to vector<64x2xf32>
    %26 = arith.addf %25, %24 : vector<64x2xf32>
    %cst_16 = arith.constant 5.000000e-01 : f32
    %27 = vector.broadcast %cst_16 : f32 to vector<64x2xf32>
    %28 = arith.mulf %27, %26 : vector<64x2xf32>
    %29 = arith.mulf %16, %28 : vector<64x2xf32>
    %c0_17 = arith.constant 0 : index
    %c0_18 = arith.constant 0 : index
    %30 = vector.load %arg1[%c0_17, %c0_18] : memref<16x2xf32, #tpu.memory_space<vmem>>, vector<16x2xf32>
    %c64 = arith.constant 64 : index
    %c0_19 = arith.constant 0 : index
    %31 = vector.load %arg4[%c64, %c0_19] : memref<1248x128xf32, #tpu.memory_space<vmem>>, vector<64x17xf32>
    %32 = vector.extract_strided_slice %31 {offsets = [0, 0], sizes = [64, 16], strides = [1, 1]} : vector<64x17xf32> to vector<64x16xf32>
    %33 = vector.extract_strided_slice %31 {offsets = [0, 16], sizes = [64, 1], strides = [1, 1]} : vector<64x17xf32> to vector<64x1xf32>
    %cst_20 = arith.constant dense<0.000000e+00> : vector<64x2xf32>
    %34 = tpu.matmul %32, %30, %cst_20 {dimension_numbers = #tpu.dot_dimension_numbers<[1], [0], [0], [1], [0, 0, 1, 1], [], []>} : vector<64x16xf32>, vector<16x2xf32>, vector<64x2xf32> -> vector<64x2xf32>
    %35 = vector.broadcast %33 : vector<64x1xf32> to vector<64x2xf32>
    %36 = arith.addf %34, %35 : vector<64x2xf32>
    %37 = arith.mulf %36, %36 : vector<64x2xf32>
    %38 = arith.mulf %36, %37 : vector<64x2xf32>
    %cst_21 = arith.constant 4.471500e-02 : f32
    %39 = vector.broadcast %cst_21 : f32 to vector<64x2xf32>
    %40 = arith.mulf %39, %38 : vector<64x2xf32>
    %41 = arith.addf %36, %40 : vector<64x2xf32>
    %cst_22 = arith.constant 0.797884583 : f32
    %42 = vector.broadcast %cst_22 : f32 to vector<64x2xf32>
    %43 = arith.mulf %42, %41 : vector<64x2xf32>
    %44 = math.tanh %43 : vector<64x2xf32>
    %cst_23 = arith.constant 1.000000e+00 : f32
    %45 = vector.broadcast %cst_23 : f32 to vector<64x2xf32>
    %46 = arith.addf %45, %44 : vector<64x2xf32>
    %cst_24 = arith.constant 5.000000e-01 : f32
    %47 = vector.broadcast %cst_24 : f32 to vector<64x2xf32>
    %48 = arith.mulf %47, %46 : vector<64x2xf32>
    %49 = arith.mulf %36, %48 : vector<64x2xf32>
    %50 = arith.addf %29, %49 : vector<64x2xf32>
    %c128 = arith.constant 128 : index
    %c0_25 = arith.constant 0 : index
    %51 = vector.load %arg4[%c128, %c0_25] : memref<1248x128xf32, #tpu.memory_space<vmem>>, vector<64x65xf32>
    %52 = vector.extract_strided_slice %51 {offsets = [0, 0], sizes = [64, 64], strides = [1, 1]} : vector<64x65xf32> to vector<64x64xf32>
    %53 = vector.extract_strided_slice %51 {offsets = [0, 64], sizes = [64, 1], strides = [1, 1]} : vector<64x65xf32> to vector<64x1xf32>
    %cst_26 = arith.constant dense<0.000000e+00> : vector<64x2xf32>
    %54 = tpu.matmul %52, %50, %cst_26 {dimension_numbers = #tpu.dot_dimension_numbers<[1], [0], [0], [1], [0, 0, 1, 1], [], []>} : vector<64x64xf32>, vector<64x2xf32>, vector<64x2xf32> -> vector<64x2xf32>
    %55 = vector.broadcast %53 : vector<64x1xf32> to vector<64x2xf32>
    %56 = arith.addf %54, %55 : vector<64x2xf32>
    %57 = arith.mulf %56, %56 : vector<64x2xf32>
    %58 = arith.mulf %56, %57 : vector<64x2xf32>
    %cst_27 = arith.constant 4.471500e-02 : f32
    %59 = vector.broadcast %cst_27 : f32 to vector<64x2xf32>
    %60 = arith.mulf %59, %58 : vector<64x2xf32>
    %61 = arith.addf %56, %60 : vector<64x2xf32>
    %cst_28 = arith.constant 0.797884583 : f32
    %62 = vector.broadcast %cst_28 : f32 to vector<64x2xf32>
    %63 = arith.mulf %62, %61 : vector<64x2xf32>
    %64 = math.tanh %63 : vector<64x2xf32>
    %cst_29 = arith.constant 1.000000e+00 : f32
    %65 = vector.broadcast %cst_29 : f32 to vector<64x2xf32>
    %66 = arith.addf %65, %64 : vector<64x2xf32>
    %cst_30 = arith.constant 5.000000e-01 : f32
    %67 = vector.broadcast %cst_30 : f32 to vector<64x2xf32>
    %68 = arith.mulf %67, %66 : vector<64x2xf32>
    %69 = arith.mulf %56, %68 : vector<64x2xf32>
    %c192 = arith.constant 192 : index
    %c0_31 = arith.constant 0 : index
    %70 = vector.load %arg4[%c192, %c0_31] : memref<1248x128xf32, #tpu.memory_space<vmem>>, vector<64x65xf32>
    %71 = vector.extract_strided_slice %70 {offsets = [0, 0], sizes = [64, 64], strides = [1, 1]} : vector<64x65xf32> to vector<64x64xf32>
    %72 = vector.extract_strided_slice %70 {offsets = [0, 64], sizes = [64, 1], strides = [1, 1]} : vector<64x65xf32> to vector<64x1xf32>
    %cst_32 = arith.constant dense<0.000000e+00> : vector<64x2xf32>
    %73 = tpu.matmul %71, %69, %cst_32 {dimension_numbers = #tpu.dot_dimension_numbers<[1], [0], [0], [1], [0, 0, 1, 1], [], []>} : vector<64x64xf32>, vector<64x2xf32>, vector<64x2xf32> -> vector<64x2xf32>
    %74 = vector.broadcast %72 : vector<64x1xf32> to vector<64x2xf32>
    %75 = arith.addf %73, %74 : vector<64x2xf32>
    %76 = arith.mulf %75, %75 : vector<64x2xf32>
    %77 = arith.mulf %75, %76 : vector<64x2xf32>
    %cst_33 = arith.constant 4.471500e-02 : f32
    %78 = vector.broadcast %cst_33 : f32 to vector<64x2xf32>
    %79 = arith.mulf %78, %77 : vector<64x2xf32>
    %80 = arith.addf %75, %79 : vector<64x2xf32>
    %cst_34 = arith.constant 0.797884583 : f32
    %81 = vector.broadcast %cst_34 : f32 to vector<64x2xf32>
    %82 = arith.mulf %81, %80 : vector<64x2xf32>
    %83 = math.tanh %82 : vector<64x2xf32>
    %cst_35 = arith.constant 1.000000e+00 : f32
    %84 = vector.broadcast %cst_35 : f32 to vector<64x2xf32>
    %85 = arith.addf %84, %83 : vector<64x2xf32>
    %cst_36 = arith.constant 5.000000e-01 : f32
    %86 = vector.broadcast %cst_36 : f32 to vector<64x2xf32>
    %87 = arith.mulf %86, %85 : vector<64x2xf32>
    %88 = arith.mulf %75, %87 : vector<64x2xf32>
    %89 = arith.negf %88 : vector<64x2xf32>
    %90 = math.exp %89 : vector<64x2xf32>
    %cst_37 = arith.constant 1.000000e+00 : f32
    %91 = vector.broadcast %cst_37 : f32 to vector<64x2xf32>
    %92 = arith.addf %91, %90 : vector<64x2xf32>
    %93 = arith.divf %91, %92 : vector<64x2xf32>
    %94 = arith.mulf %88, %93 : vector<64x2xf32>
    %cst_38 = arith.constant dense<0.000000e+00> : vector<64x16xf32>
    %95 = tpu.matmul %94, %5, %cst_38 {dimension_numbers = #tpu.dot_dimension_numbers<[1], [0], [0], [1], [0, 0, 1, 1], [], []>} : vector<64x2xf32>, vector<2x16xf32>, vector<64x16xf32> -> vector<64x16xf32>
    %c0_39 = arith.constant 0 : index
    %c0_40 = arith.constant 0 : index
    %96 = vector.load %arg3[%c0_39, %c0_40] : memref<4x32xf32, #tpu.memory_space<vmem>>, vector<4x32xf32>
    %c0_41 = arith.constant 0 : index
    %c0_42 = arith.constant 0 : index
    %97 = vector.load %arg2[%c0_41, %c0_42] : memref<2x16xf32, #tpu.memory_space<vmem>>, vector<2x16xf32>
    %c1232 = arith.constant 1232 : index
    %c0_43 = arith.constant 0 : index
    %98 = vector.load %arg4[%c1232, %c0_43] : memref<1248x128xf32, #tpu.memory_space<vmem>>, vector<16x32xf32>
    %cst_44 = arith.constant dense<0.000000e+00> : vector<2x32xf32>
    %99 = tpu.matmul %97, %98, %cst_44 {dimension_numbers = #tpu.dot_dimension_numbers<[1], [0], [0], [1], [0, 0, 1, 1], [], []>} : vector<2x16xf32>, vector<16x32xf32>, vector<2x32xf32> -> vector<2x32xf32>
    %100 = tpu.concatenate %96, %99 in 0 : vector<4x32xf32>, vector<2x32xf32> -> vector<6x32xf32>
    %101 = vector.extract_strided_slice %0 {offsets = [0, 0], sizes = [32, 32], strides = [1, 1]} : vector<32x96xf32> to vector<32x32xf32>
    %cst_45 = arith.constant dense<0.000000e+00> : vector<6x32xf32>
    %102 = tpu.matmul %100, %101, %cst_45 {dimension_numbers = #tpu.dot_dimension_numbers<[1], [0], [0], [1], [0, 0, 1, 1], [], []>} : vector<6x32xf32>, vector<32x32xf32>, vector<6x32xf32> -> vector<6x32xf32>
    %103 = vector.extract_strided_slice %0 {offsets = [0, 32], sizes = [32, 32], strides = [1, 1]} : vector<32x96xf32> to vector<32x32xf32>
    %cst_46 = arith.constant dense<0.000000e+00> : vector<6x32xf32>
    %104 = tpu.matmul %100, %103, %cst_46 {dimension_numbers = #tpu.dot_dimension_numbers<[1], [0], [0], [1], [0, 0, 1, 1], [], []>} : vector<6x32xf32>, vector<32x32xf32>, vector<6x32xf32> -> vector<6x32xf32>
    %105 = vector.extract_strided_slice %0 {offsets = [0, 64], sizes = [32, 32], strides = [1, 1]} : vector<32x96xf32> to vector<32x32xf32>
    %cst_47 = arith.constant dense<0.000000e+00> : vector<6x32xf32>
    %106 = tpu.matmul %100, %105, %cst_47 {dimension_numbers = #tpu.dot_dimension_numbers<[1], [0], [0], [1], [0, 0, 1, 1], [], []>} : vector<6x32xf32>, vector<32x32xf32>, vector<6x32xf32> -> vector<6x32xf32>
    %107 = tpu.concatenate %102, %104, %106 in 0 : vector<6x32xf32>, vector<6x32xf32>, vector<6x32xf32> -> vector<18x32xf32>
    %c256 = arith.constant 256 : index
    %c0_48 = arith.constant 0 : index
    %108 = vector.load %arg4[%c256, %c0_48] : memref<1248x128xf32, #tpu.memory_space<vmem>>, vector<16x19xf32>
    %109 = vector.extract_strided_slice %108 {offsets = [0, 0], sizes = [16, 18], strides = [1, 1]} : vector<16x19xf32> to vector<16x18xf32>
    %110 = vector.extract_strided_slice %108 {offsets = [0, 18], sizes = [16, 1], strides = [1, 1]} : vector<16x19xf32> to vector<16x1xf32>
    %cst_49 = arith.constant dense<0.000000e+00> : vector<16x32xf32>
    %111 = tpu.matmul %109, %107, %cst_49 {dimension_numbers = #tpu.dot_dimension_numbers<[1], [0], [0], [1], [0, 0, 1, 1], [], []>} : vector<16x18xf32>, vector<18x32xf32>, vector<16x32xf32> -> vector<16x32xf32>
    %112 = vector.broadcast %110 : vector<16x1xf32> to vector<16x32xf32>
    %113 = arith.addf %111, %112 : vector<16x32xf32>
    %114 = vector.extract_strided_slice %1 {offsets = [0, 0], sizes = [32, 16], strides = [1, 1]} : vector<32x80xf32> to vector<32x16xf32>
    %cst_50 = arith.constant dense<0.000000e+00> : vector<16x16xf32>
    %115 = tpu.matmul %113, %114, %cst_50 {dimension_numbers = #tpu.dot_dimension_numbers<[1], [0], [0], [1], [0, 0, 1, 1], [], []>} : vector<16x32xf32>, vector<32x16xf32>, vector<16x16xf32> -> vector<16x16xf32>
    %116 = vector.extract_strided_slice %1 {offsets = [0, 16], sizes = [32, 16], strides = [1, 1]} : vector<32x80xf32> to vector<32x16xf32>
    %cst_51 = arith.constant dense<0.000000e+00> : vector<16x16xf32>
    %117 = tpu.matmul %113, %116, %cst_51 {dimension_numbers = #tpu.dot_dimension_numbers<[1], [0], [0], [1], [0, 0, 1, 1], [], []>} : vector<16x32xf32>, vector<32x16xf32>, vector<16x16xf32> -> vector<16x16xf32>
    %118 = vector.extract_strided_slice %1 {offsets = [0, 32], sizes = [32, 16], strides = [1, 1]} : vector<32x80xf32> to vector<32x16xf32>
    %cst_52 = arith.constant dense<0.000000e+00> : vector<16x16xf32>
    %119 = tpu.matmul %113, %118, %cst_52 {dimension_numbers = #tpu.dot_dimension_numbers<[1], [0], [0], [1], [0, 0, 1, 1], [], []>} : vector<16x32xf32>, vector<32x16xf32>, vector<16x16xf32> -> vector<16x16xf32>
    %120 = vector.extract_strided_slice %1 {offsets = [0, 48], sizes = [32, 16], strides = [1, 1]} : vector<32x80xf32> to vector<32x16xf32>
    %cst_53 = arith.constant dense<0.000000e+00> : vector<16x16xf32>
    %121 = tpu.matmul %113, %120, %cst_53 {dimension_numbers = #tpu.dot_dimension_numbers<[1], [0], [0], [1], [0, 0, 1, 1], [], []>} : vector<16x32xf32>, vector<32x16xf32>, vector<16x16xf32> -> vector<16x16xf32>
    %122 = vector.extract_strided_slice %1 {offsets = [0, 64], sizes = [32, 16], strides = [1, 1]} : vector<32x80xf32> to vector<32x16xf32>
    %cst_54 = arith.constant dense<0.000000e+00> : vector<16x16xf32>
    %123 = tpu.matmul %113, %122, %cst_54 {dimension_numbers = #tpu.dot_dimension_numbers<[1], [0], [0], [1], [0, 0, 1, 1], [], []>} : vector<16x32xf32>, vector<32x16xf32>, vector<16x16xf32> -> vector<16x16xf32>
    %124 = tpu.concatenate %115, %117, %119, %121, %123 in 0 : vector<16x16xf32>, vector<16x16xf32>, vector<16x16xf32>, vector<16x16xf32>, vector<16x16xf32> -> vector<80x16xf32>
    %c272 = arith.constant 272 : index
    %c0_55 = arith.constant 0 : index
    %125 = vector.load %arg4[%c272, %c0_55] : memref<1248x128xf32, #tpu.memory_space<vmem>>, vector<32x81xf32>
    %126 = vector.extract_strided_slice %125 {offsets = [0, 0], sizes = [32, 80], strides = [1, 1]} : vector<32x81xf32> to vector<32x80xf32>
    %127 = vector.extract_strided_slice %125 {offsets = [0, 80], sizes = [32, 1], strides = [1, 1]} : vector<32x81xf32> to vector<32x1xf32>
    %cst_56 = arith.constant dense<0.000000e+00> : vector<32x16xf32>
    %128 = tpu.matmul %126, %124, %cst_56 {dimension_numbers = #tpu.dot_dimension_numbers<[1], [0], [0], [1], [0, 0, 1, 1], [], []>} : vector<32x80xf32>, vector<80x16xf32>, vector<32x16xf32> -> vector<32x16xf32>
    %129 = vector.broadcast %127 : vector<32x1xf32> to vector<32x16xf32>
    %130 = arith.addf %128, %129 : vector<32x16xf32>
    %c392 = arith.constant 392 : index
    %c0_57 = arith.constant 0 : index
    %131 = vector.load %arg4[%c392, %c0_57] : memref<1248x128xf32, #tpu.memory_space<vmem>>, vector<32x65xf32>
    %132 = vector.extract_strided_slice %131 {offsets = [0, 0], sizes = [32, 64], strides = [1, 1]} : vector<32x65xf32> to vector<32x64xf32>
    %133 = vector.extract_strided_slice %131 {offsets = [0, 64], sizes = [32, 1], strides = [1, 1]} : vector<32x65xf32> to vector<32x1xf32>
    %cst_58 = arith.constant dense<0.000000e+00> : vector<32x16xf32>
    %134 = tpu.matmul %132, %95, %cst_58 {dimension_numbers = #tpu.dot_dimension_numbers<[1], [0], [0], [1], [0, 0, 1, 1], [], []>} : vector<32x64xf32>, vector<64x16xf32>, vector<32x16xf32> -> vector<32x16xf32>
    %135 = vector.broadcast %133 : vector<32x1xf32> to vector<32x16xf32>
    %136 = arith.addf %134, %135 : vector<32x16xf32>
    %c328 = arith.constant 328 : index
    %c0_59 = arith.constant 0 : index
    %137 = vector.load %arg4[%c328, %c0_59] : memref<1248x128xf32, #tpu.memory_space<vmem>>, vector<32x2xf32>
    %138 = arith.mulf %130, %130 : vector<32x16xf32>
    %139 = tpu.concatenate %130, %138 in 0 : vector<32x16xf32>, vector<32x16xf32> -> vector<64x16xf32>
    %cst_60 = arith.constant dense<0.000000e+00> : vector<64x2xf32>
    %140 = tpu.matmul %139, %4, %cst_60 {dimension_numbers = #tpu.dot_dimension_numbers<[1], [0], [0], [1], [0, 0, 1, 1], [], []>} : vector<64x16xf32>, vector<16x2xf32>, vector<64x2xf32> -> vector<64x2xf32>
    %cst_61 = arith.constant dense<0.000000e+00> : vector<8x2xf32>
    %141 = tpu.matmul %6, %140, %cst_61 {dimension_numbers = #tpu.dot_dimension_numbers<[1], [0], [0], [1], [0, 0, 1, 1], [], []>} : vector<8x64xf32>, vector<64x2xf32>, vector<8x2xf32> -> vector<8x2xf32>
    %142 = vector.extract_strided_slice %141 {offsets = [0, 0], sizes = [4, 2], strides = [1, 1]} : vector<8x2xf32> to vector<4x2xf32>
    %143 = vector.extract_strided_slice %141 {offsets = [4, 0], sizes = [4, 2], strides = [1, 1]} : vector<8x2xf32> to vector<4x2xf32>
    %144 = arith.mulf %142, %142 : vector<4x2xf32>
    %145 = arith.subf %143, %144 : vector<4x2xf32>
    %cst_62 = arith.constant 9.99999974E-6 : f32
    %146 = vector.broadcast %cst_62 : f32 to vector<4x2xf32>
    %147 = arith.addf %145, %146 : vector<4x2xf32>
    %148 = math.rsqrt %147 : vector<4x2xf32>
    %cst_63 = arith.constant 0.000000e+00 : f32
    %149 = vector.broadcast %cst_63 : f32 to vector<4x2xf32>
    %150 = arith.subf %149, %142 : vector<4x2xf32>
    %151 = arith.mulf %150, %148 : vector<4x2xf32>
    %152 = tpu.concatenate %148, %151 in 0 : vector<4x2xf32>, vector<4x2xf32> -> vector<8x2xf32>
    %cst_64 = arith.constant dense<0.000000e+00> : vector<64x2xf32>
    %153 = tpu.matmul %7, %152, %cst_64 {dimension_numbers = #tpu.dot_dimension_numbers<[1], [0], [0], [1], [0, 0, 1, 1], [], []>} : vector<64x8xf32>, vector<8x2xf32>, vector<64x2xf32> -> vector<64x2xf32>
    %cst_65 = arith.constant dense<0.000000e+00> : vector<64x16xf32>
    %154 = tpu.matmul %153, %5, %cst_65 {dimension_numbers = #tpu.dot_dimension_numbers<[1], [0], [0], [1], [0, 0, 1, 1], [], []>} : vector<64x2xf32>, vector<2x16xf32>, vector<64x16xf32> -> vector<64x16xf32>
    %155 = vector.extract_strided_slice %154 {offsets = [0, 0], sizes = [32, 16], strides = [1, 1]} : vector<64x16xf32> to vector<32x16xf32>
    %156 = arith.mulf %130, %155 : vector<32x16xf32>
    %157 = vector.extract_strided_slice %154 {offsets = [32, 0], sizes = [32, 16], strides = [1, 1]} : vector<64x16xf32> to vector<32x16xf32>
    %158 = arith.addf %156, %157 : vector<32x16xf32>
    %159 = vector.extract_strided_slice %137 {offsets = [0, 0], sizes = [32, 1], strides = [1, 1]} : vector<32x2xf32> to vector<32x1xf32>
    %160 = vector.broadcast %159 : vector<32x1xf32> to vector<32x16xf32>
    %161 = arith.mulf %158, %160 : vector<32x16xf32>
    %162 = vector.extract_strided_slice %137 {offsets = [0, 1], sizes = [32, 1], strides = [1, 1]} : vector<32x2xf32> to vector<32x1xf32>
    %163 = vector.broadcast %162 : vector<32x1xf32> to vector<32x16xf32>
    %164 = arith.addf %161, %163 : vector<32x16xf32>
    %165 = arith.negf %164 : vector<32x16xf32>
    %166 = math.exp %165 : vector<32x16xf32>
    %cst_66 = arith.constant 1.000000e+00 : f32
    %167 = vector.broadcast %cst_66 : f32 to vector<32x16xf32>
    %168 = arith.addf %167, %166 : vector<32x16xf32>
    %169 = arith.divf %167, %168 : vector<32x16xf32>
    %170 = arith.mulf %164, %169 : vector<32x16xf32>
    %171 = vector.extract_strided_slice %2 {offsets = [0, 0], sizes = [16, 16], strides = [1, 1]} : vector<16x48xf32> to vector<16x16xf32>
    %cst_67 = arith.constant dense<0.000000e+00> : vector<32x16xf32>
    %172 = tpu.matmul %170, %171, %cst_67 {dimension_numbers = #tpu.dot_dimension_numbers<[1], [0], [0], [1], [0, 0, 1, 1], [], []>} : vector<32x16xf32>, vector<16x16xf32>, vector<32x16xf32> -> vector<32x16xf32>
    %173 = vector.extract_strided_slice %2 {offsets = [0, 16], sizes = [16, 16], strides = [1, 1]} : vector<16x48xf32> to vector<16x16xf32>
    %cst_68 = arith.constant dense<0.000000e+00> : vector<32x16xf32>
    %174 = tpu.matmul %170, %173, %cst_68 {dimension_numbers = #tpu.dot_dimension_numbers<[1], [0], [0], [1], [0, 0, 1, 1], [], []>} : vector<32x16xf32>, vector<16x16xf32>, vector<32x16xf32> -> vector<32x16xf32>
    %175 = vector.extract_strided_slice %2 {offsets = [0, 32], sizes = [16, 16], strides = [1, 1]} : vector<16x48xf32> to vector<16x16xf32>
    %cst_69 = arith.constant dense<0.000000e+00> : vector<32x16xf32>
    %176 = tpu.matmul %170, %175, %cst_69 {dimension_numbers = #tpu.dot_dimension_numbers<[1], [0], [0], [1], [0, 0, 1, 1], [], []>} : vector<32x16xf32>, vector<16x16xf32>, vector<32x16xf32> -> vector<32x16xf32>
    %177 = tpu.concatenate %172, %174, %176 in 0 : vector<32x16xf32>, vector<32x16xf32>, vector<32x16xf32> -> vector<96x16xf32>
    %c360 = arith.constant 360 : index
    %c0_70 = arith.constant 0 : index
    %178 = vector.load %arg4[%c360, %c0_70] : memref<1248x128xf32, #tpu.memory_space<vmem>>, vector<32x97xf32>
    %179 = vector.extract_strided_slice %178 {offsets = [0, 0], sizes = [32, 96], strides = [1, 1]} : vector<32x97xf32> to vector<32x96xf32>
    %180 = vector.extract_strided_slice %178 {offsets = [0, 96], sizes = [32, 1], strides = [1, 1]} : vector<32x97xf32> to vector<32x1xf32>
    %cst_71 = arith.constant dense<0.000000e+00> : vector<32x16xf32>
    %181 = tpu.matmul %179, %177, %cst_71 {dimension_numbers = #tpu.dot_dimension_numbers<[1], [0], [0], [1], [0, 0, 1, 1], [], []>} : vector<32x96xf32>, vector<96x16xf32>, vector<32x16xf32> -> vector<32x16xf32>
    %182 = vector.broadcast %180 : vector<32x1xf32> to vector<32x16xf32>
    %183 = arith.addf %181, %182 : vector<32x16xf32>
    %184 = arith.addf %183, %136 : vector<32x16xf32>
    %c424 = arith.constant 424 : index
    %c0_72 = arith.constant 0 : index
    %185 = vector.load %arg4[%c424, %c0_72] : memref<1248x128xf32, #tpu.memory_space<vmem>>, vector<32x2xf32>
    %186 = arith.mulf %184, %184 : vector<32x16xf32>
    %187 = tpu.concatenate %184, %186 in 0 : vector<32x16xf32>, vector<32x16xf32> -> vector<64x16xf32>
    %cst_73 = arith.constant dense<0.000000e+00> : vector<64x2xf32>
    %188 = tpu.matmul %187, %4, %cst_73 {dimension_numbers = #tpu.dot_dimension_numbers<[1], [0], [0], [1], [0, 0, 1, 1], [], []>} : vector<64x16xf32>, vector<16x2xf32>, vector<64x2xf32> -> vector<64x2xf32>
    %cst_74 = arith.constant dense<0.000000e+00> : vector<8x2xf32>
    %189 = tpu.matmul %6, %188, %cst_74 {dimension_numbers = #tpu.dot_dimension_numbers<[1], [0], [0], [1], [0, 0, 1, 1], [], []>} : vector<8x64xf32>, vector<64x2xf32>, vector<8x2xf32> -> vector<8x2xf32>
    %190 = vector.extract_strided_slice %189 {offsets = [0, 0], sizes = [4, 2], strides = [1, 1]} : vector<8x2xf32> to vector<4x2xf32>
    %191 = vector.extract_strided_slice %189 {offsets = [4, 0], sizes = [4, 2], strides = [1, 1]} : vector<8x2xf32> to vector<4x2xf32>
    %192 = arith.mulf %190, %190 : vector<4x2xf32>
    %193 = arith.subf %191, %192 : vector<4x2xf32>
    %cst_75 = arith.constant 9.99999974E-6 : f32
    %194 = vector.broadcast %cst_75 : f32 to vector<4x2xf32>
    %195 = arith.addf %193, %194 : vector<4x2xf32>
    %196 = math.rsqrt %195 : vector<4x2xf32>
    %cst_76 = arith.constant 0.000000e+00 : f32
    %197 = vector.broadcast %cst_76 : f32 to vector<4x2xf32>
    %198 = arith.subf %197, %190 : vector<4x2xf32>
    %199 = arith.mulf %198, %196 : vector<4x2xf32>
    %200 = tpu.concatenate %196, %199 in 0 : vector<4x2xf32>, vector<4x2xf32> -> vector<8x2xf32>
    %cst_77 = arith.constant dense<0.000000e+00> : vector<64x2xf32>
    %201 = tpu.matmul %7, %200, %cst_77 {dimension_numbers = #tpu.dot_dimension_numbers<[1], [0], [0], [1], [0, 0, 1, 1], [], []>} : vector<64x8xf32>, vector<8x2xf32>, vector<64x2xf32> -> vector<64x2xf32>
    %cst_78 = arith.constant dense<0.000000e+00> : vector<64x16xf32>
    %202 = tpu.matmul %201, %5, %cst_78 {dimension_numbers = #tpu.dot_dimension_numbers<[1], [0], [0], [1], [0, 0, 1, 1], [], []>} : vector<64x2xf32>, vector<2x16xf32>, vector<64x16xf32> -> vector<64x16xf32>
    %203 = vector.extract_strided_slice %202 {offsets = [0, 0], sizes = [32, 16], strides = [1, 1]} : vector<64x16xf32> to vector<32x16xf32>
    %204 = arith.mulf %184, %203 : vector<32x16xf32>
    %205 = vector.extract_strided_slice %202 {offsets = [32, 0], sizes = [32, 16], strides = [1, 1]} : vector<64x16xf32> to vector<32x16xf32>
    %206 = arith.addf %204, %205 : vector<32x16xf32>
    %207 = vector.extract_strided_slice %185 {offsets = [0, 0], sizes = [32, 1], strides = [1, 1]} : vector<32x2xf32> to vector<32x1xf32>
    %208 = vector.broadcast %207 : vector<32x1xf32> to vector<32x16xf32>
    %209 = arith.mulf %206, %208 : vector<32x16xf32>
    %210 = vector.extract_strided_slice %185 {offsets = [0, 1], sizes = [32, 1], strides = [1, 1]} : vector<32x2xf32> to vector<32x1xf32>
    %211 = vector.broadcast %210 : vector<32x1xf32> to vector<32x16xf32>
    %212 = arith.addf %209, %211 : vector<32x16xf32>
    %213 = arith.negf %212 : vector<32x16xf32>
    %214 = math.exp %213 : vector<32x16xf32>
    %cst_79 = arith.constant 1.000000e+00 : f32
    %215 = vector.broadcast %cst_79 : f32 to vector<32x16xf32>
    %216 = arith.addf %215, %214 : vector<32x16xf32>
    %217 = arith.divf %215, %216 : vector<32x16xf32>
    %218 = arith.mulf %212, %217 : vector<32x16xf32>
    %219 = vector.extract_strided_slice %2 {offsets = [0, 0], sizes = [16, 16], strides = [1, 1]} : vector<16x48xf32> to vector<16x16xf32>
    %cst_80 = arith.constant dense<0.000000e+00> : vector<32x16xf32>
    %220 = tpu.matmul %218, %219, %cst_80 {dimension_numbers = #tpu.dot_dimension_numbers<[1], [0], [0], [1], [0, 0, 1, 1], [], []>} : vector<32x16xf32>, vector<16x16xf32>, vector<32x16xf32> -> vector<32x16xf32>
    %221 = vector.extract_strided_slice %2 {offsets = [0, 16], sizes = [16, 16], strides = [1, 1]} : vector<16x48xf32> to vector<16x16xf32>
    %cst_81 = arith.constant dense<0.000000e+00> : vector<32x16xf32>
    %222 = tpu.matmul %218, %221, %cst_81 {dimension_numbers = #tpu.dot_dimension_numbers<[1], [0], [0], [1], [0, 0, 1, 1], [], []>} : vector<32x16xf32>, vector<16x16xf32>, vector<32x16xf32> -> vector<32x16xf32>
    %223 = vector.extract_strided_slice %2 {offsets = [0, 32], sizes = [16, 16], strides = [1, 1]} : vector<16x48xf32> to vector<16x16xf32>
    %cst_82 = arith.constant dense<0.000000e+00> : vector<32x16xf32>
    %224 = tpu.matmul %218, %223, %cst_82 {dimension_numbers = #tpu.dot_dimension_numbers<[1], [0], [0], [1], [0, 0, 1, 1], [], []>} : vector<32x16xf32>, vector<16x16xf32>, vector<32x16xf32> -> vector<32x16xf32>
    %225 = tpu.concatenate %220, %222, %224 in 0 : vector<32x16xf32>, vector<32x16xf32>, vector<32x16xf32> -> vector<96x16xf32>
    %c456 = arith.constant 456 : index
    %c0_83 = arith.constant 0 : index
    %226 = vector.load %arg4[%c456, %c0_83] : memref<1248x128xf32, #tpu.memory_space<vmem>>, vector<32x97xf32>
    %227 = vector.extract_strided_slice %226 {offsets = [0, 0], sizes = [32, 96], strides = [1, 1]} : vector<32x97xf32> to vector<32x96xf32>
    %228 = vector.extract_strided_slice %226 {offsets = [0, 96], sizes = [32, 1], strides = [1, 1]} : vector<32x97xf32> to vector<32x1xf32>
    %cst_84 = arith.constant dense<0.000000e+00> : vector<32x16xf32>
    %229 = tpu.matmul %227, %225, %cst_84 {dimension_numbers = #tpu.dot_dimension_numbers<[1], [0], [0], [1], [0, 0, 1, 1], [], []>} : vector<32x96xf32>, vector<96x16xf32>, vector<32x16xf32> -> vector<32x16xf32>
    %230 = vector.broadcast %228 : vector<32x1xf32> to vector<32x16xf32>
    %231 = arith.addf %229, %230 : vector<32x16xf32>
    %232 = arith.addf %231, %130 : vector<32x16xf32>
    %c552 = arith.constant 552 : index
    %c0_85 = arith.constant 0 : index
    %233 = vector.load %arg4[%c552, %c0_85] : memref<1248x128xf32, #tpu.memory_space<vmem>>, vector<32x65xf32>
    %234 = vector.extract_strided_slice %233 {offsets = [0, 0], sizes = [32, 64], strides = [1, 1]} : vector<32x65xf32> to vector<32x64xf32>
    %235 = vector.extract_strided_slice %233 {offsets = [0, 64], sizes = [32, 1], strides = [1, 1]} : vector<32x65xf32> to vector<32x1xf32>
    %cst_86 = arith.constant dense<0.000000e+00> : vector<32x16xf32>
    %236 = tpu.matmul %234, %95, %cst_86 {dimension_numbers = #tpu.dot_dimension_numbers<[1], [0], [0], [1], [0, 0, 1, 1], [], []>} : vector<32x64xf32>, vector<64x16xf32>, vector<32x16xf32> -> vector<32x16xf32>
    %237 = vector.broadcast %235 : vector<32x1xf32> to vector<32x16xf32>
    %238 = arith.addf %236, %237 : vector<32x16xf32>
    %c488 = arith.constant 488 : index
    %c0_87 = arith.constant 0 : index
    %239 = vector.load %arg4[%c488, %c0_87] : memref<1248x128xf32, #tpu.memory_space<vmem>>, vector<32x2xf32>
    %240 = arith.mulf %232, %232 : vector<32x16xf32>
    %241 = tpu.concatenate %232, %240 in 0 : vector<32x16xf32>, vector<32x16xf32> -> vector<64x16xf32>
    %cst_88 = arith.constant dense<0.000000e+00> : vector<64x2xf32>
    %242 = tpu.matmul %241, %4, %cst_88 {dimension_numbers = #tpu.dot_dimension_numbers<[1], [0], [0], [1], [0, 0, 1, 1], [], []>} : vector<64x16xf32>, vector<16x2xf32>, vector<64x2xf32> -> vector<64x2xf32>
    %cst_89 = arith.constant dense<0.000000e+00> : vector<8x2xf32>
    %243 = tpu.matmul %6, %242, %cst_89 {dimension_numbers = #tpu.dot_dimension_numbers<[1], [0], [0], [1], [0, 0, 1, 1], [], []>} : vector<8x64xf32>, vector<64x2xf32>, vector<8x2xf32> -> vector<8x2xf32>
    %244 = vector.extract_strided_slice %243 {offsets = [0, 0], sizes = [4, 2], strides = [1, 1]} : vector<8x2xf32> to vector<4x2xf32>
    %245 = vector.extract_strided_slice %243 {offsets = [4, 0], sizes = [4, 2], strides = [1, 1]} : vector<8x2xf32> to vector<4x2xf32>
    %246 = arith.mulf %244, %244 : vector<4x2xf32>
    %247 = arith.subf %245, %246 : vector<4x2xf32>
    %cst_90 = arith.constant 9.99999974E-6 : f32
    %248 = vector.broadcast %cst_90 : f32 to vector<4x2xf32>
    %249 = arith.addf %247, %248 : vector<4x2xf32>
    %250 = math.rsqrt %249 : vector<4x2xf32>
    %cst_91 = arith.constant 0.000000e+00 : f32
    %251 = vector.broadcast %cst_91 : f32 to vector<4x2xf32>
    %252 = arith.subf %251, %244 : vector<4x2xf32>
    %253 = arith.mulf %252, %250 : vector<4x2xf32>
    %254 = tpu.concatenate %250, %253 in 0 : vector<4x2xf32>, vector<4x2xf32> -> vector<8x2xf32>
    %cst_92 = arith.constant dense<0.000000e+00> : vector<64x2xf32>
    %255 = tpu.matmul %7, %254, %cst_92 {dimension_numbers = #tpu.dot_dimension_numbers<[1], [0], [0], [1], [0, 0, 1, 1], [], []>} : vector<64x8xf32>, vector<8x2xf32>, vector<64x2xf32> -> vector<64x2xf32>
    %cst_93 = arith.constant dense<0.000000e+00> : vector<64x16xf32>
    %256 = tpu.matmul %255, %5, %cst_93 {dimension_numbers = #tpu.dot_dimension_numbers<[1], [0], [0], [1], [0, 0, 1, 1], [], []>} : vector<64x2xf32>, vector<2x16xf32>, vector<64x16xf32> -> vector<64x16xf32>
    %257 = vector.extract_strided_slice %256 {offsets = [0, 0], sizes = [32, 16], strides = [1, 1]} : vector<64x16xf32> to vector<32x16xf32>
    %258 = arith.mulf %232, %257 : vector<32x16xf32>
    %259 = vector.extract_strided_slice %256 {offsets = [32, 0], sizes = [32, 16], strides = [1, 1]} : vector<64x16xf32> to vector<32x16xf32>
    %260 = arith.addf %258, %259 : vector<32x16xf32>
    %261 = vector.extract_strided_slice %239 {offsets = [0, 0], sizes = [32, 1], strides = [1, 1]} : vector<32x2xf32> to vector<32x1xf32>
    %262 = vector.broadcast %261 : vector<32x1xf32> to vector<32x16xf32>
    %263 = arith.mulf %260, %262 : vector<32x16xf32>
    %264 = vector.extract_strided_slice %239 {offsets = [0, 1], sizes = [32, 1], strides = [1, 1]} : vector<32x2xf32> to vector<32x1xf32>
    %265 = vector.broadcast %264 : vector<32x1xf32> to vector<32x16xf32>
    %266 = arith.addf %263, %265 : vector<32x16xf32>
    %267 = arith.negf %266 : vector<32x16xf32>
    %268 = math.exp %267 : vector<32x16xf32>
    %cst_94 = arith.constant 1.000000e+00 : f32
    %269 = vector.broadcast %cst_94 : f32 to vector<32x16xf32>
    %270 = arith.addf %269, %268 : vector<32x16xf32>
    %271 = arith.divf %269, %270 : vector<32x16xf32>
    %272 = arith.mulf %266, %271 : vector<32x16xf32>
    %273 = vector.extract_strided_slice %2 {offsets = [0, 0], sizes = [16, 16], strides = [1, 1]} : vector<16x48xf32> to vector<16x16xf32>
    %cst_95 = arith.constant dense<0.000000e+00> : vector<32x16xf32>
    %274 = tpu.matmul %272, %273, %cst_95 {dimension_numbers = #tpu.dot_dimension_numbers<[1], [0], [0], [1], [0, 0, 1, 1], [], []>} : vector<32x16xf32>, vector<16x16xf32>, vector<32x16xf32> -> vector<32x16xf32>
    %275 = vector.extract_strided_slice %2 {offsets = [0, 16], sizes = [16, 16], strides = [1, 1]} : vector<16x48xf32> to vector<16x16xf32>
    %cst_96 = arith.constant dense<0.000000e+00> : vector<32x16xf32>
    %276 = tpu.matmul %272, %275, %cst_96 {dimension_numbers = #tpu.dot_dimension_numbers<[1], [0], [0], [1], [0, 0, 1, 1], [], []>} : vector<32x16xf32>, vector<16x16xf32>, vector<32x16xf32> -> vector<32x16xf32>
    %277 = vector.extract_strided_slice %2 {offsets = [0, 32], sizes = [16, 16], strides = [1, 1]} : vector<16x48xf32> to vector<16x16xf32>
    %cst_97 = arith.constant dense<0.000000e+00> : vector<32x16xf32>
    %278 = tpu.matmul %272, %277, %cst_97 {dimension_numbers = #tpu.dot_dimension_numbers<[1], [0], [0], [1], [0, 0, 1, 1], [], []>} : vector<32x16xf32>, vector<16x16xf32>, vector<32x16xf32> -> vector<32x16xf32>
    %279 = tpu.concatenate %274, %276, %278 in 0 : vector<32x16xf32>, vector<32x16xf32>, vector<32x16xf32> -> vector<96x16xf32>
    %c520 = arith.constant 520 : index
    %c0_98 = arith.constant 0 : index
    %280 = vector.load %arg4[%c520, %c0_98] : memref<1248x128xf32, #tpu.memory_space<vmem>>, vector<32x97xf32>
    %281 = vector.extract_strided_slice %280 {offsets = [0, 0], sizes = [32, 96], strides = [1, 1]} : vector<32x97xf32> to vector<32x96xf32>
    %282 = vector.extract_strided_slice %280 {offsets = [0, 96], sizes = [32, 1], strides = [1, 1]} : vector<32x97xf32> to vector<32x1xf32>
    %cst_99 = arith.constant dense<0.000000e+00> : vector<32x16xf32>
    %283 = tpu.matmul %281, %279, %cst_99 {dimension_numbers = #tpu.dot_dimension_numbers<[1], [0], [0], [1], [0, 0, 1, 1], [], []>} : vector<32x96xf32>, vector<96x16xf32>, vector<32x16xf32> -> vector<32x16xf32>
    %284 = vector.broadcast %282 : vector<32x1xf32> to vector<32x16xf32>
    %285 = arith.addf %283, %284 : vector<32x16xf32>
    %286 = arith.addf %285, %238 : vector<32x16xf32>
    %c584 = arith.constant 584 : index
    %c0_100 = arith.constant 0 : index
    %287 = vector.load %arg4[%c584, %c0_100] : memref<1248x128xf32, #tpu.memory_space<vmem>>, vector<32x2xf32>
    %288 = arith.mulf %286, %286 : vector<32x16xf32>
    %289 = tpu.concatenate %286, %288 in 0 : vector<32x16xf32>, vector<32x16xf32> -> vector<64x16xf32>
    %cst_101 = arith.constant dense<0.000000e+00> : vector<64x2xf32>
    %290 = tpu.matmul %289, %4, %cst_101 {dimension_numbers = #tpu.dot_dimension_numbers<[1], [0], [0], [1], [0, 0, 1, 1], [], []>} : vector<64x16xf32>, vector<16x2xf32>, vector<64x2xf32> -> vector<64x2xf32>
    %cst_102 = arith.constant dense<0.000000e+00> : vector<8x2xf32>
    %291 = tpu.matmul %6, %290, %cst_102 {dimension_numbers = #tpu.dot_dimension_numbers<[1], [0], [0], [1], [0, 0, 1, 1], [], []>} : vector<8x64xf32>, vector<64x2xf32>, vector<8x2xf32> -> vector<8x2xf32>
    %292 = vector.extract_strided_slice %291 {offsets = [0, 0], sizes = [4, 2], strides = [1, 1]} : vector<8x2xf32> to vector<4x2xf32>
    %293 = vector.extract_strided_slice %291 {offsets = [4, 0], sizes = [4, 2], strides = [1, 1]} : vector<8x2xf32> to vector<4x2xf32>
    %294 = arith.mulf %292, %292 : vector<4x2xf32>
    %295 = arith.subf %293, %294 : vector<4x2xf32>
    %cst_103 = arith.constant 9.99999974E-6 : f32
    %296 = vector.broadcast %cst_103 : f32 to vector<4x2xf32>
    %297 = arith.addf %295, %296 : vector<4x2xf32>
    %298 = math.rsqrt %297 : vector<4x2xf32>
    %cst_104 = arith.constant 0.000000e+00 : f32
    %299 = vector.broadcast %cst_104 : f32 to vector<4x2xf32>
    %300 = arith.subf %299, %292 : vector<4x2xf32>
    %301 = arith.mulf %300, %298 : vector<4x2xf32>
    %302 = tpu.concatenate %298, %301 in 0 : vector<4x2xf32>, vector<4x2xf32> -> vector<8x2xf32>
    %cst_105 = arith.constant dense<0.000000e+00> : vector<64x2xf32>
    %303 = tpu.matmul %7, %302, %cst_105 {dimension_numbers = #tpu.dot_dimension_numbers<[1], [0], [0], [1], [0, 0, 1, 1], [], []>} : vector<64x8xf32>, vector<8x2xf32>, vector<64x2xf32> -> vector<64x2xf32>
    %cst_106 = arith.constant dense<0.000000e+00> : vector<64x16xf32>
    %304 = tpu.matmul %303, %5, %cst_106 {dimension_numbers = #tpu.dot_dimension_numbers<[1], [0], [0], [1], [0, 0, 1, 1], [], []>} : vector<64x2xf32>, vector<2x16xf32>, vector<64x16xf32> -> vector<64x16xf32>
    %305 = vector.extract_strided_slice %304 {offsets = [0, 0], sizes = [32, 16], strides = [1, 1]} : vector<64x16xf32> to vector<32x16xf32>
    %306 = arith.mulf %286, %305 : vector<32x16xf32>
    %307 = vector.extract_strided_slice %304 {offsets = [32, 0], sizes = [32, 16], strides = [1, 1]} : vector<64x16xf32> to vector<32x16xf32>
    %308 = arith.addf %306, %307 : vector<32x16xf32>
    %309 = vector.extract_strided_slice %287 {offsets = [0, 0], sizes = [32, 1], strides = [1, 1]} : vector<32x2xf32> to vector<32x1xf32>
    %310 = vector.broadcast %309 : vector<32x1xf32> to vector<32x16xf32>
    %311 = arith.mulf %308, %310 : vector<32x16xf32>
    %312 = vector.extract_strided_slice %287 {offsets = [0, 1], sizes = [32, 1], strides = [1, 1]} : vector<32x2xf32> to vector<32x1xf32>
    %313 = vector.broadcast %312 : vector<32x1xf32> to vector<32x16xf32>
    %314 = arith.addf %311, %313 : vector<32x16xf32>
    %315 = arith.negf %314 : vector<32x16xf32>
    %316 = math.exp %315 : vector<32x16xf32>
    %cst_107 = arith.constant 1.000000e+00 : f32
    %317 = vector.broadcast %cst_107 : f32 to vector<32x16xf32>
    %318 = arith.addf %317, %316 : vector<32x16xf32>
    %319 = arith.divf %317, %318 : vector<32x16xf32>
    %320 = arith.mulf %314, %319 : vector<32x16xf32>
    %321 = vector.extract_strided_slice %2 {offsets = [0, 0], sizes = [16, 16], strides = [1, 1]} : vector<16x48xf32> to vector<16x16xf32>
    %cst_108 = arith.constant dense<0.000000e+00> : vector<32x16xf32>
    %322 = tpu.matmul %320, %321, %cst_108 {dimension_numbers = #tpu.dot_dimension_numbers<[1], [0], [0], [1], [0, 0, 1, 1], [], []>} : vector<32x16xf32>, vector<16x16xf32>, vector<32x16xf32> -> vector<32x16xf32>
    %323 = vector.extract_strided_slice %2 {offsets = [0, 16], sizes = [16, 16], strides = [1, 1]} : vector<16x48xf32> to vector<16x16xf32>
    %cst_109 = arith.constant dense<0.000000e+00> : vector<32x16xf32>
    %324 = tpu.matmul %320, %323, %cst_109 {dimension_numbers = #tpu.dot_dimension_numbers<[1], [0], [0], [1], [0, 0, 1, 1], [], []>} : vector<32x16xf32>, vector<16x16xf32>, vector<32x16xf32> -> vector<32x16xf32>
    %325 = vector.extract_strided_slice %2 {offsets = [0, 32], sizes = [16, 16], strides = [1, 1]} : vector<16x48xf32> to vector<16x16xf32>
    %cst_110 = arith.constant dense<0.000000e+00> : vector<32x16xf32>
    %326 = tpu.matmul %320, %325, %cst_110 {dimension_numbers = #tpu.dot_dimension_numbers<[1], [0], [0], [1], [0, 0, 1, 1], [], []>} : vector<32x16xf32>, vector<16x16xf32>, vector<32x16xf32> -> vector<32x16xf32>
    %327 = tpu.concatenate %322, %324, %326 in 0 : vector<32x16xf32>, vector<32x16xf32>, vector<32x16xf32> -> vector<96x16xf32>
    %c616 = arith.constant 616 : index
    %c0_111 = arith.constant 0 : index
    %328 = vector.load %arg4[%c616, %c0_111] : memref<1248x128xf32, #tpu.memory_space<vmem>>, vector<32x97xf32>
    %329 = vector.extract_strided_slice %328 {offsets = [0, 0], sizes = [32, 96], strides = [1, 1]} : vector<32x97xf32> to vector<32x96xf32>
    %330 = vector.extract_strided_slice %328 {offsets = [0, 96], sizes = [32, 1], strides = [1, 1]} : vector<32x97xf32> to vector<32x1xf32>
    %cst_112 = arith.constant dense<0.000000e+00> : vector<32x16xf32>
    %331 = tpu.matmul %329, %327, %cst_112 {dimension_numbers = #tpu.dot_dimension_numbers<[1], [0], [0], [1], [0, 0, 1, 1], [], []>} : vector<32x96xf32>, vector<96x16xf32>, vector<32x16xf32> -> vector<32x16xf32>
    %332 = vector.broadcast %330 : vector<32x1xf32> to vector<32x16xf32>
    %333 = arith.addf %331, %332 : vector<32x16xf32>
    %334 = arith.addf %333, %232 : vector<32x16xf32>
    %cst_113 = arith.constant 0.707106769 : f32
    %335 = vector.broadcast %cst_113 : f32 to vector<32x16xf32>
    %336 = arith.mulf %232, %335 : vector<32x16xf32>
    %337 = tpu.concatenate %334, %336 in 0 : vector<32x16xf32>, vector<32x16xf32> -> vector<64x16xf32>
    %c776 = arith.constant 776 : index
    %c0_114 = arith.constant 0 : index
    %338 = vector.load %arg4[%c776, %c0_114] : memref<1248x128xf32, #tpu.memory_space<vmem>>, vector<32x65xf32>
    %339 = vector.extract_strided_slice %338 {offsets = [0, 0], sizes = [32, 64], strides = [1, 1]} : vector<32x65xf32> to vector<32x64xf32>
    %340 = vector.extract_strided_slice %338 {offsets = [0, 64], sizes = [32, 1], strides = [1, 1]} : vector<32x65xf32> to vector<32x1xf32>
    %cst_115 = arith.constant dense<0.000000e+00> : vector<32x16xf32>
    %341 = tpu.matmul %339, %95, %cst_115 {dimension_numbers = #tpu.dot_dimension_numbers<[1], [0], [0], [1], [0, 0, 1, 1], [], []>} : vector<32x64xf32>, vector<64x16xf32>, vector<32x16xf32> -> vector<32x16xf32>
    %342 = vector.broadcast %340 : vector<32x1xf32> to vector<32x16xf32>
    %343 = arith.addf %341, %342 : vector<32x16xf32>
    %c648 = arith.constant 648 : index
    %c0_116 = arith.constant 0 : index
    %344 = vector.load %arg4[%c648, %c0_116] : memref<1248x128xf32, #tpu.memory_space<vmem>>, vector<64x2xf32>
    %345 = arith.mulf %337, %337 : vector<64x16xf32>
    %346 = tpu.concatenate %337, %345 in 0 : vector<64x16xf32>, vector<64x16xf32> -> vector<128x16xf32>
    %cst_117 = arith.constant dense<0.000000e+00> : vector<128x2xf32>
    %347 = tpu.matmul %346, %4, %cst_117 {dimension_numbers = #tpu.dot_dimension_numbers<[1], [0], [0], [1], [0, 0, 1, 1], [], []>} : vector<128x16xf32>, vector<16x2xf32>, vector<128x2xf32> -> vector<128x2xf32>
    %cst_118 = arith.constant dense<0.000000e+00> : vector<8x2xf32>
    %348 = tpu.matmul %8, %347, %cst_118 {dimension_numbers = #tpu.dot_dimension_numbers<[1], [0], [0], [1], [0, 0, 1, 1], [], []>} : vector<8x128xf32>, vector<128x2xf32>, vector<8x2xf32> -> vector<8x2xf32>
    %349 = vector.extract_strided_slice %348 {offsets = [0, 0], sizes = [4, 2], strides = [1, 1]} : vector<8x2xf32> to vector<4x2xf32>
    %350 = vector.extract_strided_slice %348 {offsets = [4, 0], sizes = [4, 2], strides = [1, 1]} : vector<8x2xf32> to vector<4x2xf32>
    %351 = arith.mulf %349, %349 : vector<4x2xf32>
    %352 = arith.subf %350, %351 : vector<4x2xf32>
    %cst_119 = arith.constant 9.99999974E-6 : f32
    %353 = vector.broadcast %cst_119 : f32 to vector<4x2xf32>
    %354 = arith.addf %352, %353 : vector<4x2xf32>
    %355 = math.rsqrt %354 : vector<4x2xf32>
    %cst_120 = arith.constant 0.000000e+00 : f32
    %356 = vector.broadcast %cst_120 : f32 to vector<4x2xf32>
    %357 = arith.subf %356, %349 : vector<4x2xf32>
    %358 = arith.mulf %357, %355 : vector<4x2xf32>
    %359 = tpu.concatenate %355, %358 in 0 : vector<4x2xf32>, vector<4x2xf32> -> vector<8x2xf32>
    %cst_121 = arith.constant dense<0.000000e+00> : vector<128x2xf32>
    %360 = tpu.matmul %9, %359, %cst_121 {dimension_numbers = #tpu.dot_dimension_numbers<[1], [0], [0], [1], [0, 0, 1, 1], [], []>} : vector<128x8xf32>, vector<8x2xf32>, vector<128x2xf32> -> vector<128x2xf32>
    %cst_122 = arith.constant dense<0.000000e+00> : vector<128x16xf32>
    %361 = tpu.matmul %360, %5, %cst_122 {dimension_numbers = #tpu.dot_dimension_numbers<[1], [0], [0], [1], [0, 0, 1, 1], [], []>} : vector<128x2xf32>, vector<2x16xf32>, vector<128x16xf32> -> vector<128x16xf32>
    %362 = vector.extract_strided_slice %361 {offsets = [0, 0], sizes = [64, 16], strides = [1, 1]} : vector<128x16xf32> to vector<64x16xf32>
    %363 = arith.mulf %337, %362 : vector<64x16xf32>
    %364 = vector.extract_strided_slice %361 {offsets = [64, 0], sizes = [64, 16], strides = [1, 1]} : vector<128x16xf32> to vector<64x16xf32>
    %365 = arith.addf %363, %364 : vector<64x16xf32>
    %366 = vector.extract_strided_slice %344 {offsets = [0, 0], sizes = [64, 1], strides = [1, 1]} : vector<64x2xf32> to vector<64x1xf32>
    %367 = vector.broadcast %366 : vector<64x1xf32> to vector<64x16xf32>
    %368 = arith.mulf %365, %367 : vector<64x16xf32>
    %369 = vector.extract_strided_slice %344 {offsets = [0, 1], sizes = [64, 1], strides = [1, 1]} : vector<64x2xf32> to vector<64x1xf32>
    %370 = vector.broadcast %369 : vector<64x1xf32> to vector<64x16xf32>
    %371 = arith.addf %368, %370 : vector<64x16xf32>
    %372 = arith.negf %371 : vector<64x16xf32>
    %373 = math.exp %372 : vector<64x16xf32>
    %cst_123 = arith.constant 1.000000e+00 : f32
    %374 = vector.broadcast %cst_123 : f32 to vector<64x16xf32>
    %375 = arith.addf %374, %373 : vector<64x16xf32>
    %376 = arith.divf %374, %375 : vector<64x16xf32>
    %377 = arith.mulf %371, %376 : vector<64x16xf32>
    %378 = vector.extract_strided_slice %2 {offsets = [0, 0], sizes = [16, 16], strides = [1, 1]} : vector<16x48xf32> to vector<16x16xf32>
    %cst_124 = arith.constant dense<0.000000e+00> : vector<64x16xf32>
    %379 = tpu.matmul %377, %378, %cst_124 {dimension_numbers = #tpu.dot_dimension_numbers<[1], [0], [0], [1], [0, 0, 1, 1], [], []>} : vector<64x16xf32>, vector<16x16xf32>, vector<64x16xf32> -> vector<64x16xf32>
    %380 = vector.extract_strided_slice %2 {offsets = [0, 16], sizes = [16, 16], strides = [1, 1]} : vector<16x48xf32> to vector<16x16xf32>
    %cst_125 = arith.constant dense<0.000000e+00> : vector<64x16xf32>
    %381 = tpu.matmul %377, %380, %cst_125 {dimension_numbers = #tpu.dot_dimension_numbers<[1], [0], [0], [1], [0, 0, 1, 1], [], []>} : vector<64x16xf32>, vector<16x16xf32>, vector<64x16xf32> -> vector<64x16xf32>
    %382 = vector.extract_strided_slice %2 {offsets = [0, 32], sizes = [16, 16], strides = [1, 1]} : vector<16x48xf32> to vector<16x16xf32>
    %cst_126 = arith.constant dense<0.000000e+00> : vector<64x16xf32>
    %383 = tpu.matmul %377, %382, %cst_126 {dimension_numbers = #tpu.dot_dimension_numbers<[1], [0], [0], [1], [0, 0, 1, 1], [], []>} : vector<64x16xf32>, vector<16x16xf32>, vector<64x16xf32> -> vector<64x16xf32>
    %384 = tpu.concatenate %379, %381, %383 in 0 : vector<64x16xf32>, vector<64x16xf32>, vector<64x16xf32> -> vector<192x16xf32>
    %c712 = arith.constant 712 : index
    %c0_127 = arith.constant 0 : index
    %385 = vector.load %arg4[%c712, %c0_127] : memref<1248x128xf32, #tpu.memory_space<vmem>>, vector<32x128xf32>
    %c744 = arith.constant 744 : index
    %c0_128 = arith.constant 0 : index
    %386 = vector.load %arg4[%c744, %c0_128] : memref<1248x128xf32, #tpu.memory_space<vmem>>, vector<32x65xf32>
    %387 = tpu.concatenate %385, %386 in 1 : vector<32x128xf32>, vector<32x65xf32> -> vector<32x193xf32>
    %388 = vector.extract_strided_slice %387 {offsets = [0, 0], sizes = [32, 192], strides = [1, 1]} : vector<32x193xf32> to vector<32x192xf32>
    %389 = vector.extract_strided_slice %387 {offsets = [0, 192], sizes = [32, 1], strides = [1, 1]} : vector<32x193xf32> to vector<32x1xf32>
    %cst_129 = arith.constant dense<0.000000e+00> : vector<32x16xf32>
    %390 = tpu.matmul %388, %384, %cst_129 {dimension_numbers = #tpu.dot_dimension_numbers<[1], [0], [0], [1], [0, 0, 1, 1], [], []>} : vector<32x192xf32>, vector<192x16xf32>, vector<32x16xf32> -> vector<32x16xf32>
    %391 = vector.broadcast %389 : vector<32x1xf32> to vector<32x16xf32>
    %392 = arith.addf %390, %391 : vector<32x16xf32>
    %393 = arith.addf %392, %343 : vector<32x16xf32>
    %c808 = arith.constant 808 : index
    %c0_130 = arith.constant 0 : index
    %394 = vector.load %arg4[%c808, %c0_130] : memref<1248x128xf32, #tpu.memory_space<vmem>>, vector<32x2xf32>
    %395 = arith.mulf %393, %393 : vector<32x16xf32>
    %396 = tpu.concatenate %393, %395 in 0 : vector<32x16xf32>, vector<32x16xf32> -> vector<64x16xf32>
    %cst_131 = arith.constant dense<0.000000e+00> : vector<64x2xf32>
    %397 = tpu.matmul %396, %4, %cst_131 {dimension_numbers = #tpu.dot_dimension_numbers<[1], [0], [0], [1], [0, 0, 1, 1], [], []>} : vector<64x16xf32>, vector<16x2xf32>, vector<64x2xf32> -> vector<64x2xf32>
    %cst_132 = arith.constant dense<0.000000e+00> : vector<8x2xf32>
    %398 = tpu.matmul %6, %397, %cst_132 {dimension_numbers = #tpu.dot_dimension_numbers<[1], [0], [0], [1], [0, 0, 1, 1], [], []>} : vector<8x64xf32>, vector<64x2xf32>, vector<8x2xf32> -> vector<8x2xf32>
    %399 = vector.extract_strided_slice %398 {offsets = [0, 0], sizes = [4, 2], strides = [1, 1]} : vector<8x2xf32> to vector<4x2xf32>
    %400 = vector.extract_strided_slice %398 {offsets = [4, 0], sizes = [4, 2], strides = [1, 1]} : vector<8x2xf32> to vector<4x2xf32>
    %401 = arith.mulf %399, %399 : vector<4x2xf32>
    %402 = arith.subf %400, %401 : vector<4x2xf32>
    %cst_133 = arith.constant 9.99999974E-6 : f32
    %403 = vector.broadcast %cst_133 : f32 to vector<4x2xf32>
    %404 = arith.addf %402, %403 : vector<4x2xf32>
    %405 = math.rsqrt %404 : vector<4x2xf32>
    %cst_134 = arith.constant 0.000000e+00 : f32
    %406 = vector.broadcast %cst_134 : f32 to vector<4x2xf32>
    %407 = arith.subf %406, %399 : vector<4x2xf32>
    %408 = arith.mulf %407, %405 : vector<4x2xf32>
    %409 = tpu.concatenate %405, %408 in 0 : vector<4x2xf32>, vector<4x2xf32> -> vector<8x2xf32>
    %cst_135 = arith.constant dense<0.000000e+00> : vector<64x2xf32>
    %410 = tpu.matmul %7, %409, %cst_135 {dimension_numbers = #tpu.dot_dimension_numbers<[1], [0], [0], [1], [0, 0, 1, 1], [], []>} : vector<64x8xf32>, vector<8x2xf32>, vector<64x2xf32> -> vector<64x2xf32>
    %cst_136 = arith.constant dense<0.000000e+00> : vector<64x16xf32>
    %411 = tpu.matmul %410, %5, %cst_136 {dimension_numbers = #tpu.dot_dimension_numbers<[1], [0], [0], [1], [0, 0, 1, 1], [], []>} : vector<64x2xf32>, vector<2x16xf32>, vector<64x16xf32> -> vector<64x16xf32>
    %412 = vector.extract_strided_slice %411 {offsets = [0, 0], sizes = [32, 16], strides = [1, 1]} : vector<64x16xf32> to vector<32x16xf32>
    %413 = arith.mulf %393, %412 : vector<32x16xf32>
    %414 = vector.extract_strided_slice %411 {offsets = [32, 0], sizes = [32, 16], strides = [1, 1]} : vector<64x16xf32> to vector<32x16xf32>
    %415 = arith.addf %413, %414 : vector<32x16xf32>
    %416 = vector.extract_strided_slice %394 {offsets = [0, 0], sizes = [32, 1], strides = [1, 1]} : vector<32x2xf32> to vector<32x1xf32>
    %417 = vector.broadcast %416 : vector<32x1xf32> to vector<32x16xf32>
    %418 = arith.mulf %415, %417 : vector<32x16xf32>
    %419 = vector.extract_strided_slice %394 {offsets = [0, 1], sizes = [32, 1], strides = [1, 1]} : vector<32x2xf32> to vector<32x1xf32>
    %420 = vector.broadcast %419 : vector<32x1xf32> to vector<32x16xf32>
    %421 = arith.addf %418, %420 : vector<32x16xf32>
    %422 = arith.negf %421 : vector<32x16xf32>
    %423 = math.exp %422 : vector<32x16xf32>
    %cst_137 = arith.constant 1.000000e+00 : f32
    %424 = vector.broadcast %cst_137 : f32 to vector<32x16xf32>
    %425 = arith.addf %424, %423 : vector<32x16xf32>
    %426 = arith.divf %424, %425 : vector<32x16xf32>
    %427 = arith.mulf %421, %426 : vector<32x16xf32>
    %428 = vector.extract_strided_slice %2 {offsets = [0, 0], sizes = [16, 16], strides = [1, 1]} : vector<16x48xf32> to vector<16x16xf32>
    %cst_138 = arith.constant dense<0.000000e+00> : vector<32x16xf32>
    %429 = tpu.matmul %427, %428, %cst_138 {dimension_numbers = #tpu.dot_dimension_numbers<[1], [0], [0], [1], [0, 0, 1, 1], [], []>} : vector<32x16xf32>, vector<16x16xf32>, vector<32x16xf32> -> vector<32x16xf32>
    %430 = vector.extract_strided_slice %2 {offsets = [0, 16], sizes = [16, 16], strides = [1, 1]} : vector<16x48xf32> to vector<16x16xf32>
    %cst_139 = arith.constant dense<0.000000e+00> : vector<32x16xf32>
    %431 = tpu.matmul %427, %430, %cst_139 {dimension_numbers = #tpu.dot_dimension_numbers<[1], [0], [0], [1], [0, 0, 1, 1], [], []>} : vector<32x16xf32>, vector<16x16xf32>, vector<32x16xf32> -> vector<32x16xf32>
    %432 = vector.extract_strided_slice %2 {offsets = [0, 32], sizes = [16, 16], strides = [1, 1]} : vector<16x48xf32> to vector<16x16xf32>
    %cst_140 = arith.constant dense<0.000000e+00> : vector<32x16xf32>
    %433 = tpu.matmul %427, %432, %cst_140 {dimension_numbers = #tpu.dot_dimension_numbers<[1], [0], [0], [1], [0, 0, 1, 1], [], []>} : vector<32x16xf32>, vector<16x16xf32>, vector<32x16xf32> -> vector<32x16xf32>
    %434 = tpu.concatenate %429, %431, %433 in 0 : vector<32x16xf32>, vector<32x16xf32>, vector<32x16xf32> -> vector<96x16xf32>
    %c840 = arith.constant 840 : index
    %c0_141 = arith.constant 0 : index
    %435 = vector.load %arg4[%c840, %c0_141] : memref<1248x128xf32, #tpu.memory_space<vmem>>, vector<32x97xf32>
    %436 = vector.extract_strided_slice %435 {offsets = [0, 0], sizes = [32, 96], strides = [1, 1]} : vector<32x97xf32> to vector<32x96xf32>
    %437 = vector.extract_strided_slice %435 {offsets = [0, 96], sizes = [32, 1], strides = [1, 1]} : vector<32x97xf32> to vector<32x1xf32>
    %cst_142 = arith.constant dense<0.000000e+00> : vector<32x16xf32>
    %438 = tpu.matmul %436, %434, %cst_142 {dimension_numbers = #tpu.dot_dimension_numbers<[1], [0], [0], [1], [0, 0, 1, 1], [], []>} : vector<32x96xf32>, vector<96x16xf32>, vector<32x16xf32> -> vector<32x16xf32>
    %439 = vector.broadcast %437 : vector<32x1xf32> to vector<32x16xf32>
    %440 = arith.addf %438, %439 : vector<32x16xf32>
    %c872 = arith.constant 872 : index
    %c0_143 = arith.constant 0 : index
    %441 = vector.load %arg4[%c872, %c0_143] : memref<1248x128xf32, #tpu.memory_space<vmem>>, vector<32x65xf32>
    %442 = vector.extract_strided_slice %441 {offsets = [0, 0], sizes = [32, 64], strides = [1, 1]} : vector<32x65xf32> to vector<32x64xf32>
    %443 = vector.extract_strided_slice %441 {offsets = [0, 64], sizes = [32, 1], strides = [1, 1]} : vector<32x65xf32> to vector<32x1xf32>
    %cst_144 = arith.constant dense<0.000000e+00> : vector<32x16xf32>
    %444 = tpu.matmul %442, %337, %cst_144 {dimension_numbers = #tpu.dot_dimension_numbers<[1], [0], [0], [1], [0, 0, 1, 1], [], []>} : vector<32x64xf32>, vector<64x16xf32>, vector<32x16xf32> -> vector<32x16xf32>
    %445 = vector.broadcast %443 : vector<32x1xf32> to vector<32x16xf32>
    %446 = arith.addf %444, %445 : vector<32x16xf32>
    %447 = arith.addf %440, %446 : vector<32x16xf32>
    %448 = vector.extract_strided_slice %3 {offsets = [0, 0], sizes = [16, 32], strides = [1, 1]} : vector<16x96xf32> to vector<16x32xf32>
    %cst_145 = arith.constant dense<0.000000e+00> : vector<32x32xf32>
    %449 = tpu.matmul %447, %448, %cst_145 {dimension_numbers = #tpu.dot_dimension_numbers<[1], [0], [0], [1], [0, 0, 1, 1], [], []>} : vector<32x16xf32>, vector<16x32xf32>, vector<32x32xf32> -> vector<32x32xf32>
    %450 = vector.extract_strided_slice %3 {offsets = [0, 32], sizes = [16, 32], strides = [1, 1]} : vector<16x96xf32> to vector<16x32xf32>
    %cst_146 = arith.constant dense<0.000000e+00> : vector<32x32xf32>
    %451 = tpu.matmul %447, %450, %cst_146 {dimension_numbers = #tpu.dot_dimension_numbers<[1], [0], [0], [1], [0, 0, 1, 1], [], []>} : vector<32x16xf32>, vector<16x32xf32>, vector<32x32xf32> -> vector<32x32xf32>
    %452 = vector.extract_strided_slice %3 {offsets = [0, 64], sizes = [16, 32], strides = [1, 1]} : vector<16x96xf32> to vector<16x32xf32>
    %cst_147 = arith.constant dense<0.000000e+00> : vector<32x32xf32>
    %453 = tpu.matmul %447, %452, %cst_147 {dimension_numbers = #tpu.dot_dimension_numbers<[1], [0], [0], [1], [0, 0, 1, 1], [], []>} : vector<32x16xf32>, vector<16x32xf32>, vector<32x32xf32> -> vector<32x32xf32>
    %454 = tpu.concatenate %449, %451, %453 in 0 : vector<32x32xf32>, vector<32x32xf32>, vector<32x32xf32> -> vector<96x32xf32>
    %c304 = arith.constant 304 : index
    %c0_148 = arith.constant 0 : index
    %455 = vector.load %arg4[%c304, %c0_148] : memref<1248x128xf32, #tpu.memory_space<vmem>>, vector<16x97xf32>
    %456 = vector.extract_strided_slice %455 {offsets = [0, 0], sizes = [16, 96], strides = [1, 1]} : vector<16x97xf32> to vector<16x96xf32>
    %457 = vector.extract_strided_slice %455 {offsets = [0, 96], sizes = [16, 1], strides = [1, 1]} : vector<16x97xf32> to vector<16x1xf32>
    %cst_149 = arith.constant dense<0.000000e+00> : vector<16x32xf32>
    %458 = tpu.matmul %456, %454, %cst_149 {dimension_numbers = #tpu.dot_dimension_numbers<[1], [0], [0], [1], [0, 0, 1, 1], [], []>} : vector<16x96xf32>, vector<96x32xf32>, vector<16x32xf32> -> vector<16x32xf32>
    %459 = vector.broadcast %457 : vector<16x1xf32> to vector<16x32xf32>
    %460 = arith.addf %458, %459 : vector<16x32xf32>
    %461 = vector.extract_strided_slice %0 {offsets = [0, 0], sizes = [32, 32], strides = [1, 1]} : vector<32x96xf32> to vector<32x32xf32>
    %cst_150 = arith.constant dense<0.000000e+00> : vector<16x32xf32>
    %462 = tpu.matmul %460, %461, %cst_150 {dimension_numbers = #tpu.dot_dimension_numbers<[1], [0], [0], [1], [0, 0, 1, 1], [], []>} : vector<16x32xf32>, vector<32x32xf32>, vector<16x32xf32> -> vector<16x32xf32>
    %463 = vector.extract_strided_slice %0 {offsets = [0, 32], sizes = [32, 32], strides = [1, 1]} : vector<32x96xf32> to vector<32x32xf32>
    %cst_151 = arith.constant dense<0.000000e+00> : vector<16x32xf32>
    %464 = tpu.matmul %460, %463, %cst_151 {dimension_numbers = #tpu.dot_dimension_numbers<[1], [0], [0], [1], [0, 0, 1, 1], [], []>} : vector<16x32xf32>, vector<32x32xf32>, vector<16x32xf32> -> vector<16x32xf32>
    %465 = vector.extract_strided_slice %0 {offsets = [0, 64], sizes = [32, 32], strides = [1, 1]} : vector<32x96xf32> to vector<32x32xf32>
    %cst_152 = arith.constant dense<0.000000e+00> : vector<16x32xf32>
    %466 = tpu.matmul %460, %465, %cst_152 {dimension_numbers = #tpu.dot_dimension_numbers<[1], [0], [0], [1], [0, 0, 1, 1], [], []>} : vector<16x32xf32>, vector<32x32xf32>, vector<16x32xf32> -> vector<16x32xf32>
    %467 = tpu.concatenate %462, %464, %466 in 0 : vector<16x32xf32>, vector<16x32xf32>, vector<16x32xf32> -> vector<48x32xf32>
    %c320 = arith.constant 320 : index
    %c0_153 = arith.constant 0 : index
    %468 = vector.load %arg4[%c320, %c0_153] : memref<1248x128xf32, #tpu.memory_space<vmem>>, vector<4x49xf32>
    %469 = vector.extract_strided_slice %468 {offsets = [0, 0], sizes = [4, 48], strides = [1, 1]} : vector<4x49xf32> to vector<4x48xf32>
    %470 = vector.extract_strided_slice %468 {offsets = [0, 48], sizes = [4, 1], strides = [1, 1]} : vector<4x49xf32> to vector<4x1xf32>
    %cst_154 = arith.constant dense<0.000000e+00> : vector<4x32xf32>
    %471 = tpu.matmul %469, %467, %cst_154 {dimension_numbers = #tpu.dot_dimension_numbers<[1], [0], [0], [1], [0, 0, 1, 1], [], []>} : vector<4x48xf32>, vector<48x32xf32>, vector<4x32xf32> -> vector<4x32xf32>
    %472 = vector.broadcast %470 : vector<4x1xf32> to vector<4x32xf32>
    %473 = arith.addf %471, %472 : vector<4x32xf32>
    %cst_155 = arith.constant 0.000000e+00 : f32
    %474 = vector.broadcast %cst_155 : f32 to vector<4x32xf32>
    %475 = tpu.concatenate %473, %474 in 0 : vector<4x32xf32>, vector<4x32xf32> -> vector<8x32xf32>
    %cst_156 = arith.constant 0.000000e+00 : f32
    %476 = vector.broadcast %cst_156 : f32 to vector<8x96xf32>
    %477 = tpu.concatenate %475, %476 in 1 : vector<8x32xf32>, vector<8x96xf32> -> vector<8x128xf32>
    %c0_157 = arith.constant 0 : index
    %c0_158 = arith.constant 0 : index
    %478 = vector.load %arg5[%c0_157, %c0_158] : memref<8x128xf32, #tpu.memory_space<vmem>>, vector<8x128xf32>
    tpu.vector_store %arg5[%c0_157, %c0_158], %477 {strides = array<i32>} : memref<8x128xf32, #tpu.memory_space<vmem>>, vector<8x128xf32>,
    return
  }
}

</mosaic_0001>

<bundles_post_ra>
// kernel: unet1d_cond_wrapper_forward.1
= control target key start
LH: loop header
LB: loop body
LE: loop exit
PB: predicated region body
PF: predicated region fallthrough
CT: control target
= control target key end

     0   :  { %v12012_v3 = vmov 16   ;;  %vm111_vm0 = vcmask 130048   ;;  %vm604_vm1 = vcmask 523264   ;;  %v14279_v24 = vmov 64   ;;  %s12014_s11 = smov 64   ;;  %s12015_s12 = smov 96   ;;  %s14273_s0 = inlined_call_operand.vmem [shape: f32[16,2], index: 0, kind: input, shape index: {}]   ;;  %s14274_s1 = inlined_call_operand.vmem [shape: f32[16,2], index: 1, kind: input, shape index: {}]   ;;  %s14275_s4 = inlined_call_operand.vmem [shape: f32[1248,128], index: 4, kind: input, shape index: {}]   ;;  %s14276_s2 = inlined_call_operand.vmem [shape: f32[2,16], index: 2, kind: input, shape index: {}]   ;;  %s14277_s3 = inlined_call_operand.vmem [shape: f32[4,32], index: 3, kind: input, shape index: {}]   ;;  %s14278_s5 = inlined_call_operand.vmem [shape: f32[8,128], index: 5, kind: output, shape index: {}]  }
   0x1   :  { %v62_v0 = vld [vmem:[%s14273_s0 + $0x8] sm:$0xff]  ;;  %v61_v2 = vld [vmem:[%s14273_s0] sm:$0xff]  ;;  %11684 = vset.pattern.permute.xlu1 %v12012_v3  ;;  %11683 = vset.pattern.permute.xlu0 %v12012_v3  ;;  %v65_v9 = vld [vmem:[%s14275_s4 + $0x10] sm:$0xff]  ;;  %vm12017_vm2 = vmmov 0   ;;  %vm1120_vm3 = vcmask 1041408   ;;  %vm1309_vm4 = vcmask 1043456  }
   0x2   :  { %v306_v1 = vld [vmem:[%s14274_s1 + $0x8] sm:$0xff]  ;;  %10450 = vmatprep.subr.mxu0 %v62_v0  ;;  %v305_v4 = vld [vmem:[%s14274_s1] sm:$0xff]  ;;  %v309_v10 = vld [vmem:[%s14275_s4 + $0x50] sm:$0xff]  ;;  %vm1311_vm5 = vcmask 261120   ;;  %vm1095_vm6 = vcmask 15360   ;;  %vm1574_vm7 = vcmask 146432  }
   0x3   :  { %10466 = vmatprep.subr.mxu1 %v306_v1  ;;  %v63_v5 = vld [vmem:[%s14275_s4] sm:$0xff]  ;;  %10451 = vmatpush3.msra.mxu0 %v62_v0  ;;  %v64_v7 = vld [vmem:[%s14275_s4 + $0x8] sm:$0xff]  ;;  %v66_v11 = vld [vmem:[%s14275_s4 + $0x18] sm:$0xff]  ;;  %s12019_s8 = smov 112   ;;  %s12020_s15 = smov 80   ;;  %vm1559_vm8 = vcmask 1045504  }
   0x4   :  { %10467 = vmatpush3.msra.mxu1 %v306_v1  ;;  %v307_v6 = vld [vmem:[%s14275_s4 + $0x40] sm:$0xff]  ;;  %10452 = vmatprep.subr.mxu0 %v61_v2  ;;  %v308_v8 = vld [vmem:[%s14275_s4 + $0x48] sm:$0xff]  ;;  %v310_v12 = vld [vmem:[%s14275_s4 + $0x58] sm:$0xff]  ;;  %vm2113_vm9 = vcmask 654336   ;;  %vm2550_vm10 = vcmask 64512   ;;  %vm3194_vm11 = vcmask 785408  }
   0x5   :  { %10468 = vmatprep.subr.mxu1 %v305_v4  ;;  %10453 = vmatpush3.msra.mxu0 %v61_v2  ;;  %v69_v13 = vld [vmem:[%s14275_s4 + $0x30] sm:$0xff]  ;;  %v70_v14 = vld [vmem:[%s14275_s4 + $0x38] sm:$0xff]  ;;  %v67_v15 = vld [vmem:[%s14275_s4 + $0x20] sm:$0xff]  ;;  %vm9261_vm12 = vcmask 392192  }
   0x6   :  { %10454 = vmatprep.mubr.msk.f32.mxu0 %vm111_vm0, %v63_v5  ;;  %10469 = vmatpush3.msra.mxu1 %v305_v4  ;;  %v311_v16 = vld [vmem:[%s14275_s4 + $0x60] sm:$0xff]  ;;  %v68_v17 = vld [vmem:[%s14275_s4 + $0x28] sm:$0xff]  ;;  %v313_v19 = vld [vmem:[%s14275_s4 + $0x70] sm:$0xff] }
   0x7   :  { %10470 = vmatprep.mubr.msk.f32.mxu1 %vm111_vm0, %v307_v6  ;;  %10455 = vmatmul.mubr.msk.f32.vlgmr.msra.gmra.mxu0 %vm111_vm0, %v64_v7  ;;  %v312_v18 = vld [vmem:[%s14275_s4 + $0x68] sm:$0xff]  ;;  %v314_v20 = vld [vmem:[%s14275_s4 + $0x78] sm:$0xff]  ;;  %v556_v21 = vld [vmem:[%s14275_s4 + $0x80] sm:$0xff] }
   0x8   :  { %10471 = vmatmul.mubr.msk.f32.vlgmr.msra.gmra.mxu1 %vm111_vm0, %v308_v8  ;;  %10457 = vmatprep.mubr.msk.f32.mxu0 %vm111_vm0, %v65_v9  ;;  %v12139_v22 = vld [vmem:[%s14275_s4 + $0xb0] sm:$0xff]  ;;  %v12144_v23 = vld [vmem:[%s14275_s4 + $0xb8] sm:$0xff]  ;;  %v12161_v28 = vld [vmem:[%s14275_s4 + $0xa0] sm:$0xff] }
   0x9   :  { %10473 = vmatprep.mubr.msk.f32.mxu1 %vm111_vm0, %v309_v10  ;;  %108 = vperm.xlu0 %11683, %v70_v14   ;;  %v800_v25 = vld [vmem:[%s14275_s4 + $0xd0] sm:$0xff]  ;;  %v12166_v29 = vld [vmem:[%s14275_s4 + $0xa8] sm:$0xff]  ;;  %v12180_v32 = vld [vmem:[%s14275_s4 + $0x98] sm:$0xff] }
   0xa   :  { %103 = vperm.xlu1 %11684, %v69_v13   ;;  %v12175_v31 = vld [vmem:[%s14275_s4 + $0x90] sm:$0xff]  ;;  %v12189_v34 = vld [vmem:[%s14275_s4 + $0x88] sm:$0xff]  ;;  %v12197_v36 = vld [vmem:[%s14275_s4 + $0xc0] sm:$0xff] }
   0xb   :  { %10458 = vmatmul.mubr.msk.f32.gmra.mxu0 %vm111_vm0, %v66_v11  ;;  %v12202_v37 = vld [vmem:[%s14275_s4 + $0xc8] sm:$0xff]  ;;  %v12211_v39 = vld [vmem:[%s14275_s4 + $0xd8] sm:$0xff]  ;;  %v12221_v42 = vld [vmem:[%s14275_s4 + $0xe0] sm:$0xff] }
   0xc   :  { %10474 = vmatmul.mubr.msk.f32.gmra.mxu1 %vm111_vm0, %v310_v12  ;;  %10460 = vmatprep.mubr.msk.f32.mxu0 %vm111_vm0, %v67_v15  ;;  %v12226_v43 = vld [vmem:[%s14275_s4 + $0xe8] sm:$0xff]  ;;  %v12233_v45 = vld [vmem:[%s14275_s4 + $0xf0] sm:$0xff]  ;;  %v12238_v46 = vld [vmem:[%s14275_s4 + $0xf8] sm:$0xff] }
   0xd   :  { %10476 = vmatprep.mubr.msk.f32.mxu1 %vm111_vm0, %v311_v16  ;;  %352 = vperm.xlu0 %11683, %v314_v20  }
   0xe   :  { %347 = vperm.xlu1 %11684, %v313_v19  }
   0xf   :  { %10461 = vmatmul.mubr.msk.f32.gmra.mxu0 %vm111_vm0, %v68_v17 }
  0x10   :  { %10477 = vmatmul.mubr.msk.f32.gmra.mxu1 %vm111_vm0, %v312_v18  ;;  %10463 = vmatprep.mubr.msk.f32.mxu0 %vm111_vm0, %v69_v13 }
  0x11   :  { %10479 = vmatprep.mubr.msk.f32.mxu1 %vm111_vm0, %v313_v19  ;;  %98 = vperm.xlu0 %11683, %v68_v17  }
  0x12   :  { %342 = vperm.xlu1 %11684, %v312_v18  }
  0x13   :  { %10464 = vmatmul.mubr.msk.f32.gmra.mxu0 %vm111_vm0, %v70_v14 }
  0x14   :  { %10480 = vmatmul.mubr.msk.f32.gmra.mxu1 %vm111_vm0, %v314_v20  ;;  %10498 = vmatprep.mubr.msk.f32.mxu0 %vm604_vm1, %v556_v21 }
  0x15   :  { %93 = vperm.xlu0 %11683, %v67_v15   ;;  %10529 = vmatprep.mubr.msk.f32.mxu1 %vm604_vm1, %v800_v25 }
  0x16   :  { %337 = vperm.xlu1 %11684, %v311_v16  }
  0x19   :  { %88 = vperm.xlu0 %11683, %v66_v11  }
  0x1a   :  { %332 = vperm.xlu1 %11684, %v310_v12  }
  0x1d   :  { %83 = vperm.xlu0 %11683, %v65_v9  }
  0x1e   :  { %327 = vperm.xlu1 %11684, %v309_v10  }
  0x21   :  { %78 = vperm.xlu0 %11683, %v64_v7  }
  0x22   :  { %322 = vperm.xlu1 %11684, %v308_v8  }
  0x25   :  { %73 = vperm.xlu0 %11683, %v63_v5  }
  0x26   :  { %317 = vperm.xlu1 %11684, %v307_v6  }
  0x29   :  { %11685 = vset.pattern.permute.xlu0 %v14279_v24 }
  0x2a   :  { %11686 = vset.pattern.permute.xlu1 %v14279_v24  ;;  %601 = vperm.xlu0 %11685, %v12144_v23  }
  0x2b   :  { %596 = vperm.xlu1 %11686, %v12139_v22  }
  0x2e   :  { %586 = vperm.xlu0 %11685, %v12161_v28  }
  0x2f   :  { %591 = vperm.xlu1 %11686, %v12166_v29  }
  0x32   :  { %576 = vperm.xlu0 %11685, %v12175_v31  }
  0x33   :  { %581 = vperm.xlu1 %11686, %v12180_v32  }
  0x36   :  { %566 = vperm.xlu0 %11685, %v556_v21  }
  0x37   :  { %571 = vperm.xlu1 %11686, %v12189_v34  }
  0x3a   :  { %813 = vperm.xlu0 %11685, %v12202_v37  }
  0x3b   :  { %808 = vperm.xlu1 %11686, %v12197_v36  }
  0x3e   :  { %823 = vperm.xlu0 %11685, %v12211_v39  }
  0x3f   :  { %818 = vperm.xlu1 %11686, %v800_v25  }
  0x42   :  { %833 = vperm.xlu0 %11685, %v12226_v43  }
  0x43   :  { %828 = vperm.xlu1 %11686, %v12221_v42  }
  0x46   :  { %843 = vperm.xlu0 %11685, %v12238_v46  }
  0x47   :  { %838 = vperm.xlu1 %11686, %v12233_v45  }
  0x84   :  { %v12153_v26 = vpop.permute.xlu0 %108 }
  0x85   :  { %v12156_v27 = vpop.permute.xlu1 %103 }
  0x88   :  { %v12170_v30 = vpop.permute.xlu0 %352 }
  0x89   :  { %v12184_v33 = vpop.permute.xlu1 %347 }
  0x8c   :  { %v12192_v35 = vpop.permute.xlu0 %98 }
  0x8d   :  { %v12204_v38 = vpop.permute.xlu1 %342 }
  0x90   :  { %v12213_v40 = vpop.permute.xlu0 %93 }
  0x91   :  { %v12216_v41 = vpop.permute.xlu1 %337 }
  0x94   :  { %v89_v44 = vpop.permute.xlu0 %88 }
  0x95   :  { %v333_v47 = vpop.permute.xlu1 %332 }
  0x98   :  { %v84_v48 = vpop.permute.xlu0 %83 }
  0x99   :  { %v328_v49 = vpop.permute.xlu1 %327 }
  0x9c   :  { %v79_v50 = vpop.permute.xlu0 %78 }
  0x9d   :  { %v323_v51 = vpop.permute.xlu1 %322 }
  0xa0   :  { %v74_v54 = vpop.permute.xlu0 %73 }
  0xa1   :  { %v318_v58 = vpop.permute.xlu1 %317 }
  0xc7   :  { %v10456_v52 = vpop.f32.mrf.mxu0 }
  0xc8   :  { %v10472_v53 = vpop.f32.mrf.mxu1  ;;  %v12242_v55 = vadd.f32 %v10456_v52, %v79_v50 }
  0xc9   :  { %v194_v56 = vpop.f32.mrf.mxu0  ;;  %v12246_v60 = vadd.f32 %v10472_v53, %v323_v51 }
  0xca   :  { %v437_v57 = vpop.f32.mrf.mxu1  ;;  %v234_v59 = vmul.f32 %v12242_v55, %v12242_v55  ;;  %v12248_v61 = vadd.f32 %v194_v56, %v74_v54 }
  0xcb   :  { %v10459_v62 = vpop.f32.mrf.mxu0  ;;  %v12251_v1 = vadd.f32 %v437_v57, %v318_v58  ;;  %v477_v7 = vmul.f32 %v12246_v60, %v12246_v60 }
  0xcc   :  { %v10475_v63 = vpop.f32.mrf.mxu1  ;;  %v242_v0 = vmul.f32 %v234_v59, %v12242_v55  ;;  %v12253_v2 = vadd.f32 %v10459_v62, %v89_v44  ;;  %v233_v8 = vmul.f32 %v12248_v61, %v12248_v61 }
  0xcd   :  { %v12255_v3 = vadd.f32 %v10475_v63, %v333_v47  ;;  %v204_v4 = vpop.f32.mrf.mxu0  ;;  %v476_v16 = vmul.f32 %v12251_v1, %v12251_v1  ;;  %v485_v21 = vmul.f32 %v477_v7, %v12246_v60 }
  0xce   :  { %v447_v5 = vpop.f32.mrf.mxu1  ;;  %v250_v6 = vmul.f32 0.044715, %v242_v0  ;;  %v236_v9 = vmul.f32 %v12253_v2, %v12253_v2  ;;  %v12265_v11 = vadd.f32 %v204_v4, %v84_v48  ;;  %v241_v25 = vmul.f32 %v233_v8, %v12248_v61 }
  0xcf   :  { %v479_v10 = vmul.f32 %v12255_v3, %v12255_v3  ;;  %v12267_v12 = vadd.f32 %v447_v5, %v328_v49  ;;  %v10462_v13 = vpop.f32.mrf.mxu0  ;;  %v484_v54 = vmul.f32 %v476_v16, %v12251_v1  ;;  %v493_v4 = vmul.f32 0.044715, %v485_v21 }
  0xd0   :  { %v10478_v14 = vpop.f32.mrf.mxu1  ;;  %v258_v15 = vadd.f32 %v250_v6, %v12242_v55  ;;  %v244_v17 = vmul.f32 %v236_v9, %v12253_v2  ;;  %v235_v19 = vmul.f32 %v12265_v11, %v12265_v11  ;;  %v12283_v52 = vadd.f32 %v10462_v13, %v12192_v35 }
  0xd1   :  { %v487_v18 = vmul.f32 %v479_v10, %v12255_v3  ;;  %v478_v20 = vmul.f32 %v12267_v12, %v12267_v12  ;;  %v214_v44 = vpop.f32.mrf.mxu0  ;;  %v12291_v63 = vadd.f32 %v10478_v14, %v12204_v38  ;;  %v249_v5 = vmul.f32 0.044715, %v241_v25 }
  0xd2   :  { %v252_v47 = vmul.f32 0.044715, %v244_v17  ;;  %v243_v49 = vmul.f32 %v235_v19, %v12265_v11  ;;  %v457_v51 = vpop.f32.mrf.mxu1  ;;  %v266_v53 = vmul.f32 0.7978846, %v258_v15  ;;  %v238_v62 = vmul.f32 %v12283_v52, %v12283_v52 }
  0xd3   :  { %v495_v48 = vmul.f32 0.044715, %v487_v18  ;;  %v486_v50 = vmul.f32 %v478_v20, %v12267_v12  ;;  %v10465_v0 = vpop.f32.mrf.mxu0  ;;  %v481_v9 = vmul.f32 %v12291_v63, %v12291_v63  ;;  %v12298_v10 = vadd.f32 %v214_v44, %v12213_v40 }
  0xd4   :  { %v260_v56 = vadd.f32 %v252_v47, %v12253_v2  ;;  %v251_v57 = vmul.f32 0.044715, %v243_v49  ;;  %v10481_v6 = vpop.f32.mrf.mxu1  ;;  %v246_v8 = vmul.f32 %v238_v62, %v12283_v52  ;;  %11759 = vtanh.f32 %v266_v53 }
  0xd5   :  { %v503_v58 = vadd.f32 %v495_v48, %v12255_v3  ;;  %v494_v59 = vmul.f32 0.044715, %v486_v50  ;;  %v492_v13 = vmul.f32 0.044715, %v484_v54  ;;  %v12301_v38 = vadd.f32 %v457_v51, %v12216_v41  ;;  %v224_v19 = vpop.f32.mrf.mxu0 }
  0xd6   :  { %v268_v35 = vmul.f32 0.7978846, %v260_v56  ;;  %v259_v7 = vadd.f32 %v251_v57, %v12265_v11  ;;  %v12304_v14 = vadd.f32 %v10465_v0, %v12153_v26  ;;  %v254_v17 = vmul.f32 0.044715, %v246_v8  ;;  %v467_v21 = vpop.f32.mrf.mxu1 }
  0xd7   :  { %v511_v15 = vmul.f32 0.7978846, %v503_v58  ;;  %v502_v16 = vadd.f32 %v494_v59, %v12267_v12  ;;  %v489_v18 = vmul.f32 %v481_v9, %v12291_v63  ;;  %v237_v40 = vmul.f32 %v12298_v10, %v12298_v10 }
  0xd8   :  { %11761 = vtanh.f32 %v268_v35  ;;  %v480_v20 = vmul.f32 %v12301_v38, %v12301_v38  ;;  %v240_v41 = vmul.f32 %v12304_v14, %v12304_v14  ;;  %v267_v26 = vmul.f32 0.7978846, %v259_v7 }
  0xd9   :  { %v262_v25 = vadd.f32 %v254_v17, %v12283_v52  ;;  %v497_v44 = vmul.f32 0.044715, %v489_v18  ;;  %v12316_v47 = vadd.f32 %v10481_v6, %v12170_v30  ;;  %v245_v48 = vmul.f32 %v237_v40, %v12298_v10 }
  0xda   :  { %v488_v49 = vmul.f32 %v480_v20, %v12301_v38  ;;  %v248_v50 = vmul.f32 %v240_v41, %v12304_v14  ;;  %v12322_v51 = vadd.f32 %v224_v19, %v12156_v27  ;;  %v12328_v57 = vadd.f32 %v467_v21, %v12184_v33 }
  0xdb   :  { %v270_v53 = vmul.f32 0.7978846, %v262_v25  ;;  %v505_v54 = vadd.f32 %v497_v44, %v12291_v63  ;;  %v483_v56 = vmul.f32 %v12316_v47, %v12316_v47  ;;  %v253_v30 = vmul.f32 0.044715, %v245_v48 }
  0xdc   :  { %v496_v58 = vmul.f32 0.044715, %v488_v49  ;;  %v256_v59 = vmul.f32 0.044715, %v248_v50  ;;  %v239_v62 = vmul.f32 %v12322_v51, %v12322_v51  ;;  %11763 = vtanh.f32 %v511_v15 }
  0xdd   :  { %v513_v0 = vmul.f32 0.7978846, %v505_v54  ;;  %v491_v27 = vmul.f32 %v483_v56, %v12316_v47  ;;  %v482_v35 = vmul.f32 %v12328_v57, %v12328_v57  ;;  %v261_v6 = vadd.f32 %v253_v30, %v12298_v10 }
  0xde   :  { %v504_v7 = vadd.f32 %v496_v58, %v12301_v38  ;;  %v264_v33 = vadd.f32 %v256_v59, %v12304_v14  ;;  %v247_v8 = vmul.f32 %v239_v62, %v12322_v51  ;;  %v501_v9 = vadd.f32 %v493_v4, %v12246_v60 }
  0xdf   :  { %11765 = vtanh.f32 %v267_v26  ;;  %v499_v17 = vmul.f32 0.044715, %v491_v27  ;;  %v490_v15 = vmul.f32 %v482_v35, %v12328_v57  ;;  %v269_v18 = vmul.f32 0.7978846, %v261_v6 }
  0xe0   :  { %11767 = vtanh.f32 %v270_v53  ;;  %v512_v19 = vmul.f32 0.7978846, %v504_v7  ;;  %v272_v40 = vmul.f32 0.7978846, %v264_v33  ;;  %v255_v41 = vmul.f32 0.044715, %v247_v8 }
  0xe1   :  { %11769 = vtanh.f32 %v513_v0  ;;  %v507_v20 = vadd.f32 %v499_v17, %v12316_v47  ;;  %v498_v21 = vmul.f32 0.044715, %v490_v15  ;;  %v257_v25 = vadd.f32 %v249_v5, %v12248_v61  ;;  %v11760_v4 = vpop.eup %11759 }
  0xe2   :  { %v500_v44 = vadd.f32 %v492_v13, %v12251_v1  ;;  %v510_v48 = vmul.f32 0.7978846, %v502_v16  ;;  %11771 = vtanh.f32 %v269_v18  ;;  %v263_v49 = vadd.f32 %v255_v41, %v12322_v51 }
  0xe3   :  { %11773 = vtanh.f32 %v512_v19  ;;  %v515_v26 = vmul.f32 0.7978846, %v507_v20  ;;  %v506_v50 = vadd.f32 %v498_v21, %v12328_v57  ;;  %v509_v54 = vmul.f32 0.7978846, %v501_v9 }
  0xe4   :  { %11775 = vtanh.f32 %v272_v40  ;;  %v271_v56 = vmul.f32 0.7978846, %v263_v49  ;;  %v265_v58 = vmul.f32 0.7978846, %v257_v25  ;;  %v508_v5 = vmul.f32 0.7978846, %v500_v44 }
  0xe5   :  { %v11762_v53 = vpop.eup %11761  ;;  %11777 = vtanh.f32 %v515_v26  ;;  %v514_v30 = vmul.f32 0.7978846, %v506_v50 }
  0xe6   :  { %11779 = vtanh.f32 %v510_v48  ;;  %v284_v25 = vadd.f32 1.0, %v11762_v53 }
  0xe7   :  { %11781 = vtanh.f32 %v271_v56 }
  0xe8   :  { %11783 = vtanh.f32 %v514_v30 }
  0xe9   :  { %11785 = vtanh.f32 %v509_v54  ;;  %v11764_v13 = vpop.eup %11763 }
  0xea   :  { %11787 = vtanh.f32 %v265_v58  ;;  %v527_v44 = vadd.f32 1.0, %v11764_v13  ;;  %v292_v13 = vmul.f32 0.5, %v284_v25 }
  0xeb   :  { %11789 = vtanh.f32 %v508_v5 }
  0xec   :  { %v11766_v16 = vpop.eup %11765 }
  0xed   :  { %v11768_v59 = vpop.eup %11767  ;;  %v283_v5 = vadd.f32 1.0, %v11766_v16 }
  0xee   :  { %v11770_v62 = vpop.eup %11769  ;;  %v286_v33 = vadd.f32 1.0, %v11768_v59  ;;  %v282_v59 = vadd.f32 1.0, %v11760_v4 }
  0xef   :  { %v11772_v0 = vpop.eup %11771  ;;  %v529_v8 = vadd.f32 1.0, %v11770_v62  ;;  %v291_v16 = vmul.f32 0.5, %v283_v5 }
  0xf0   :  { %v11774_v27 = vpop.eup %11773  ;;  %v285_v19 = vadd.f32 1.0, %v11772_v0  ;;  %v294_v50 = vmul.f32 0.5, %v286_v33 }
  0xf1   :  { %v11776_v35 = vpop.eup %11775  ;;  %v528_v40 = vadd.f32 1.0, %v11774_v27  ;;  %v537_v54 = vmul.f32 0.5, %v529_v8  ;;  %v299_v25 = vmul.f32 %v291_v16, %v12265_v11 }
  0xf2   :  { %v11778_v6 = vpop.eup %11777  ;;  %v288_v7 = vadd.f32 1.0, %v11776_v35  ;;  %v293_v27 = vmul.f32 0.5, %v285_v19  ;;  %v302_v33 = vmul.f32 %v294_v50, %v12283_v52 }
  0xf3   :  { %v11780_v9 = vpop.eup %11779  ;;  %v531_v17 = vadd.f32 1.0, %v11778_v6  ;;  %v536_v35 = vmul.f32 0.5, %v528_v40  ;;  %v545_v8 = vmul.f32 %v537_v54, %v12291_v63  ;;  %v290_v40 = vmul.f32 0.5, %v282_v59 }
  0xf4   :  { %v11782_v15 = vpop.eup %11781  ;;  %v296_v18 = vmul.f32 0.5, %v288_v7  ;;  %v526_v6 = vadd.f32 1.0, %v11780_v9  ;;  %v301_v9 = vmul.f32 %v293_v27, %v12298_v10 }
  0xf5   :  { %v11784_v20 = vpop.eup %11783  ;;  %v539_v41 = vmul.f32 0.5, %v531_v17  ;;  %v287_v21 = vadd.f32 1.0, %v11782_v15  ;;  %v544_v19 = vmul.f32 %v536_v35, %v12301_v38 }
  0xf6   :  { %v11786_v48 = vpop.eup %11785  ;;  %v304_v26 = vmul.f32 %v296_v18, %v12304_v14  ;;  %v530_v49 = vadd.f32 1.0, %v11784_v20  ;;  %v553_v20 = vadd.f32 %v545_v8, %v302_v33 }
  0xf7   :  { %v11788_v56 = vpop.eup %11787  ;;  %v547_v30 = vmul.f32 %v539_v41, %v12316_v47  ;;  %v295_v58 = vmul.f32 0.5, %v287_v21  ;;  %v525_v17 = vadd.f32 1.0, %v11786_v48  ;;  %v535_v47 = vmul.f32 0.5, %v527_v44 }
  0xf8   :  { %v11790_v62 = vpop.eup %11789  ;;  %v538_v0 = vmul.f32 0.5, %v530_v49  ;;  %v281_v4 = vadd.f32 1.0, %v11788_v56  ;;  %v552_v21 = vadd.f32 %v544_v19, %v301_v9  ;;  %v298_v48 = vmul.f32 %v290_v40, %v12242_v55 }
  0xf9   :  { %v555_v7 = vadd.f32 %v547_v30, %v304_v26  ;;  %v303_v53 = vmul.f32 %v295_v58, %v12322_v51  ;;  %v524_v15 = vadd.f32 1.0, %v11790_v62  ;;  %v534_v51 = vmul.f32 0.5, %v526_v6 }
  0xfa   :  { %v546_v14 = vmul.f32 %v538_v0, %v12328_v57  ;;  %v300_v57 = vmul.f32 %v292_v13, %v12253_v2  ;;  %v543_v52 = vmul.f32 %v535_v47, %v12255_v3  ;;  %v533_v63 = vmul.f32 0.5, %v525_v17 }
  0xfb   :  { %10482 = vmatprep.subr.mxu0 %v555_v7  ;;  %v289_v41 = vmul.f32 0.5, %v281_v4  ;;  %v542_v44 = vmul.f32 %v534_v51, %v12267_v12  ;;  %v532_v10 = vmul.f32 0.5, %v524_v15 }
  0xfc   :  { %10483 = vmatpush3.msra.mxu0 %v555_v7  ;;  %v554_v18 = vadd.f32 %v546_v14, %v303_v53  ;;  %v551_v38 = vadd.f32 %v543_v52, %v300_v57  ;;  %v541_v26 = vmul.f32 %v533_v63, %v12246_v60 }
  0xfd   :  { %v550_v2 = vadd.f32 %v542_v44, %v299_v25  ;;  %v297_v3 = vmul.f32 %v289_v41, %v12248_v61  ;;  %v540_v49 = vmul.f32 %v532_v10, %v12251_v1 }
  0xfe   :  { %10484 = vmatprep.subr.mxu0 %v554_v18  ;;  %v549_v11 = vadd.f32 %v541_v26, %v298_v48 }
  0xff   :  { %10485 = vmatpush3.msra.mxu0 %v554_v18  ;;  %v548_v12 = vadd.f32 %v540_v49, %v297_v3 }
 0x100   :  { %10486 = vmatprep.subr.mxu0 %v553_v20 }
 0x101   :  { %10487 = vmatpush3.msra.mxu0 %v553_v20 }
 0x102   :  { %10488 = vmatprep.subr.mxu0 %v552_v21 }
 0x103   :  { %10489 = vmatpush3.msra.mxu0 %v552_v21 }
 0x104   :  { %10490 = vmatprep.subr.mxu0 %v551_v38 }
 0x105   :  { %10491 = vmatpush3.msra.mxu0 %v551_v38 }
 0x106   :  { %10492 = vmatprep.subr.mxu0 %v550_v2 }
 0x107   :  { %10493 = vmatpush3.msra.mxu0 %v550_v2 }
 0x108   :  { %10494 = vmatprep.subr.mxu0 %v549_v11 }
 0x109   :  { %10495 = vmatpush3.msra.mxu0 %v549_v11 }
 0x10a   :  { %10496 = vmatprep.subr.mxu0 %v548_v12 }
 0x10b   :  { %10497 = vmatpush3.msra.mxu0 %v548_v12 }
 0x10c   :  { %10499 = vmatmul.mubr.msk.f32.vlgmr.msra.gmra.mxu0 %vm604_vm1, %v12189_v34 }
 0x10d   :  { %10501 = vmatprep.mubr.msk.f32.mxu0 %vm604_vm1, %v12175_v31  ;;  %v12381_v31 = vld [vmem:[%s14275_s4 + $0x3a0] sm:$0xff] }
 0x10e   :  { %1477 = vrot.lane.b32.xlu1 %v12381_v31, %s12014_s11  ;;  %1395 = vrot.lane.b32.xlu0 %v12381_v31, %s12015_s12 }
 0x110   :  { %10502 = vmatmul.mubr.msk.f32.gmra.mxu0 %vm604_vm1, %v12180_v32  ;;  %v602_v32 = vpop.permute.xlu0 %601 }
 0x111   :  { %10504 = vmatprep.mubr.msk.f32.mxu0 %vm604_vm1, %v12161_v28  ;;  %v12408_v28 = vld [vmem:[%s14275_s4 + $0x388] sm:$0xff] }
 0x114   :  { %10505 = vmatmul.mubr.msk.f32.gmra.mxu0 %vm604_vm1, %v12166_v29  ;;  %v597_v29 = vpop.permute.xlu1 %596 }
 0x115   :  { %10507 = vmatprep.mubr.msk.f32.mxu0 %vm604_vm1, %v12139_v22  ;;  %v12390_v22 = vld [vmem:[%s14275_s4 + $0x398] sm:$0xff] }
 0x116   :  { %1475 = vrot.lane.b32.xlu1 %v12390_v22, %s12014_s11  ;;  %1393 = vrot.lane.b32.xlu0 %v12390_v22, %s12015_s12 }
 0x118   :  { %10508 = vmatmul.mubr.msk.f32.gmra.mxu0 %vm604_vm1, %v12144_v23  ;;  %v12399_v23 = vld [vmem:[%s14275_s4 + $0x390] sm:$0xff]  ;;  %v592_v34 = vpop.permute.xlu1 %591 }
 0x119   :  { %10526 = vmatprep.mubr.msk.f32.mxu0 %vm604_vm1, %v12197_v36  ;;  %v587_v36 = vpop.permute.xlu0 %586 }
 0x11a   :  { %1473 = vrot.lane.b32.xlu1 %v12399_v23, %s12014_s11  ;;  %1391 = vrot.lane.b32.xlu0 %v12399_v23, %s12015_s12 }
 0x11c   :  { %v582_v55 = vpop.permute.xlu1 %581 }
 0x11d   :  { %v577_v61 = vpop.permute.xlu0 %576 }
 0x11e   :  { %1471 = vrot.lane.b32.xlu1 %v12408_v28, %s12014_s11  ;;  %1389 = vrot.lane.b32.xlu0 %v12408_v28, %s12015_s12 }
 0x120   :  { %v572_v56 = vpop.permute.xlu1 %571 }
 0x121   :  { %v567_v59 = vpop.permute.xlu0 %566 }
 0x1cc   :  { %v10500_v60 = vpop.f32.mrf.mxu0 }
 0x1cd   :  { %v12416_v58 = vadd.f32 %v10500_v60, %v572_v56 }
 0x1ce   :  { %v687_v1 = vpop.f32.mrf.mxu0 }
 0x1cf   :  { %v12422_v27 = vadd.f32 %v687_v1, %v567_v59  ;;  %v727_v53 = vmul.f32 %v12416_v58, %v12416_v58 }
 0x1d0   :  { %v10503_v50 = vpop.f32.mrf.mxu0 }
 0x1d1   :  { %v12414_v54 = vadd.f32 %v10503_v50, %v582_v55  ;;  %v726_v8 = vmul.f32 %v12422_v27, %v12422_v27  ;;  %v735_v9 = vmul.f32 %v727_v53, %v12416_v58 }
 0x1d2   :  { %v697_v30 = vpop.f32.mrf.mxu0 }
 0x1d3   :  { %v12418_v5 = vadd.f32 %v697_v30, %v577_v61  ;;  %v729_v62 = vmul.f32 %v12414_v54, %v12414_v54  ;;  %v734_v52 = vmul.f32 %v726_v8, %v12422_v27  ;;  %v743_v10 = vmul.f32 0.044715, %v735_v9 }
 0x1d4   :  { %v10506_v0 = vpop.f32.mrf.mxu0 }
 0x1d5   :  { %v728_v35 = vmul.f32 %v12418_v5, %v12418_v5  ;;  %v12426_v6 = vadd.f32 %v10506_v0, %v592_v34  ;;  %v737_v13 = vmul.f32 %v729_v62, %v12414_v54  ;;  %v742_v11 = vmul.f32 0.044715, %v734_v52 }
 0x1d6   :  { %v707_v7 = vpop.f32.mrf.mxu0 }
 0x1d7   :  { %v731_v17 = vmul.f32 %v12426_v6, %v12426_v6  ;;  %v12433_v14 = vadd.f32 %v707_v7, %v587_v36  ;;  %v736_v47 = vmul.f32 %v728_v35, %v12418_v5  ;;  %v745_v51 = vmul.f32 0.044715, %v737_v13 }
 0x1d8   :  { %v10509_v33 = vpop.f32.mrf.mxu0  ;;  %v751_v36 = vadd.f32 %v743_v10, %v12416_v58  ;;  %v750_v1 = vadd.f32 %v742_v11, %v12422_v27 }
 0x1d9   :  { %v739_v16 = vmul.f32 %v731_v17, %v12426_v6  ;;  %v730_v4 = vmul.f32 %v12433_v14, %v12433_v14  ;;  %v723_v15 = vadd.f32 %v10509_v33, %v602_v32  ;;  %v744_v41 = vmul.f32 0.044715, %v736_v47 }
 0x1da   :  { %v717_v18 = vpop.f32.mrf.mxu0  ;;  %v753_v48 = vadd.f32 %v745_v51, %v12414_v54  ;;  %v759_v56 = vmul.f32 0.7978846, %v751_v36  ;;  %v758_v30 = vmul.f32 0.7978846, %v750_v1 }
 0x1db   :  { %v718_v19 = vadd.f32 %v717_v18, %v597_v29  ;;  %v747_v40 = vmul.f32 0.044715, %v739_v16  ;;  %v738_v20 = vmul.f32 %v730_v4, %v12433_v14  ;;  %v733_v57 = vmul.f32 %v723_v15, %v723_v15 }
 0x1dc   :  { %v752_v12 = vadd.f32 %v744_v41, %v12418_v5  ;;  %v761_v55 = vmul.f32 0.7978846, %v753_v48 }
 0x1dd   :  { %v732_v63 = vmul.f32 %v718_v19, %v718_v19  ;;  %v755_v21 = vadd.f32 %v747_v40, %v12426_v6  ;;  %v746_v25 = vmul.f32 0.044715, %v738_v20  ;;  %v741_v44 = vmul.f32 %v733_v57, %v723_v15 }
 0x1de   :  { %v760_v50 = vmul.f32 0.7978846, %v752_v12 }
 0x1df   :  { %v740_v38 = vmul.f32 %v732_v63, %v718_v19  ;;  %v763_v26 = vmul.f32 0.7978846, %v755_v21  ;;  %v754_v2 = vadd.f32 %v746_v25, %v12433_v14  ;;  %v749_v3 = vmul.f32 0.044715, %v741_v44 }
 0x1e1   :  { %v748_v49 = vmul.f32 0.044715, %v740_v38  ;;  %v762_v29 = vmul.f32 0.7978846, %v754_v2  ;;  %v757_v32 = vadd.f32 %v749_v3, %v723_v15  ;;  %11791 = vtanh.f32 %v763_v26 }
 0x1e3   :  { %v756_v34 = vadd.f32 %v748_v49, %v718_v19  ;;  %v765_v60 = vmul.f32 0.7978846, %v757_v32  ;;  %11793 = vtanh.f32 %v762_v29 }
 0x1e5   :  { %v764_v61 = vmul.f32 0.7978846, %v756_v34  ;;  %11795 = vtanh.f32 %v765_v60 }
 0x1e7   :  { %11797 = vtanh.f32 %v764_v61 }
 0x1e8   :  { %11799 = vtanh.f32 %v761_v55 }
 0x1e9   :  { %11801 = vtanh.f32 %v760_v50 }
 0x1ea   :  { %11803 = vtanh.f32 %v759_v56 }
 0x1eb   :  { %11805 = vtanh.f32 %v758_v30 }
 0x1ee   :  { %v11792_v59 = vpop.eup %11791 }
 0x1ef   :  { %v779_v53 = vadd.f32 1.0, %v11792_v59 }
 0x1f0   :  { %v11794_v62 = vpop.eup %11793 }
 0x1f1   :  { %v778_v8 = vadd.f32 1.0, %v11794_v62  ;;  %v787_v18 = vmul.f32 0.5, %v779_v53 }
 0x1f2   :  { %v11796_v0 = vpop.eup %11795 }
 0x1f3   :  { %v781_v7 = vadd.f32 1.0, %v11796_v0  ;;  %v786_v20 = vmul.f32 0.5, %v778_v8  ;;  %v795_v63 = vmul.f32 %v787_v18, %v12426_v6 }
 0x1f4   :  { %v11798_v35 = vpop.eup %11797 }
 0x1f5   :  { %v11800_v13 = vpop.eup %11799  ;;  %v780_v17 = vadd.f32 1.0, %v11798_v35  ;;  %v789_v33 = vmul.f32 0.5, %v781_v7 }
 0x1f6   :  { %v11802_v47 = vpop.eup %11801  ;;  %v777_v9 = vadd.f32 1.0, %v11800_v13 }
 0x1f7   :  { %v788_v16 = vmul.f32 0.5, %v780_v17  ;;  %v797_v4 = vmul.f32 %v789_v33, %v723_v15  ;;  %v11804_v51 = vpop.eup %11803  ;;  %v776_v57 = vadd.f32 1.0, %v11802_v47  ;;  %v794_v15 = vmul.f32 %v786_v20, %v12433_v14 }
 0x1f8   :  { %v11806_v52 = vpop.eup %11805  ;;  %v785_v41 = vmul.f32 0.5, %v777_v9  ;;  %v775_v21 = vadd.f32 1.0, %v11804_v51 }
 0x1f9   :  { %v796_v40 = vmul.f32 %v788_v16, %v718_v19  ;;  %10510 = vmatprep.subr.mxu0 %v797_v4  ;;  %11653 = vmatprep.subr.mxu1 %v797_v4  ;;  %v784_v19 = vmul.f32 0.5, %v776_v57  ;;  %v774_v25 = vadd.f32 1.0, %v11806_v52 }
 0x1fa   :  { %10511 = vmatpush3.msra.mxu0 %v797_v4  ;;  %11661 = vmatpush3.msra.mxu1 %v797_v4  ;;  %v793_v44 = vmul.f32 %v785_v41, %v12414_v54  ;;  %v783_v10 = vmul.f32 0.5, %v775_v21 }
 0x1fb   :  { %10512 = vmatprep.subr.mxu0 %v796_v40  ;;  %11654 = vmatprep.subr.mxu1 %v796_v40  ;;  %v792_v6 = vmul.f32 %v784_v19, %v12418_v5  ;;  %v782_v38 = vmul.f32 0.5, %v774_v25  ;;  %v1232_v5 = vld [vmem:[%s14275_s4 + $0x4d8] sm:$0xff]  ;;  %v1229_v19 = vld [vmem:[%s14277_s3] sm:$0xf] }
 0x1fc   :  { %10513 = vmatpush3.msra.mxu0 %v796_v40  ;;  %11662 = vmatpush3.msra.mxu1 %v796_v40  ;;  %v791_v14 = vmul.f32 %v783_v10, %v12416_v58  ;;  %v14287_v58 = vmov 0.0  }
 0x1fd   :  { %10514 = vmatprep.subr.mxu0 %v795_v63  ;;  %11655 = vmatprep.subr.mxu1 %v795_v63  ;;  %v790_v54 = vmul.f32 %v782_v38, %v12422_v27  ;;  %v1231_v27 = vld [vmem:[%s14275_s4 + $0x4d0] sm:$0xff] }
 0x1fe   :  { %10515 = vmatpush3.msra.mxu0 %v795_v63  ;;  %11663 = vmatpush3.msra.mxu1 %v795_v63 }
 0x1ff   :  { %10516 = vmatprep.subr.mxu0 %v794_v15  ;;  %11656 = vmatprep.subr.mxu1 %v794_v15 }
 0x200   :  { %10517 = vmatpush3.msra.mxu0 %v794_v15  ;;  %11664 = vmatpush3.msra.mxu1 %v794_v15 }
 0x201   :  { %10518 = vmatprep.subr.mxu0 %v793_v44  ;;  %11657 = vmatprep.subr.mxu1 %v793_v44 }
 0x202   :  { %10519 = vmatpush3.msra.mxu0 %v793_v44  ;;  %11665 = vmatpush3.msra.mxu1 %v793_v44 }
 0x203   :  { %10520 = vmatprep.subr.mxu0 %v792_v6  ;;  %11658 = vmatprep.subr.mxu1 %v792_v6 }
 0x204   :  { %10521 = vmatpush3.msra.mxu0 %v792_v6  ;;  %11666 = vmatpush3.msra.mxu1 %v792_v6 }
 0x205   :  { %10522 = vmatprep.subr.mxu0 %v791_v14  ;;  %11659 = vmatprep.subr.mxu1 %v791_v14 }
 0x206   :  { %10523 = vmatpush3.msra.mxu0 %v791_v14  ;;  %11667 = vmatpush3.msra.mxu1 %v791_v14 }
 0x207   :  { %10524 = vmatprep.subr.mxu0 %v790_v54  ;;  %11660 = vmatprep.subr.mxu1 %v790_v54 }
 0x208   :  { %10525 = vmatpush3.msra.mxu0 %v790_v54  ;;  %11668 = vmatpush3.msra.mxu1 %v790_v54 }
 0x209   :  { %10527 = vmatmul.mubr.msk.f32.vlgmr.msra.gmra.mxu0 %vm604_vm1, %v12202_v37  ;;  %10530 = vmatmul.mubr.msk.f32.vlgmr.msra.gmra.mxu1 %vm604_vm1, %v12211_v39  ;;  %v1230_v37 = vld [vmem:[%s14276_s2] sm:$0x3]  ;;  %v34_v39 = vld [vmem:[%s14275_s4 + $0x3f8] sm:$0x3] }
 0x20a   :  { %10532 = vmatprep.mubr.msk.f32.mxu1 %vm604_vm1, %v12221_v42  ;;  %10552 = vmatprep.subr.mxu1 %v14287_v58  ;;  %v809_v42 = vpop.permute.xlu1 %808 }
 0x20b   :  { %10553 = vmatpush3.msra.mxu1 %v1232_v5  ;;  %10538 = vmatprep.subr.msk.mxu0 %vm1120_vm3, %v34_v39 }
 0x20c   :  { %10554 = vmatprep.subr.mxu1 %v14287_v58  ;;  %10539 = vmatpush3.msk.msra.mxu0 %vm1120_vm3, %v34_v39 }
 0x20d   :  { %10533 = vmatmul.mubr.msk.f32.gmra.mxu1 %vm604_vm1, %v12226_v43  ;;  %10570 = vmatprep.subr.mxu0 %v14287_v58 }
 0x20e   :  { %10535 = vmatprep.mubr.msk.f32.mxu1 %vm604_vm1, %v12233_v45  ;;  %10555 = vmatpush3.msra.mxu1 %v1231_v27  ;;  %v819_v43 = vpop.permute.xlu1 %818  ;;  %v814_v45 = vpop.permute.xlu0 %813 }
 0x20f   :  { %10559 = vmatprep.subr.mxu1 %v14287_v58 }
 0x211   :  { %10536 = vmatmul.mubr.msk.f32.gmra.mxu1 %vm604_vm1, %v12238_v46 }
 0x212   :  { %10556 = vmatprep.mubr.msk.f32.mxu1 %vm12017_vm2, %v14287_v58  ;;  %v829_v46 = vpop.permute.xlu1 %828 }
 0x215   :  { %10557 = vmatmul.mubr.msk.f32.vlgmr.msra.gmra.mxu1 %vm111_vm0, %v1230_v37 }
 0x216   :  { %10560 = vmatpush3.msra.mxu1 %v12381_v31  ;;  %10567 = vmatprep.mubr.msk.f32.mxu1 %vm12017_vm2, %v14287_v58  ;;  %v824_v31 = vpop.permute.xlu0 %823 }
 0x217   :  { %10561 = vmatprep.subr.mxu1 %v14287_v58 }
 0x218   :  { %10562 = vmatpush3.msra.mxu1 %v12390_v22  ;;  %v839_v22 = vpop.permute.xlu1 %838 }
 0x219   :  { %10563 = vmatprep.subr.mxu1 %v14287_v58 }
 0x21a   :  { %10564 = vmatpush3.msra.mxu1 %v12399_v23  ;;  %v834_v11 = vpop.permute.xlu0 %833 }
 0x21b   :  { %10565 = vmatprep.subr.mxu1 %v14287_v58 }
 0x21c   :  { %10566 = vmatpush3.msra.mxu1 %v12408_v28  ;;  %v12503_v2 = vpop.permute.xlu1 %1477 }
 0x21d   :  { %10581 = vmatprep.subr.mxu1 %v14287_v58  ;;  %14316 = vst [vmem:[#allocation2_spill] sm:$0xff] %v12503_v2 }
 0x21e   :  { %v844_v17 = vpop.permute.xlu0 %843 }
 0x220   :  { %v12527_v13 = vpop.permute.xlu1 %1475 }
 0x221   :  { %14317 = vst [vmem:[#allocation3_spill] sm:$0xff] %v12527_v13 }
 0x224   :  { %v12548_v5 = vpop.permute.xlu1 %1473 }
 0x225   :  { %14318 = vst [vmem:[#allocation4_spill] sm:$0xff] %v12548_v5 }
 0x2c9   :  { %v10528_v23 = vpop.f32.mrf.mxu0  ;;  %v10531_v28 = vpop.f32.mrf.mxu1 }
 0x2ca   :  { %v12499_v48 = vadd.f32 %v10528_v23, %v814_v45  ;;  %v12501_v26 = vadd.f32 %v10531_v28, %v824_v31 }
 0x2cb   :  { %v928_v3 = vpop.f32.mrf.mxu0  ;;  %v938_v49 = vpop.f32.mrf.mxu1 }
 0x2cc   :  { %v968_v12 = vmul.f32 %v12499_v48, %v12499_v48  ;;  %v970_v29 = vmul.f32 %v12501_v26, %v12501_v26  ;;  %v12509_v32 = vadd.f32 %v928_v3, %v809_v42  ;;  %v12511_v34 = vadd.f32 %v938_v49, %v819_v43  ;;  %v12566_v3 = vpop.permute.xlu1 %1471 }
 0x2cd   :  { %v10534_v36 = vpop.f32.mrf.mxu1  ;;  %14319 = vst [vmem:[#allocation5_spill] sm:$0xff] %v12566_v3 }
 0x2ce   :  { %v976_v55 = vmul.f32 %v968_v12, %v12499_v48  ;;  %v978_v60 = vmul.f32 %v970_v29, %v12501_v26  ;;  %v967_v61 = vmul.f32 %v12509_v32, %v12509_v32  ;;  %v969_v1 = vmul.f32 %v12511_v34, %v12511_v34 }
 0x2cf   :  { %v12519_v50 = vadd.f32 %v10534_v36, %v834_v11  ;;  %v948_v56 = vpop.f32.mrf.mxu1 }
 0x2d0   :  { %v984_v30 = vmul.f32 0.044715, %v976_v55  ;;  %v986_v59 = vmul.f32 0.044715, %v978_v60  ;;  %v975_v62 = vmul.f32 %v967_v61, %v12509_v32  ;;  %v977_v0 = vmul.f32 %v969_v1, %v12511_v34 }
 0x2d1   :  { %v972_v35 = vmul.f32 %v12519_v50, %v12519_v50  ;;  %v12525_v7 = vadd.f32 %v948_v56, %v829_v46  ;;  %v10537_v53 = vpop.f32.mrf.mxu1 }
 0x2d2   :  { %v992_v33 = vadd.f32 %v984_v30, %v12499_v48  ;;  %v994_v8 = vadd.f32 %v986_v59, %v12501_v26  ;;  %v983_v47 = vmul.f32 0.044715, %v975_v62  ;;  %v985_v16 = vmul.f32 0.044715, %v977_v0 }
 0x2d3   :  { %v980_v4 = vmul.f32 %v972_v35, %v12519_v50  ;;  %v971_v18 = vmul.f32 %v12525_v7, %v12525_v7  ;;  %v12534_v9 = vadd.f32 %v10537_v53, %v844_v17  ;;  %v958_v51 = vpop.f32.mrf.mxu1 }
 0x2d4   :  { %v1000_v40 = vmul.f32 0.7978846, %v992_v33  ;;  %v1002_v20 = vmul.f32 0.7978846, %v994_v8  ;;  %v991_v57 = vadd.f32 %v983_v47, %v12509_v32  ;;  %v993_v52 = vadd.f32 %v985_v16, %v12511_v34 }
 0x2d5   :  { %v988_v63 = vmul.f32 0.044715, %v980_v4  ;;  %v979_v41 = vmul.f32 %v971_v18, %v12525_v7  ;;  %v974_v21 = vmul.f32 %v12534_v9, %v12534_v9  ;;  %v12541_v15 = vadd.f32 %v958_v51, %v839_v22  ;;  %v1302_v25 = vpop.f32.mrf.mxu1 }
 0x2d6   :  { %11807 = vtanh.f32 %v1000_v40  ;;  %v999_v44 = vmul.f32 0.7978846, %v991_v57  ;;  %v1001_v10 = vmul.f32 0.7978846, %v993_v52  ;;  %v1307_v6 = vrot.slane %v1302_v25, 4 }
 0x2d7   :  { %11809 = vtanh.f32 %v1002_v20  ;;  %v996_v38 = vadd.f32 %v988_v63, %v12519_v50  ;;  %v987_v14 = vmul.f32 0.044715, %v979_v41  ;;  %v982_v54 = vmul.f32 %v974_v21, %v12534_v9  ;;  %v10558_v27 = vpop.f32.mrf.mxu1 }
 0x2d8   :  { %11811 = vtanh.f32 %v999_v44  ;;  %v973_v37 = vmul.f32 %v12541_v15, %v12541_v15  ;;  %v12553_v39 = vsel %vm1309_vm4, %v1229_v19, %v1307_v6 }
 0x2d9   :  { %11813 = vtanh.f32 %v1001_v10  ;;  %v1004_v42 = vmul.f32 0.7978846, %v996_v38  ;;  %v995_v43 = vadd.f32 %v987_v14, %v12525_v7  ;;  %v990_v45 = vmul.f32 0.044715, %v982_v54  ;;  %10568 = vmatmul.mubr.msk.f32.vlgmr.msra.gmra.mxu1 %vm1311_vm5, %v12553_v39 }
 0x2da   :  { %v981_v46 = vmul.f32 %v973_v37, %v12541_v15  ;;  %10582 = vmatpush3.msra.mxu1 %v12503_v2  ;;  %10589 = vmatprep.mubr.msk.f32.mxu1 %vm12017_vm2, %v14287_v58 }
 0x2db   :  { %11815 = vtanh.f32 %v1004_v42  ;;  %v1003_v31 = vmul.f32 0.7978846, %v995_v43  ;;  %v998_v22 = vadd.f32 %v990_v45, %v12534_v9  ;;  %10583 = vmatprep.subr.mxu1 %v14287_v58 }
 0x2dc   :  { %v989_v23 = vmul.f32 0.044715, %v981_v46  ;;  %10584 = vmatpush3.msra.mxu1 %v12527_v13 }
 0x2dd   :  { %11817 = vtanh.f32 %v1003_v31  ;;  %v1006_v28 = vmul.f32 0.7978846, %v998_v22  ;;  %10585 = vmatprep.subr.mxu1 %v14287_v58  ;;  %v12594_v22 = vpop.permute.xlu0 %1395 }
 0x2de   :  { %v997_v49 = vadd.f32 %v989_v23, %v12541_v15  ;;  %10586 = vmatpush3.msra.mxu1 %v12548_v5  ;;  %14320 = vst [vmem:[#allocation6_spill] sm:$0xff] %v12594_v22 }
 0x2df   :  { %11819 = vtanh.f32 %v1006_v28  ;;  %10587 = vmatprep.subr.mxu1 %v14287_v58 }
 0x2e0   :  { %v1005_v11 = vmul.f32 0.7978846, %v997_v49  ;;  %10588 = vmatpush3.msra.mxu1 %v12566_v3 }
 0x2e1   :  { %10590 = vmatmul.mubr.msk.f32.vlgmr.msra.gmra.mxu1 %vm1311_vm5, %v12553_v39 }
 0x2e2   :  { %11821 = vtanh.f32 %v1005_v11 }
 0x2e3   :  { %v11808_v12 = vpop.eup %11807 }
 0x2e4   :  { %v11810_v29 = vpop.eup %11809  ;;  %v1016_v36 = vadd.f32 1.0, %v11808_v12  ;;  %v12596_v12 = vpop.permute.xlu0 %1393 }
 0x2e5   :  { %v11812_v55 = vpop.eup %11811  ;;  %v1018_v60 = vadd.f32 1.0, %v11810_v29  ;;  %14321 = vst [vmem:[#allocation7_spill] sm:$0xff] %v12596_v12 }
 0x2e6   :  { %v11814_v61 = vpop.eup %11813  ;;  %v1024_v1 = vmul.f32 0.5, %v1016_v36  ;;  %v1015_v56 = vadd.f32 1.0, %v11812_v55 }
 0x2e7   :  { %v1026_v30 = vmul.f32 0.5, %v1018_v60  ;;  %v1017_v59 = vadd.f32 1.0, %v11814_v61 }
 0x2e8   :  { %v11816_v62 = vpop.eup %11815  ;;  %v12575_v0 = vmul.f32 %v1024_v1, %v12499_v48  ;;  %v1023_v35 = vmul.f32 0.5, %v1015_v56  ;;  %v12599_v1 = vpop.permute.xlu0 %1391 }
 0x2e9   :  { %v12578_v53 = vmul.f32 %v1026_v30, %v12501_v26  ;;  %v1020_v17 = vadd.f32 1.0, %v11816_v62  ;;  %v1025_v33 = vmul.f32 0.5, %v1017_v59  ;;  %14322 = vst [vmem:[#allocation8_spill] sm:$0xff] %v12599_v1 }
 0x2ea   :  { %v11818_v8 = vpop.eup %11817  ;;  %v9374_v47 = vmul.f32 -1.442695, %v12575_v0  ;;  %v1031_v16 = vmul.f32 %v1023_v35, %v12509_v32 }
 0x2eb   :  { %v9376_v4 = vmul.f32 -1.442695, %v12578_v53  ;;  %v1028_v18 = vmul.f32 0.5, %v1020_v17  ;;  %v1033_v51 = vmul.f32 %v1025_v33, %v12511_v34  ;;  %v1019_v40 = vadd.f32 1.0, %v11818_v8 }
 0x2ec   :  { %v11820_v20 = vpop.eup %11819  ;;  %11823 = vpow2.f32 %v9374_v47  ;;  %v9373_v48 = vmul.f32 -1.442695, %v1031_v16 }
 0x2ed   :  { %11825 = vpow2.f32 %v9376_v4  ;;  %v12585_v26 = vmul.f32 %v1028_v18, %v12519_v50  ;;  %v1022_v57 = vadd.f32 1.0, %v11820_v20  ;;  %v9375_v52 = vmul.f32 -1.442695, %v1033_v51  ;;  %v1562_v4 = vld [vmem:[%s14275_s4 + $0x100] sm:$0xff]  ;;  %v12632_v18 = vld [vmem:[%s14275_s4 + $0x108] sm:$0xff]  ;;  %v25_v20 = vld [vmem:[%s14275_s4 + $0x3b0] sm:$0xff] }
 0x2ee   :  { %11827 = vpow2.f32 %v9373_v48  ;;  %v1027_v63 = vmul.f32 0.5, %v1019_v40  ;;  %v26_v40 = vld [vmem:[%s14275_s4 + $0x3b8] sm:$0xff]  ;;  %v24_v48 = vld [vmem:[%s14275_s4 + $0x3a8] sm:$0xff] }
 0x2ef   :  { %v11822_v41 = vpop.eup %11821  ;;  %v9378_v32 = vmul.f32 -1.442695, %v12585_v26  ;;  %v1030_v21 = vmul.f32 0.5, %v1022_v57  ;;  %11829 = vpow2.f32 %v9375_v52 }
 0x2f0   :  { %v1035_v19 = vmul.f32 %v1027_v63, %v12525_v7  ;;  %v1021_v34 = vadd.f32 1.0, %v11822_v41 }
 0x2f1   :  { %11831 = vpow2.f32 %v9378_v32  ;;  %v12590_v25 = vmul.f32 %v1030_v21, %v12534_v9 }
 0x2f2   :  { %v9377_v44 = vmul.f32 -1.442695, %v1035_v19  ;;  %v1029_v10 = vmul.f32 0.5, %v1021_v34 }
 0x2f3   :  { %v9380_v50 = vmul.f32 -1.442695, %v12590_v25 }
 0x2f4   :  { %11833 = vpow2.f32 %v9377_v44  ;;  %v1037_v6 = vmul.f32 %v1029_v10, %v12541_v15 }
 0x2f5   :  { %11835 = vpow2.f32 %v9380_v50 }
 0x2f6   :  { %v9379_v38 = vmul.f32 -1.442695, %v1037_v6 }
 0x2f8   :  { %11837 = vpow2.f32 %v9379_v38 }
 0x2f9   :  { %v11824_v14 = vpop.eup %11823 }
 0x2fa   :  { %v11826_v54 = vpop.eup %11825  ;;  %v1064_v27 = vadd.f32 1.0, %v11824_v14 }
 0x2fb   :  { %v11828_v37 = vpop.eup %11827  ;;  %v1066_v43 = vadd.f32 1.0, %v11826_v54 }
 0x2fc   :  { %v11830_v7 = vpop.eup %11829  ;;  %v1063_v42 = vadd.f32 1.0, %v11828_v37  ;;  %11839 = vrcp.f32 %v1064_v27 }
 0x2fd   :  { %v1065_v9 = vadd.f32 1.0, %v11830_v7 }
 0x2fe   :  { %v11832_v45 = vpop.eup %11831  ;;  %11841 = vrcp.f32 %v1063_v42 }
 0x2ff   :  { %11843 = vrcp.f32 %v1065_v9  ;;  %v1068_v31 = vadd.f32 1.0, %v11832_v45 }
 0x300   :  { %11845 = vrcp.f32 %v1066_v43 }
 0x301   :  { %v11834_v46 = vpop.eup %11833 }
 0x302   :  { %v11836_v15 = vpop.eup %11835  ;;  %v1067_v23 = vadd.f32 1.0, %v11834_v46 }
 0x303   :  { %v1070_v49 = vadd.f32 1.0, %v11836_v15 }
 0x304   :  { %11847 = vrcp.f32 %v1067_v23 }
 0x305   :  { %v11838_v28 = vpop.eup %11837  ;;  %11849 = vrcp.f32 %v1068_v31 }
 0x306   :  { %v1069_v11 = vadd.f32 1.0, %v11838_v28 }
 0x308   :  { %11851 = vrcp.f32 %v1069_v11 }
 0x309   :  { %11853 = vrcp.f32 %v1070_v49  ;;  %v11840_v29 = vpop.eup %11839 }
 0x30a   :  { %v1088_v61 = vmul.f32 %v11840_v29, %v12575_v0  ;;  %v12610_v0 = vpop.permute.xlu0 %1389 }
 0x30b   :  { %v11842_v36 = vpop.eup %11841  ;;  %14323 = vst [vmem:[#allocation9_spill] sm:$0xff] %v12610_v0 }
 0x30c   :  { %v11844_v55 = vpop.eup %11843  ;;  %v1087_v60 = vmul.f32 %v11842_v36, %v1031_v16 }
 0x30d   :  { %v11846_v56 = vpop.eup %11845  ;;  %v1089_v30 = vmul.f32 %v11844_v55, %v1033_v51  ;;  %v12018_v51 = vmov 18  }
 0x30e   :  { %10540 = vmatprep.mubr.msk.f32.mxu0 %vm1095_vm6, %v1087_v60  ;;  %v1090_v62 = vmul.f32 %v11846_v56, %v12578_v53  ;;  %11687 = vset.pattern.permute.xlu1 %v12018_v51 }
 0x30f   :  { %10541 = vmatmul.mubr.msk.f32.vlgmr.msra.gmra.mxu0 %vm1095_vm6, %v1088_v61  ;;  %11688 = vset.pattern.permute.xlu0 %v12018_v51 }
 0x310   :  { %10543 = vmatprep.mubr.msk.f32.mxu0 %vm1095_vm6, %v1089_v30  ;;  %10571 = vmatpush3.msra.mxu0 %v12594_v22 }
 0x311   :  { %v11848_v59 = vpop.eup %11847  ;;  %10572 = vmatprep.subr.mxu0 %v14287_v58  ;;  %1566 = vperm.xlu1 %11687, %v1562_v4  }
 0x312   :  { %v11850_v35 = vpop.eup %11849  ;;  %v1091_v17 = vmul.f32 %v11848_v59, %v1035_v19  ;;  %10573 = vmatpush3.msra.mxu0 %v12596_v12  ;;  %1571 = vperm.xlu0 %11688, %v12632_v18  }
 0x313   :  { %10544 = vmatmul.mubr.msk.f32.gmra.mxu0 %vm1095_vm6, %v1090_v62  ;;  %10574 = vmatprep.subr.mxu0 %v14287_v58  ;;  %v1092_v8 = vmul.f32 %v11850_v35, %v12585_v26  ;;  %v2089_v35 = vld [vmem:[%s14275_s4 + $0x110] sm:$0xff] }
 0x314   :  { %10546 = vmatprep.mubr.msk.f32.mxu0 %vm1095_vm6, %v1091_v17  ;;  %10575 = vmatpush3.msra.mxu0 %v12599_v1  ;;  %v12713_v17 = vld [vmem:[%s14275_s4 + $0x188] sm:$0xff] }
 0x315   :  { %v11852_v33 = vpop.eup %11851  ;;  %10576 = vmatprep.subr.mxu0 %v14287_v58 }
 0x316   :  { %v11854_v53 = vpop.eup %11853  ;;  %v1093_v47 = vmul.f32 %v11852_v33, %v1037_v6  ;;  %10577 = vmatpush3.msra.mxu0 %v12610_v0  ;;  %v2090_v33 = vld [vmem:[%s14275_s4 + $0x118] sm:$0xff] }
 0x317   :  { %10547 = vmatmul.mubr.msk.f32.gmra.mxu0 %vm1095_vm6, %v1092_v8  ;;  %v1094_v16 = vmul.f32 %v11854_v53, %v12590_v25  ;;  %v12021_v8 = vmov 80   ;;  %v12721_v53 = vld [vmem:[%s14275_s4 + $0x190] sm:$0xff] }
 0x318   :  { %10549 = vmatprep.mubr.msk.f32.mxu0 %vm1095_vm6, %v1093_v47  ;;  %11689 = vset.pattern.permute.xlu0 %v12021_v8  ;;  %v12726_v47 = vld [vmem:[%s14275_s4 + $0x198] sm:$0xff] }
 0x319   :  { %11690 = vset.pattern.permute.xlu1 %v12021_v8 }
 0x31b   :  { %10550 = vmatmul.mubr.msk.f32.gmra.mxu0 %vm1095_vm6, %v1094_v16  ;;  %v2091_v16 = vld [vmem:[%s14275_s4 + $0x120] sm:$0xff] }
 0x31c   :  { %10578 = vmatprep.mubr.msk.f32.mxu0 %vm12017_vm2, %v14287_v58 }
 0x31f   :  { %10579 = vmatmul.mubr.msk.f32.vlgmr.msra.gmra.mxu0 %vm1311_vm5, %v12553_v39  ;;  %v27_v39 = vld [vmem:[%s14275_s4 + $0x3c0] sm:$0xff] }
 0x320   :  { %10598 = vmatprep.mubr.msk.f32.mxu0 %vm1574_vm7, %v1562_v4  ;;  %10601 = vmatprep.subr.mxu1 %v27_v39  ;;  %v2092_v4 = vld [vmem:[%s14275_s4 + $0x128] sm:$0xff] }
 0x321   :  { %10602 = vmatpush3.msra.mxu1 %v27_v39  ;;  %1834 = vrot.lane.b32.xlu1 %v27_v39, %s12015_s12 }
 0x322   :  { %10603 = vmatprep.subr.mxu1 %v26_v40  ;;  %1747 = vrot.lane.b32.xlu0 %v27_v39, %s12019_s8 }
 0x323   :  { %10604 = vmatpush3.msra.mxu1 %v26_v40 }
 0x324   :  { %10605 = vmatprep.subr.mxu1 %v25_v20 }
 0x325   :  { %10606 = vmatpush3.msra.mxu1 %v25_v20  ;;  %1832 = vrot.lane.b32.xlu1 %v26_v40, %s12015_s12 }
 0x326   :  { %1745 = vrot.lane.b32.xlu0 %v26_v40, %s12019_s8  ;;  %10607 = vmatprep.subr.mxu1 %v24_v48 }
 0x327   :  { %10608 = vmatpush3.msra.mxu1 %v24_v48 }
 0x329   :  { %1830 = vrot.lane.b32.xlu1 %v25_v20, %s12015_s12 }
 0x32a   :  { %1743 = vrot.lane.b32.xlu0 %v25_v20, %s12019_s8 }
 0x32d   :  { %1828 = vrot.lane.b32.xlu1 %v24_v48, %s12015_s12 }
 0x32e   :  { %1741 = vrot.lane.b32.xlu0 %v24_v48, %s12019_s8 }
 0x331   :  { %2008 = vrot.lane.b32.xlu1 %v27_v39, %s12014_s11 }
 0x332   :  { %1921 = vrot.lane.b32.xlu0 %v27_v39, %s12020_s15 }
 0x335   :  { %2006 = vrot.lane.b32.xlu1 %v26_v40, %s12014_s11 }
 0x336   :  { %1919 = vrot.lane.b32.xlu0 %v26_v40, %s12020_s15 }
 0x339   :  { %2004 = vrot.lane.b32.xlu1 %v25_v20, %s12014_s11 }
 0x33a   :  { %1917 = vrot.lane.b32.xlu0 %v25_v20, %s12020_s15 }
 0x33d   :  { %2002 = vrot.lane.b32.xlu1 %v24_v48, %s12014_s11 }
 0x33e   :  { %2095 = vperm.xlu0 %11689, %v2089_v35  }
 0x341   :  { %1915 = vrot.lane.b32.xlu1 %v24_v48, %s12020_s15 }
 0x342   :  { %2110 = vperm.xlu0 %11689, %v2092_v4  }
 0x345   :  { %2100 = vperm.xlu1 %11690, %v2090_v33  }
 0x349   :  { %2105 = vperm.xlu1 %11690, %v2091_v16  }
 0x38c   :  { %v1567_v37 = vpop.permute.xlu1 %1566 }
 0x38d   :  { %v1572_v7 = vpop.permute.xlu0 %1571 }
 0x393   :  { %v1835_v42 = vpop.permute.xlu1 %1834 }
 0x394   :  { %v1748_v43 = vpop.permute.xlu0 %1747  ;;  %10623 = vmatprep.subr.mxu1 %v1835_v42 }
 0x397   :  { %v1833_v15 = vpop.permute.xlu1 %1832 }
 0x398   :  { %v1746_v9 = vpop.permute.xlu0 %1745 }
 0x399   :  { %v1381_v26 = vpop.f32.mrf.mxu1 }
 0x39b   :  { %v10569_v57 = vpop.f32.mrf.mxu1  ;;  %v1831_v23 = vpop.permute.xlu1 %1830 }
 0x39c   :  { %v1744_v45 = vpop.permute.xlu0 %1743 }
 0x39f   :  { %v1829_v28 = vpop.permute.xlu1 %1828 }
 0x3a0   :  { %v1742_v46 = vpop.permute.xlu0 %1741 }
 0x3a1   :  { %v1549_v52 = vpop.f32.mrf.mxu1 }
 0x3a2   :  { %v1557_v63 = vrot.slane %v1549_v52, 4 }
 0x3a3   :  { %v10591_v41 = vpop.f32.mrf.mxu1  ;;  %v2009_v49 = vpop.permute.xlu1 %2008 }
 0x3a4   :  { %10592 = vmatprep.subr.msk.mxu0 %vm1120_vm3, %v1557_v63  ;;  %v1922_v31 = vpop.permute.xlu0 %1921  ;;  %v2210_v41 = vld [vmem:[%s14275_s4 + $0x1a0] sm:$0xff] }
 0x3a5   :  { %10593 = vmatpush3.msk.msra.mxu0 %vm1120_vm3, %v1557_v63 }
 0x3a7   :  { %v2007_v11 = vpop.permute.xlu1 %2006 }
 0x3a8   :  { %v1920_v60 = vpop.permute.xlu0 %1919 }
 0x3ab   :  { %v2005_v29 = vpop.permute.xlu1 %2004 }
 0x3ac   :  { %v1918_v59 = vpop.permute.xlu0 %1917 }
 0x3af   :  { %v2003_v30 = vpop.permute.xlu1 %2002 }
 0x3b3   :  { %v1916_v62 = vpop.permute.xlu1 %1915 }
 0x3cf   :  { %v12661_v32 = vpop.f32.mrf.mxu0 }
 0x3d0   :  { %14324 = vst [vmem:[#allocation10_spill] sm:$0xff] %v12661_v32 }
 0x3d1   :  { %v12663_v21 = vpop.f32.mrf.mxu0 }
 0x3d2   :  { %14325 = vst [vmem:[#allocation11_spill] sm:$0xff] %v12663_v21 }
 0x3d3   :  { %v12665_v19 = vpop.f32.mrf.mxu0 }
 0x3d5   :  { %v12667_v34 = vpop.f32.mrf.mxu0 }
 0x3d6   :  { %14326 = vst [vmem:[#allocation12_spill] sm:$0xff] %v12667_v34 }
 0x3d7   :  { %v12669_v25 = vpop.f32.mrf.mxu0 }
 0x3d9   :  { %v12671_v44 = vpop.f32.mrf.mxu0 }
 0x3db   :  { %v12673_v10 = vpop.f32.mrf.mxu0 }
 0x3dd   :  { %v12675_v50 = vpop.f32.mrf.mxu0 }
 0x3df   :  { %v1467_v6 = vpop.f32.mrf.mxu0 }
 0x3e0   :  { %v1554_v38 = vrot.slane %v1467_v6, 2  ;;  %v12750_v6 = vld [vmem:[%s14275_s4 + $0x3f0] sm:$0xff] }
 0x3e1   :  { %v10580_v14 = vpop.f32.mrf.mxu0 }
 0x3e2   :  { %v1561_v54 = vsel %vm1309_vm4, %v1554_v38, %v1557_v63  ;;  %v1560_v27 = vsel %vm1559_vm8, %v1381_v26, %v1554_v38  ;;  %v12757_v38 = vld [vmem:[%s14275_s4 + $0x3e8] sm:$0xff] }
 0x3e3   :  { %10594 = vmatprep.subr.mxu0 %v1561_v54  ;;  %v2324_v14 = vld [vmem:[%s14275_s4 + $0x148] sm:$0xff] }
 0x3e4   :  { %10595 = vmatpush3.msra.mxu0 %v1561_v54  ;;  %v14283_v54 = vmov 0  }
 0x3e5   :  { %10596 = vmatprep.subr.mxu0 %v1560_v27  ;;  %11691 = vset.pattern.permute.xlu1 %v14283_v54 }
 0x3e6   :  { %10597 = vmatpush3.msra.mxu0 %v1560_v27  ;;  %v2325_v27 = vld [vmem:[%s14275_s4 + $0x150] sm:$0xff]  ;;  %11692 = vset.pattern.permute.xlu0 %v14283_v54 }
 0x3e7   :  { %10599 = vmatmul.mubr.msk.f32.vlgmr.msra.gmra.mxu0 %vm1574_vm7, %v12632_v18  ;;  %10612 = vmatprep.subr.mxu0 %v1748_v43 }
 0x3e8   :  { %10613 = vmatpush3.msra.mxu0 %v1748_v43  ;;  %2819 = vperm.xlu1 %11691, %v2324_v14   ;;  %v2327_v43 = vld [vmem:[%s14275_s4 + $0x160] sm:$0xff] }
 0x3e9   :  { %10614 = vmatprep.subr.mxu0 %v1746_v9  ;;  %2824 = vperm.xlu0 %11692, %v2325_v27  }
 0x3ea   :  { %10615 = vmatpush3.msra.mxu0 %v1746_v9  ;;  %v14281_v9 = vmov 96  }
 0x3eb   :  { %10616 = vmatprep.subr.mxu0 %v1744_v45 }
 0x3ec   :  { %10617 = vmatpush3.msra.mxu0 %v1744_v45  ;;  %v12793_v45 = vld [vmem:[%s14275_s4 + $0x168] sm:$0xff] }
 0x3ed   :  { %10618 = vmatprep.subr.mxu0 %v1742_v46 }
 0x3ee   :  { %10619 = vmatpush3.msra.mxu0 %v1742_v46  ;;  %v12798_v46 = vld [vmem:[%s14275_s4 + $0x3d0] sm:$0xff] }
 0x3ef   :  { %10634 = vmatprep.subr.mxu0 %v1922_v31 }
 0x4a7   :  { %v10600_v36 = vpop.f32.mrf.mxu0 }
 0x4a8   :  { %v1653_v56 = vadd.f32 %v10600_v36, %v1572_v7  ;;  %v14285_v7 = vmov 1  }
 0x4a9   :  { %v1647_v55 = vpop.f32.mrf.mxu0  ;;  %11693 = vset.pattern.permute.xlu1 %v14285_v7 }
 0x4aa   :  { %v1648_v61 = vadd.f32 %v1647_v55, %v1567_v37  ;;  %v2326_v37 = vld [vmem:[%s14275_s4 + $0x158] sm:$0xff]  ;;  %2842 = vperm.xlu1 %11693, %v2324_v14  }
 0x4ab   :  { %2829 = vperm.xlu0 %11692, %v2326_v37  }
 0x4ac   :  { %10609 = vmatprep.mubr.msk.f32.mxu1 %vm1311_vm5, %v1648_v61  ;;  %10620 = vmatprep.mubr.msk.f32.mxu0 %vm1311_vm5, %v1648_v61 }
 0x4ad   :  { %10610 = vmatmul.mubr.msk.f32.vlgmr.msra.gmra.mxu1 %vm1311_vm5, %v1653_v56  ;;  %10621 = vmatmul.mubr.msk.f32.vlgmr.msra.gmra.mxu0 %vm1311_vm5, %v1653_v56 }
 0x4ae   :  { %10624 = vmatpush3.msra.mxu1 %v1835_v42  ;;  %10635 = vmatpush3.msra.mxu0 %v1922_v31  ;;  %v12778_v42 = vld [vmem:[%s14275_s4 + $0x3c8] sm:$0xff]  ;;  %v12814_v31 = vld [vmem:[%s14275_s4 + $0x170] sm:$0xff] }
 0x4af   :  { %10625 = vmatprep.subr.mxu1 %v1833_v15  ;;  %10631 = vmatprep.mubr.msk.f32.mxu1 %vm1311_vm5, %v1648_v61 }
 0x4b0   :  { %10636 = vmatprep.subr.mxu0 %v1920_v60  ;;  %10642 = vmatprep.mubr.msk.f32.mxu0 %vm1311_vm5, %v1648_v61 }
 0x4b1   :  { %10626 = vmatpush3.msra.mxu1 %v1833_v15  ;;  %10637 = vmatpush3.msra.mxu0 %v1920_v60  ;;  %v12821_v15 = vld [vmem:[%s14275_s4 + $0x178] sm:$0xff] }
 0x4b2   :  { %10627 = vmatprep.subr.mxu1 %v1831_v23  ;;  %10638 = vmatprep.subr.mxu0 %v1918_v59 }
 0x4b3   :  { %10628 = vmatpush3.msra.mxu1 %v1831_v23  ;;  %10639 = vmatpush3.msra.mxu0 %v1918_v59  ;;  %v2101_v23 = vpop.permute.xlu1 %2100 }
 0x4b4   :  { %10629 = vmatprep.subr.mxu1 %v1829_v28  ;;  %10640 = vmatprep.subr.mxu0 %v1916_v62 }
 0x4b5   :  { %10630 = vmatpush3.msra.mxu1 %v1829_v28  ;;  %10641 = vmatpush3.msra.mxu0 %v1916_v62 }
 0x4b6   :  { %10632 = vmatmul.mubr.msk.f32.vlgmr.msra.gmra.mxu1 %vm1311_vm5, %v1653_v56  ;;  %10643 = vmatmul.mubr.msk.f32.vlgmr.msra.gmra.mxu0 %vm1311_vm5, %v1653_v56 }
 0x4b7   :  { %10645 = vmatprep.subr.mxu1 %v2009_v49  ;;  %10653 = vmatprep.mubr.msk.f32.mxu1 %vm1311_vm5, %v1648_v61  ;;  %v2106_v60 = vpop.permute.xlu1 %2105 }
 0x4b8   :  { %10646 = vmatpush3.msra.mxu1 %v2009_v49  ;;  %10676 = vmatprep.mubr.msk.f32.mxu0 %vm2113_vm9, %v2089_v35  ;;  %v2096_v49 = vpop.permute.xlu0 %2095 }
 0x4b9   :  { %10647 = vmatprep.subr.mxu1 %v2007_v11  ;;  %11695 = vset.pattern.permute.xlu0 %v14285_v7 }
 0x4ba   :  { %10648 = vmatpush3.msra.mxu1 %v2007_v11  ;;  %2846 = vperm.xlu1 %11693, %v2325_v27  }
 0x4bb   :  { %10649 = vmatprep.subr.mxu1 %v2005_v29  ;;  %2850 = vperm.xlu0 %11695, %v2326_v37   ;;  %v12885_v37 = vld [vmem:[%s14275_s4 + $0x400] sm:$0xff] }
 0x4bc   :  { %10650 = vmatpush3.msra.mxu1 %v2005_v29 }
 0x4bd   :  { %10651 = vmatprep.subr.mxu1 %v2003_v30 }
 0x4be   :  { %10652 = vmatpush3.msra.mxu1 %v2003_v30  ;;  %11694 = vset.pattern.permute.xlu1 %v14283_v54 }
 0x4bf   :  { %10654 = vmatmul.mubr.msk.f32.vlgmr.msra.gmra.mxu1 %vm1311_vm5, %v1653_v56  ;;  %10682 = vmatprep.subr.mxu1 %v12673_v10  ;;  %v2111_v56 = vpop.permute.xlu0 %2110 }
 0x4c0   :  { %10683 = vmatpush3.msra.mxu1 %v12673_v10  ;;  %10698 = vmatprep.mubr.msk.f32.mxu1 %vm604_vm1, %v12713_v17 }
 0x4c1   :  { %10684 = vmatprep.subr.mxu1 %v12675_v50  ;;  %3079 = vrot.lane.b32.xlu0 %v12778_v42, %s12015_s12 }
 0x4c2   :  { %10685 = vmatpush3.msra.mxu1 %v12675_v50  ;;  %2834 = vperm.xlu1 %11694, %v2327_v43  }
 0x4c3   :  { %10686 = vmatprep.subr.mxu1 %v12669_v25  ;;  %11698 = vset.pattern.permute.xlu0 %v14281_v9 }
 0x4c4   :  { %10687 = vmatpush3.msra.mxu1 %v12669_v25 }
 0x4c5   :  { %10688 = vmatprep.subr.mxu1 %v12671_v44  ;;  %2988 = vrot.lane.b32.xlu0 %v12778_v42, %s12019_s8 }
 0x4c6   :  { %10689 = vmatpush3.msra.mxu1 %v12671_v44  ;;  %11696 = vset.pattern.permute.xlu1 %v14285_v7 }
 0x4c7   :  { %10690 = vmatprep.subr.mxu1 %v12665_v19  ;;  %2854 = vperm.xlu1 %11696, %v2327_v43   ;;  %v12893_v43 = vld [vmem:[%s14275_s4 + $0x3f8] sm:$0x3] }
 0x4c8   :  { %10691 = vmatpush3.msra.mxu1 %v12665_v19 }
 0x4c9   :  { %10692 = vmatprep.subr.mxu1 %v12667_v34  ;;  %3176 = vperm.xlu0 %11698, %v12793_v45  }
 0x4ca   :  { %10693 = vmatpush3.msra.mxu1 %v12667_v34 }
 0x4cb   :  { %10694 = vmatprep.subr.mxu1 %v12661_v32  ;;  %3081 = vrot.lane.b32.xlu1 %v12798_v46, %s12015_s12 }
 0x4cc   :  { %10695 = vmatpush3.msra.mxu1 %v12661_v32  ;;  %11697 = vset.pattern.permute.xlu1 %v14279_v24 }
 0x4cd   :  { %10696 = vmatprep.subr.mxu1 %v12663_v21  ;;  %11700 = vset.pattern.permute.xlu0 %v14279_v24 }
 0x4ce   :  { %10697 = vmatpush3.msra.mxu1 %v12663_v21  ;;  %2223 = vperm.xlu0 %11700, %v12726_v47  }
 0x4cf   :  { %10699 = vmatmul.mubr.msk.f32.vlgmr.msra.gmra.mxu1 %vm604_vm1, %v12721_v53  ;;  %10704 = vmatprep.subr.mxu1 %v12750_v6 }
 0x4d0   :  { %10701 = vmatprep.mubr.msk.f32.mxu1 %vm604_vm1, %v12726_v47  ;;  %10705 = vmatpush3.msra.mxu1 %v12750_v6  ;;  %v12860_v47 = vpop.permute.xlu1 %2819 }
 0x4d1   :  { %10706 = vmatprep.subr.mxu1 %v12757_v38  ;;  %2990 = vrot.lane.b32.xlu1 %v12798_v46, %s12019_s8 }
 0x4d2   :  { %10707 = vmatpush3.msra.mxu1 %v12757_v38  ;;  %11702 = vset.pattern.permute.xlu0 %v14281_v9 }
 0x4d3   :  { %10702 = vmatmul.mubr.msk.f32.gmra.mxu1 %vm604_vm1, %v2210_v41  ;;  %10720 = vmatprep.subr.mxu1 %v14287_v58 }
 0x4d5   :  { %2213 = vperm.xlu1 %11697, %v12713_v17  }
 0x4d9   :  { %2218 = vperm.xlu1 %11697, %v12721_v53  }
 0x4dd   :  { %11699 = vset.pattern.permute.xlu1 %v14281_v9 }
 0x4de   :  { %3181 = vperm.xlu1 %11699, %v12814_v31  }
 0x4e2   :  { %3186 = vperm.xlu1 %11699, %v12821_v15  }
 0x4e6   :  { %11701 = vset.pattern.permute.xlu1 %v14279_v24 }
 0x4e7   :  { %2228 = vperm.xlu1 %11701, %v2210_v41  }
 0x4eb   :  { %11703 = vset.pattern.permute.xlu1 %v14283_v54 }
 0x56d   :  { %v10611_v18 = vpop.f32.mrf.mxu1  ;;  %v10622_v40 = vpop.f32.mrf.mxu0 }
 0x56f   :  { %v1728_v51 = vpop.f32.mrf.mxu1  ;;  %v1819_v48 = vpop.f32.mrf.mxu0 }
 0x576   :  { %v10633_v39 = vpop.f32.mrf.mxu1  ;;  %v10644_v57 = vpop.f32.mrf.mxu0 }
 0x578   :  { %v1906_v20 = vpop.f32.mrf.mxu1  ;;  %v1993_v63 = vpop.f32.mrf.mxu0 }
 0x57f   :  { %v10655_v26 = vpop.f32.mrf.mxu1 }
 0x580   :  { %10656 = vmatprep.subr.mxu0 %v10655_v26 }
 0x581   :  { %v2080_v52 = vpop.f32.mrf.mxu1  ;;  %10657 = vmatpush3.msra.mxu0 %v10655_v26 }
 0x582   :  { %10658 = vmatprep.subr.mxu0 %v2080_v52 }
 0x583   :  { %10659 = vmatpush3.msra.mxu0 %v2080_v52 }
 0x584   :  { %10660 = vmatprep.subr.mxu0 %v10644_v57 }
 0x585   :  { %10661 = vmatpush3.msra.mxu0 %v10644_v57 }
 0x586   :  { %10662 = vmatprep.subr.mxu0 %v1993_v63 }
 0x587   :  { %10663 = vmatpush3.msra.mxu0 %v1993_v63 }
 0x588   :  { %10664 = vmatprep.subr.mxu0 %v10633_v39 }
 0x589   :  { %10665 = vmatpush3.msra.mxu0 %v10633_v39 }
 0x58a   :  { %10666 = vmatprep.subr.mxu0 %v1906_v20 }
 0x58b   :  { %10667 = vmatpush3.msra.mxu0 %v1906_v20 }
 0x58c   :  { %10668 = vmatprep.subr.mxu0 %v10622_v40 }
 0x58d   :  { %10669 = vmatpush3.msra.mxu0 %v10622_v40 }
 0x58e   :  { %10670 = vmatprep.subr.mxu0 %v1819_v48 }
 0x58f   :  { %10671 = vmatpush3.msra.mxu0 %v1819_v48  ;;  %v12856_v8 = vpop.f32.mrf.mxu1 }
 0x590   :  { %10672 = vmatprep.subr.mxu0 %v10611_v18 }
 0x591   :  { %10673 = vmatpush3.msra.mxu0 %v10611_v18  ;;  %v12858_v53 = vpop.f32.mrf.mxu1  ;;  %v12866_v18 = vpop.permute.xlu1 %2842 }
 0x592   :  { %10674 = vmatprep.subr.mxu0 %v1728_v51 }
 0x593   :  { %10675 = vmatpush3.msra.mxu0 %v1728_v51 }
 0x594   :  { %10677 = vmatmul.mubr.msk.f32.vlgmr.msra.gmra.mxu0 %vm2113_vm9, %v2090_v33 }
 0x595   :  { %10679 = vmatprep.mubr.msk.f32.mxu0 %vm2113_vm9, %v2091_v16  ;;  %v12862_v16 = vpop.f32.mrf.mxu1  ;;  %v12868_v20 = vpop.permute.xlu1 %2846 }
 0x598   :  { %10680 = vmatmul.mubr.msk.f32.gmra.mxu0 %vm2113_vm9, %v2092_v4  ;;  %v12864_v4 = vpop.f32.mrf.mxu1 }
 0x599   :  { %v12870_v52 = vpop.permute.xlu1 %2834 }
 0x59d   :  { %v12874_v14 = vpop.permute.xlu1 %2854 }
 0x5a1   :  { %v12879_v27 = vpop.permute.xlu1 %3081 }
 0x654   :  { %v10678_v28 = vpop.f32.mrf.mxu0 }
 0x655   :  { %v12828_v36 = vadd.f32 %v10678_v28, %v2101_v23  ;;  %v12897_v23 = vpop.permute.xlu1 %2990  ;;  %v12905_v28 = vld [vmem:[%s14275_s4 + $0x408] sm:$0xff] }
 0x656   :  { %v2188_v11 = vpop.f32.mrf.mxu0  ;;  %10741 = vmatprep.mubr.msk.f32.mxu0 %vm2550_vm10, %v12905_v28 }
 0x657   :  { %v12826_v29 = vadd.f32 %v2188_v11, %v2096_v49  ;;  %v2329_v35 = vmul.f32 %v12828_v36, %v12828_v36 }
 0x658   :  { %v10681_v55 = vpop.f32.mrf.mxu0 }
 0x659   :  { %10708 = vmatprep.mubr.msk.f32.mxu1 %vm111_vm0, %v12826_v29  ;;  %v12836_v59 = vadd.f32 %v10681_v55, %v2111_v56  ;;  %v2328_v62 = vmul.f32 %v12826_v29, %v12826_v29 }
 0x65a   :  { %v2198_v61 = vpop.f32.mrf.mxu0  ;;  %10709 = vmatmul.mubr.msk.f32.vlgmr.msra.gmra.mxu1 %vm111_vm0, %v12828_v36 }
 0x65b   :  { %v12834_v30 = vadd.f32 %v2198_v61, %v2106_v60  ;;  %v2331_v33 = vmul.f32 %v12836_v59, %v12836_v59 }
 0x65d   :  { %10711 = vmatprep.mubr.msk.f32.mxu1 %vm111_vm0, %v12834_v30  ;;  %v2330_v17 = vmul.f32 %v12834_v30, %v12834_v30 }
 0x65e   :  { %10712 = vmatmul.mubr.msk.f32.gmra.mxu1 %vm111_vm0, %v12836_v59 }
 0x65f   :  { %10714 = vmatprep.mubr.msk.f32.mxu1 %vm111_vm0, %v2328_v62 }
 0x662   :  { %10715 = vmatmul.mubr.msk.f32.gmra.mxu1 %vm111_vm0, %v2329_v35 }
 0x663   :  { %10717 = vmatprep.mubr.msk.f32.mxu1 %vm111_vm0, %v2330_v17 }
 0x666   :  { %10718 = vmatmul.mubr.msk.f32.gmra.mxu1 %vm111_vm0, %v2331_v33 }
 0x667   :  { %10736 = vmatprep.mubr.msk.f32.mxu1 %vm12017_vm2, %v14287_v58 }
 0x71a   :  { %v10710_v51 = vpop.f32.mrf.mxu1 }
 0x71c   :  { %v2422_v39 = vpop.f32.mrf.mxu1 }
 0x71e   :  { %v10713_v40 = vpop.f32.mrf.mxu1 }
 0x720   :  { %v2432_v48 = vpop.f32.mrf.mxu1 }
 0x722   :  { %v10716_v26 = vpop.f32.mrf.mxu1 }
 0x724   :  { %v2442_v57 = vpop.f32.mrf.mxu1 }
 0x726   :  { %v10719_v63 = vpop.f32.mrf.mxu1 }
 0x727   :  { %10721 = vmatpush3.msra.mxu1 %v10719_v63  ;;  %v12946_v63 = vld [vmem:[%s14275_s4 + $0x430] sm:$0xff] }
 0x728   :  { %v2452_v41 = vpop.f32.mrf.mxu1  ;;  %10722 = vmatprep.subr.mxu1 %v14287_v58 }
 0x729   :  { %10723 = vmatpush3.msra.mxu1 %v2452_v41  ;;  %v12951_v41 = vld [vmem:[%s14275_s4 + $0x438] sm:$0xff] }
 0x72a   :  { %10724 = vmatprep.subr.mxu1 %v14287_v58 }
 0x72b   :  { %10725 = vmatpush3.msra.mxu1 %v10716_v26  ;;  %v12928_v26 = vld [vmem:[%s14275_s4 + $0x420] sm:$0xff] }
 0x72c   :  { %10726 = vmatprep.subr.mxu1 %v14287_v58 }
 0x72d   :  { %10727 = vmatpush3.msra.mxu1 %v2442_v57  ;;  %v12934_v57 = vld [vmem:[%s14275_s4 + $0x428] sm:$0xff] }
 0x72e   :  { %10728 = vmatprep.subr.mxu1 %v14287_v58 }
 0x72f   :  { %10729 = vmatpush3.msra.mxu1 %v10713_v40  ;;  %v12913_v40 = vld [vmem:[%s14275_s4 + $0x410] sm:$0xff] }
 0x730   :  { %10730 = vmatprep.subr.mxu1 %v14287_v58 }
 0x731   :  { %10731 = vmatpush3.msra.mxu1 %v2432_v48  ;;  %v12918_v48 = vld [vmem:[%s14275_s4 + $0x418] sm:$0xff] }
 0x732   :  { %10732 = vmatprep.subr.mxu1 %v14287_v58 }
 0x733   :  { %10733 = vmatpush3.msra.mxu1 %v10710_v51 }
 0x734   :  { %10734 = vmatprep.subr.mxu1 %v14287_v58 }
 0x735   :  { %10735 = vmatpush3.msra.mxu1 %v2422_v39 }
 0x736   :  { %10737 = vmatmul.mubr.msk.f32.vlgmr.msra.gmra.mxu1 %vm604_vm1, %v12885_v37  ;;  %10753 = vmatprep.subr.msk.mxu1 %vm1120_vm3, %v12893_v43 }
 0x737   :  { %10754 = vmatpush3.msk.msra.mxu1 %vm1120_vm3, %v12893_v43 }
 0x738   :  { %10777 = vmatprep.subr.mxu1 %v12897_v23 }
 0x7f6   :  { %v2530_v49 = vpop.f32.mrf.mxu1 }
 0x7f7   :  { %v2534_v11 = vmul.f32 %v2530_v49, %v2530_v49  ;;  %v2541_v35 = vsub.f32 0.0, %v2530_v49 }
 0x7f8   :  { %v10738_v55 = vpop.f32.mrf.mxu1 }
 0x7f9   :  { %v2536_v60 = vrot.slane %v2534_v11, 4  ;;  %v2825_v11 = vpop.permute.xlu0 %2824 }
 0x7fb   :  { %v2538_v61 = vsub.f32 %v2530_v49, %v2536_v60  ;;  %v12960_v49 = vld [vmem:[%s14275_s4 + $0x440] sm:$0xff] }
 0x7fd   :  { %v2539_v56 = vadd.f32 1e-05, %v2538_v61  ;;  %v2830_v55 = vpop.permute.xlu0 %2829 }
 0x7ff   :  { %11855 = vrsqrt.f32 %v2539_v56 }
 0x801   :  { %v2851_v60 = vpop.permute.xlu0 %2850 }
 0x805   :  { %v12964_v61 = vpop.permute.xlu0 %3079 }
 0x80c   :  { %v11856_v62 = vpop.eup %11855 }
 0x80d   :  { %v2543_v17 = vrot.slane %v11856_v62, 4 }
 0x80f   :  { %v2545_v33 = vmul.f32 %v2543_v17, %v2541_v35 }
 0x811   :  { %v2547_v51 = vrot.slane %v2545_v33, 4 }
 0x813   :  { %v2549_v39 = vsel %vm1309_vm4, %v2543_v17, %v2547_v51  ;;  %v12968_v17 = vpop.permute.xlu0 %2988 }
 0x814   :  { %10739 = vmatprep.subr.mxu0 %v2549_v39 }
 0x815   :  { %10740 = vmatpush3.msra.mxu0 %v2549_v39 }
 0x816   :  { %10742 = vmatmul.mubr.msk.f32.vlgmr.msra.gmra.mxu0 %vm2550_vm10, %v12913_v40  ;;  %10767 = vmatprep.subr.mxu0 %v12798_v46 }
 0x817   :  { %10744 = vmatprep.mubr.msk.f32.mxu0 %vm2550_vm10, %v12918_v48  ;;  %10768 = vmatpush3.msra.mxu0 %v12798_v46 }
 0x818   :  { %10769 = vmatprep.subr.mxu0 %v12778_v42 }
 0x819   :  { %10770 = vmatpush3.msra.mxu0 %v12778_v42 }
 0x81a   :  { %10745 = vmatmul.mubr.msk.f32.gmra.mxu0 %vm2550_vm10, %v12928_v26  ;;  %10787 = vmatprep.subr.mxu0 %v12879_v27 }
 0x81b   :  { %10747 = vmatprep.mubr.msk.f32.mxu0 %vm2550_vm10, %v12934_v57 }
 0x81e   :  { %10748 = vmatmul.mubr.msk.f32.gmra.mxu0 %vm2550_vm10, %v12946_v63 }
 0x81f   :  { %10750 = vmatprep.mubr.msk.f32.mxu0 %vm2550_vm10, %v12951_v41 }
 0x822   :  { %10751 = vmatmul.mubr.msk.f32.gmra.mxu0 %vm2550_vm10, %v12960_v49 }
 0x8d6   :  { %v10743_v56 = vpop.f32.mrf.mxu0 }
 0x8d8   :  { %v2641_v62 = vpop.f32.mrf.mxu0 }
 0x8d9   :  { %10755 = vmatprep.mubr.msk.f32.mxu1 %vm1095_vm6, %v2641_v62 }
 0x8da   :  { %v10746_v35 = vpop.f32.mrf.mxu0  ;;  %10756 = vmatmul.mubr.msk.f32.vlgmr.msra.gmra.mxu1 %vm1095_vm6, %v10743_v56 }
 0x8db   :  { %10778 = vmatpush3.msra.mxu1 %v12897_v23 }
 0x8dc   :  { %v2651_v33 = vpop.f32.mrf.mxu0  ;;  %10779 = vmatprep.subr.mxu1 %v12968_v17 }
 0x8dd   :  { %10758 = vmatprep.mubr.msk.f32.mxu1 %vm1095_vm6, %v2651_v33  ;;  %10780 = vmatpush3.msra.mxu1 %v12968_v17 }
 0x8de   :  { %v10749_v51 = vpop.f32.mrf.mxu0  ;;  %10759 = vmatmul.mubr.msk.f32.gmra.mxu1 %vm1095_vm6, %v10746_v35 }
 0x8e0   :  { %v2661_v39 = vpop.f32.mrf.mxu0 }
 0x8e1   :  { %10761 = vmatprep.mubr.msk.f32.mxu1 %vm1095_vm6, %v2661_v39 }
 0x8e2   :  { %v10752_v62 = vpop.f32.mrf.mxu0  ;;  %10762 = vmatmul.mubr.msk.f32.gmra.mxu1 %vm1095_vm6, %v10749_v51 }
 0x8e4   :  { %v2671_v56 = vpop.f32.mrf.mxu0 }
 0x8e5   :  { %10764 = vmatprep.mubr.msk.f32.mxu1 %vm1095_vm6, %v2671_v56 }
 0x8e6   :  { %10765 = vmatmul.mubr.msk.f32.gmra.mxu1 %vm1095_vm6, %v10752_v62 }
 0x99a   :  { %v10757_v24 = vpop.f32.mrf.mxu1 }
 0x99b   :  { %v2810_v7 = vmul.f32 %v10757_v24, %v12828_v36 }
 0x99c   :  { %v2770_v9 = vpop.f32.mrf.mxu1 }
 0x99d   :  { %v2809_v35 = vmul.f32 %v2770_v9, %v12826_v29 }
 0x99e   :  { %v10760_v54 = vpop.f32.mrf.mxu1 }
 0x99f   :  { %v2812_v39 = vmul.f32 %v10760_v54, %v12836_v59 }
 0x9a0   :  { %v2780_v33 = vpop.f32.mrf.mxu1 }
 0x9a1   :  { %v2811_v56 = vmul.f32 %v2780_v33, %v12834_v30 }
 0x9a2   :  { %v10763_v58 = vpop.f32.mrf.mxu1 }
 0x9a3   :  { %v2814_v3 = vadd.f32 %v10763_v58, %v2810_v7 }
 0x9a4   :  { %v2790_v5 = vpop.f32.mrf.mxu1 }
 0x9a5   :  { %v2838_v13 = vmul.f32 %v2825_v11, %v2814_v3  ;;  %v2813_v51 = vadd.f32 %v2809_v35, %v2790_v5 }
 0x9a6   :  { %v10766_v2 = vpop.f32.mrf.mxu1 }
 0x9a7   :  { %v2858_v62 = vadd.f32 %v12868_v20, %v2838_v13  ;;  %v2837_v0 = vmul.f32 %v12860_v47, %v2813_v51  ;;  %v2816_v1 = vadd.f32 %v10766_v2, %v2812_v39 }
 0x9a8   :  { %v2800_v12 = vpop.f32.mrf.mxu1 }
 0x9a9   :  { %v9442_v22 = vmul.f32 -1.442695, %v2858_v62  ;;  %v2857_v24 = vadd.f32 %v12866_v18, %v2837_v0  ;;  %v2840_v9 = vmul.f32 %v12870_v52, %v2816_v1  ;;  %v2815_v58 = vadd.f32 %v2811_v56, %v2800_v12 }
 0x9aa   :  { %v14327_v56 = vmov 0.0  }
 0x9ab   :  { %11857 = vpow2.f32 %v9442_v22  ;;  %v9441_v7 = vmul.f32 -1.442695, %v2857_v24  ;;  %v2860_v3 = vadd.f32 %v12874_v14, %v2840_v9  ;;  %v2839_v5 = vmul.f32 %v2830_v55, %v2815_v58 }
 0x9ad   :  { %11859 = vpow2.f32 %v9441_v7  ;;  %v9444_v54 = vmul.f32 -1.442695, %v2860_v3  ;;  %v2859_v11 = vadd.f32 %v2851_v60, %v2839_v5 }
 0x9af   :  { %11861 = vpow2.f32 %v9444_v54  ;;  %v9443_v13 = vmul.f32 -1.442695, %v2859_v11 }
 0x9b1   :  { %11863 = vpow2.f32 %v9443_v13 }
 0x9b8   :  { %v11858_v47 = vpop.eup %11857 }
 0x9b9   :  { %v2874_v2 = vadd.f32 1.0, %v11858_v47 }
 0x9ba   :  { %v11860_v20 = vpop.eup %11859 }
 0x9bb   :  { %v2873_v33 = vadd.f32 1.0, %v11860_v20  ;;  %11865 = vrcp.f32 %v2874_v2  ;;  %v2214_v2 = vpop.permute.xlu1 %2213 }
 0x9bc   :  { %v11862_v35 = vpop.eup %11861 }
 0x9bd   :  { %11867 = vrcp.f32 %v2873_v33  ;;  %v2876_v1 = vadd.f32 1.0, %v11862_v35  ;;  %v3177_v35 = vpop.permute.xlu0 %3176 }
 0x9be   :  { %v11864_v12 = vpop.eup %11863 }
 0x9bf   :  { %v2875_v22 = vadd.f32 1.0, %v11864_v12  ;;  %11869 = vrcp.f32 %v2876_v1  ;;  %v2219_v20 = vpop.permute.xlu1 %2218 }
 0x9c1   :  { %11871 = vrcp.f32 %v2875_v22  ;;  %v2224_v12 = vpop.permute.xlu0 %2223 }
 0x9c3   :  { %v3182_v33 = vpop.permute.xlu1 %3181 }
 0x9c7   :  { %v3187_v1 = vpop.permute.xlu1 %3186 }
 0x9c8   :  { %v11866_v0 = vpop.eup %11865 }
 0x9c9   :  { %v2886_v14 = vmul.f32 %v11866_v0, %v2858_v62  ;;  %v3173_v62 = vld [vmem:[%s14275_s4 + $0x180] sm:$0xff] }
 0x9ca   :  { %v11868_v18 = vpop.eup %11867  ;;  %3191 = vperm.xlu0 %11702, %v3173_v62  }
 0x9cb   :  { %v2885_v52 = vmul.f32 %v11868_v18, %v2857_v24  ;;  %v14328_v24 = vmov 1  }
 0x9cc   :  { %v11870_v55 = vpop.eup %11869 }
 0x9cd   :  { %10771 = vmatprep.mubr.msk.f32.mxu0 %vm111_vm0, %v2885_v52  ;;  %10781 = vmatprep.mubr.msk.f32.mxu1 %vm111_vm0, %v2885_v52  ;;  %v2888_v51 = vmul.f32 %v11870_v55, %v2860_v3 }
 0x9ce   :  { %v11872_v60 = vpop.eup %11871  ;;  %10772 = vmatmul.mubr.msk.f32.vlgmr.msra.gmra.mxu0 %vm111_vm0, %v2886_v14  ;;  %10782 = vmatmul.mubr.msk.f32.vlgmr.msra.gmra.mxu1 %vm111_vm0, %v2886_v14 }
 0x9cf   :  { %10788 = vmatpush3.msra.mxu0 %v12879_v27  ;;  %v2887_v39 = vmul.f32 %v11872_v60, %v2859_v11  ;;  %11704 = vset.pattern.permute.xlu0 %v14328_v24  ;;  %v2229_v60 = vpop.permute.xlu1 %2228 }
 0x9d0   :  { %10789 = vmatprep.subr.mxu0 %v12964_v61 }
 0x9d1   :  { %10774 = vmatprep.mubr.msk.f32.mxu0 %vm111_vm0, %v2887_v39  ;;  %10784 = vmatprep.mubr.msk.f32.mxu1 %vm111_vm0, %v2887_v39 }
 0x9d2   :  { %10775 = vmatmul.mubr.msk.f32.gmra.mxu0 %vm111_vm0, %v2888_v51  ;;  %10785 = vmatmul.mubr.msk.f32.gmra.mxu1 %vm111_vm0, %v2888_v51 }
 0x9d3   :  { %10791 = vmatprep.mubr.msk.f32.mxu0 %vm111_vm0, %v2885_v52  ;;  %10790 = vmatpush3.msra.mxu0 %v12964_v61  ;;  %v2306_v52 = vadd.f32 %v12858_v53, %v2214_v2  ;;  %v2321_v53 = vadd.f32 %v12862_v16, %v2229_v60 }
 0x9d4   :  { %10827 = vmatprep.subr.mxu0 %v12750_v6  ;;  %10821 = vmatprep.mubr.msk.f32.mxu1 %vm3194_vm11, %v12793_v45 }
 0x9d6   :  { %10792 = vmatmul.mubr.msk.f32.vlgmr.msra.gmra.mxu0 %vm111_vm0, %v2886_v14 }
 0x9d7   :  { %10794 = vmatprep.mubr.msk.f32.mxu0 %vm111_vm0, %v2887_v39  ;;  %10828 = vmatpush3.msra.mxu0 %v12750_v6 }
 0x9d8   :  { %10829 = vmatprep.subr.mxu0 %v12757_v38 }
 0x9d9   :  { %10830 = vmatpush3.msra.mxu0 %v12757_v38 }
 0x9da   :  { %10795 = vmatmul.mubr.msk.f32.gmra.mxu0 %vm111_vm0, %v2888_v51  ;;  %10843 = vmatprep.subr.mxu0 %v14327_v56 }
 0xa45   :  { %v3192_v14 = vpop.permute.xlu0 %3191 }
 0xa8e   :  { %v10773_v6 = vpop.f32.mrf.mxu0  ;;  %v10783_v3 = vpop.f32.mrf.mxu1 }
 0xa90   :  { %v2967_v9 = vpop.f32.mrf.mxu0  ;;  %v3060_v11 = vpop.f32.mrf.mxu1 }
 0xa92   :  { %v10776_v58 = vpop.f32.mrf.mxu0  ;;  %v10786_v45 = vpop.f32.mrf.mxu1 }
 0xa94   :  { %v2977_v7 = vpop.f32.mrf.mxu0  ;;  %v3070_v47 = vpop.f32.mrf.mxu1 }
 0xa96   :  { %v10793_v38 = vpop.f32.mrf.mxu0 }
 0xa98   :  { %v3151_v5 = vpop.f32.mrf.mxu0 }
 0xa9a   :  { %v10796_v54 = vpop.f32.mrf.mxu0 }
 0xa9b   :  { %10797 = vmatprep.subr.mxu1 %v10796_v54 }
 0xa9c   :  { %v3161_v13 = vpop.f32.mrf.mxu0  ;;  %10798 = vmatpush3.msra.mxu1 %v10796_v54 }
 0xa9d   :  { %10799 = vmatprep.subr.mxu1 %v3161_v13 }
 0xa9e   :  { %10800 = vmatpush3.msra.mxu1 %v3161_v13 }
 0xa9f   :  { %10801 = vmatprep.subr.mxu1 %v10793_v38 }
 0xaa0   :  { %10802 = vmatpush3.msra.mxu1 %v10793_v38 }
 0xaa1   :  { %10803 = vmatprep.subr.mxu1 %v3151_v5 }
 0xaa2   :  { %10804 = vmatpush3.msra.mxu1 %v3151_v5 }
 0xaa3   :  { %10805 = vmatprep.subr.mxu1 %v10786_v45 }
 0xaa4   :  { %10806 = vmatpush3.msra.mxu1 %v10786_v45 }
 0xaa5   :  { %10807 = vmatprep.subr.mxu1 %v3070_v47 }
 0xaa6   :  { %10808 = vmatpush3.msra.mxu1 %v3070_v47 }
 0xaa7   :  { %10809 = vmatprep.subr.mxu1 %v10783_v3 }
 0xaa8   :  { %10810 = vmatpush3.msra.mxu1 %v10783_v3 }
 0xaa9   :  { %10811 = vmatprep.subr.mxu1 %v3060_v11 }
 0xaaa   :  { %10812 = vmatpush3.msra.mxu1 %v3060_v11 }
 0xaab   :  { %10813 = vmatprep.subr.mxu1 %v10776_v58 }
 0xaac   :  { %10814 = vmatpush3.msra.mxu1 %v10776_v58 }
 0xaad   :  { %10815 = vmatprep.subr.mxu1 %v2977_v7 }
 0xaae   :  { %10816 = vmatpush3.msra.mxu1 %v2977_v7 }
 0xaaf   :  { %10817 = vmatprep.subr.mxu1 %v10773_v6 }
 0xab0   :  { %10818 = vmatpush3.msra.mxu1 %v10773_v6  ;;  %v2316_v6 = vadd.f32 %v12864_v4, %v2224_v12 }
 0xab1   :  { %10819 = vmatprep.subr.mxu1 %v2967_v9 }
 0xab2   :  { %10820 = vmatpush3.msra.mxu1 %v2967_v9 }
 0xab3   :  { %10822 = vmatmul.mubr.msk.f32.vlgmr.msra.gmra.mxu1 %vm3194_vm11, %v12814_v31 }
 0xab4   :  { %10824 = vmatprep.mubr.msk.f32.mxu1 %vm3194_vm11, %v12821_v15  ;;  %v2311_v15 = vadd.f32 %v12856_v8, %v2219_v20 }
 0xab7   :  { %10825 = vmatmul.mubr.msk.f32.gmra.mxu1 %vm3194_vm11, %v3173_v62 }
 0xab8   :  { %10864 = vmatprep.mubr.msk.f32.mxu1 %vm2550_vm10, %v12905_v28 }
 0xb73   :  { %v10823_v22 = vpop.f32.mrf.mxu1 }
 0xb74   :  { %v3275_v0 = vadd.f32 %v10823_v22, %v3182_v33 }
 0xb75   :  { %v3269_v18 = vpop.f32.mrf.mxu1 }
 0xb76   :  { %v3270_v31 = vadd.f32 %v3269_v18, %v3177_v35  ;;  %v13025_v28 = vadd.f32 %v3275_v0, %v2311_v15 }
 0xb77   :  { %v10826_v55 = vpop.f32.mrf.mxu1 }
 0xb78   :  { %v13023_v39 = vadd.f32 %v3270_v31, %v2306_v52  ;;  %v3285_v51 = vadd.f32 %v10826_v55, %v3192_v14  ;;  %v3297_v16 = vmul.f32 %v13025_v28, %v13025_v28 }
 0xb79   :  { %v3279_v62 = vpop.f32.mrf.mxu1 }
 0xb7a   :  { %v3280_v9 = vadd.f32 %v3279_v62, %v3187_v1  ;;  %10831 = vmatprep.mubr.msk.f32.mxu0 %vm111_vm0, %v13023_v39  ;;  %v13035_v58 = vadd.f32 %v3285_v51, %v2321_v53  ;;  %v3296_v7 = vmul.f32 %v13023_v39, %v13023_v39 }
 0xb7b   :  { %10832 = vmatmul.mubr.msk.f32.vlgmr.msra.gmra.mxu0 %vm111_vm0, %v13025_v28 }
 0xb7c   :  { %v13033_v8 = vadd.f32 %v3280_v9, %v2316_v6  ;;  %v3299_v38 = vmul.f32 %v13035_v58, %v13035_v58 }
 0xb7e   :  { %10834 = vmatprep.mubr.msk.f32.mxu0 %vm111_vm0, %v13033_v8  ;;  %v3298_v4 = vmul.f32 %v13033_v8, %v13033_v8 }
 0xb7f   :  { %10835 = vmatmul.mubr.msk.f32.gmra.mxu0 %vm111_vm0, %v13035_v58 }
 0xb80   :  { %10837 = vmatprep.mubr.msk.f32.mxu0 %vm111_vm0, %v3296_v7 }
 0xb83   :  { %10838 = vmatmul.mubr.msk.f32.gmra.mxu0 %vm111_vm0, %v3297_v16 }
 0xb84   :  { %10840 = vmatprep.mubr.msk.f32.mxu0 %vm111_vm0, %v3298_v4 }
 0xb87   :  { %10841 = vmatmul.mubr.msk.f32.gmra.mxu0 %vm111_vm0, %v3299_v38 }
 0xb88   :  { %10859 = vmatprep.mubr.msk.f32.mxu0 %vm12017_vm2, %v14327_v56 }
 0xc3b   :  { %v10833_v3 = vpop.f32.mrf.mxu0 }
 0xc3d   :  { %v3390_v5 = vpop.f32.mrf.mxu0 }
 0xc3f   :  { %v10836_v54 = vpop.f32.mrf.mxu0 }
 0xc41   :  { %v3400_v11 = vpop.f32.mrf.mxu0 }
 0xc43   :  { %v10839_v13 = vpop.f32.mrf.mxu0 }
 0xc45   :  { %v3410_v45 = vpop.f32.mrf.mxu0 }
 0xc47   :  { %v10842_v47 = vpop.f32.mrf.mxu0 }
 0xc48   :  { %10844 = vmatpush3.msra.mxu0 %v10842_v47 }
 0xc49   :  { %v3420_v2 = vpop.f32.mrf.mxu0  ;;  %10845 = vmatprep.subr.mxu0 %v14327_v56 }
 0xc4a   :  { %10846 = vmatpush3.msra.mxu0 %v3420_v2 }
 0xc4b   :  { %10847 = vmatprep.subr.mxu0 %v14327_v56 }
 0xc4c   :  { %10848 = vmatpush3.msra.mxu0 %v10839_v13 }
 0xc4d   :  { %10849 = vmatprep.subr.mxu0 %v14327_v56 }
 0xc4e   :  { %10850 = vmatpush3.msra.mxu0 %v3410_v45 }
 0xc4f   :  { %10851 = vmatprep.subr.mxu0 %v14327_v56 }
 0xc50   :  { %10852 = vmatpush3.msra.mxu0 %v10836_v54 }
 0xc51   :  { %10853 = vmatprep.subr.mxu0 %v14327_v56 }
 0xc52   :  { %10854 = vmatpush3.msra.mxu0 %v3400_v11 }
 0xc53   :  { %10855 = vmatprep.subr.mxu0 %v14327_v56 }
 0xc54   :  { %10856 = vmatpush3.msra.mxu0 %v10833_v3 }
 0xc55   :  { %10857 = vmatprep.subr.mxu0 %v14327_v56 }
 0xc56   :  { %10858 = vmatpush3.msra.mxu0 %v3390_v5 }
 0xc57   :  { %10860 = vmatmul.mubr.msk.f32.vlgmr.msra.gmra.mxu0 %vm604_vm1, %v12885_v37  ;;  %10876 = vmatprep.subr.msk.mxu0 %vm1120_vm3, %v12893_v43 }
 0xc58   :  { %10877 = vmatpush3.msk.msra.mxu0 %vm1120_vm3, %v12893_v43 }
 0xc59   :  { %10900 = vmatprep.subr.mxu0 %v12897_v23 }
 0xd17   :  { %v3495_v20 = vpop.f32.mrf.mxu0 }
 0xd18   :  { %v3499_v33 = vmul.f32 %v3495_v20, %v3495_v20  ;;  %v3506_v18 = vsub.f32 0.0, %v3495_v20 }
 0xd19   :  { %v10861_v35 = vpop.f32.mrf.mxu0 }
 0xd1a   :  { %v3501_v1 = vrot.slane %v3499_v33, 4 }
 0xd1c   :  { %v3503_v12 = vsub.f32 %v3495_v20, %v3501_v1 }
 0xd1e   :  { %v3504_v22 = vadd.f32 1e-05, %v3503_v12 }
 0xd20   :  { %11873 = vrsqrt.f32 %v3504_v22 }
 0xd2d   :  { %v11874_v0 = vpop.eup %11873 }
 0xd2e   :  { %v3508_v52 = vrot.slane %v11874_v0, 4 }
 0xd30   :  { %v3510_v31 = vmul.f32 %v3508_v52, %v3506_v18 }
 0xd32   :  { %v3512_v37 = vrot.slane %v3510_v31, 4 }
 0xd34   :  { %v3514_v14 = vsel %vm1309_vm4, %v3508_v52, %v3512_v37 }
 0xd35   :  { %10862 = vmatprep.subr.mxu1 %v3514_v14 }
 0xd36   :  { %10863 = vmatpush3.msra.mxu1 %v3514_v14 }
 0xd37   :  { %10865 = vmatmul.mubr.msk.f32.vlgmr.msra.gmra.mxu1 %vm2550_vm10, %v12913_v40  ;;  %10890 = vmatprep.subr.mxu1 %v12798_v46  ;;  %v3295_v40 = vld [vmem:[%s14275_s4 + $0x1c0] sm:$0xff] }
 0xd38   :  { %10891 = vmatpush3.msra.mxu1 %v12798_v46  ;;  %10867 = vmatprep.mubr.msk.f32.mxu1 %vm2550_vm10, %v12918_v48  ;;  %v3293_v46 = vld [vmem:[%s14275_s4 + $0x1b0] sm:$0xff]  ;;  %v14329_v48 = vmov 0  }
 0xd39   :  { %10892 = vmatprep.subr.mxu1 %v12778_v42 }
 0xd3a   :  { %10893 = vmatpush3.msra.mxu1 %v12778_v42  ;;  %v3292_v42 = vld [vmem:[%s14275_s4 + $0x1a8] sm:$0xff] }
 0xd3b   :  { %10868 = vmatmul.mubr.msk.f32.gmra.mxu1 %vm2550_vm10, %v12928_v26  ;;  %10910 = vmatprep.subr.mxu1 %v12879_v27  ;;  %v14330_v26 = vmov 96  }
 0xd3c   :  { %10870 = vmatprep.mubr.msk.f32.mxu1 %vm2550_vm10, %v12934_v57  ;;  %3759 = vperm.xlu1 %11703, %v3292_v42   ;;  %v3294_v57 = vld [vmem:[%s14275_s4 + $0x1b8] sm:$0xff] }
 0xd3d   :  { %3782 = vperm.xlu0 %11704, %v3292_v42  }
 0xd3f   :  { %10871 = vmatmul.mubr.msk.f32.gmra.mxu1 %vm2550_vm10, %v12946_v63 }
 0xd40   :  { %10873 = vmatprep.mubr.msk.f32.mxu1 %vm2550_vm10, %v12951_v41  ;;  %3764 = vperm.xlu1 %11703, %v3293_v46  }
 0xd41   :  { %11707 = vset.pattern.permute.xlu0 %v14329_v48 }
 0xd42   :  { %3774 = vperm.xlu0 %11707, %v3295_v40  }
 0xd43   :  { %10874 = vmatmul.mubr.msk.f32.gmra.mxu1 %vm2550_vm10, %v12960_v49 }
 0xd44   :  { %11705 = vset.pattern.permute.xlu1 %v14328_v24 }
 0xd45   :  { %3786 = vperm.xlu1 %11705, %v3293_v46  }
 0xd46   :  { %11709 = vset.pattern.permute.xlu0 %v14330_v26 }
 0xd49   :  { %11706 = vset.pattern.permute.xlu1 %v14329_v48 }
 0xd4a   :  { %3769 = vperm.xlu1 %11706, %v3294_v57  }
 0xd4e   :  { %11708 = vset.pattern.permute.xlu1 %v14328_v24 }
 0xd4f   :  { %3790 = vperm.xlu1 %11708, %v3294_v57  }
 0xd53   :  { %3794 = vperm.xlu1 %11708, %v3295_v40  }
 0xd57   :  { %11710 = vset.pattern.permute.xlu1 %v14330_v26 }
 0xdb7   :  { %v3760_v6 = vpop.permute.xlu1 %3759 }
 0xdb8   :  { %v3783_v5 = vpop.permute.xlu0 %3782 }
 0xdbb   :  { %v3765_v9 = vpop.permute.xlu1 %3764 }
 0xdbd   :  { %v3775_v12 = vpop.permute.xlu0 %3774 }
 0xdc0   :  { %v3787_v53 = vpop.permute.xlu1 %3786 }
 0xdc5   :  { %v3770_v4 = vpop.permute.xlu1 %3769 }
 0xdca   :  { %v3791_v13 = vpop.permute.xlu1 %3790 }
 0xdce   :  { %v3795_v37 = vpop.permute.xlu1 %3794 }
 0xdf7   :  { %v10866_v63 = vpop.f32.mrf.mxu1 }
 0xdf9   :  { %v3581_v41 = vpop.f32.mrf.mxu1 }
 0xdfa   :  { %10878 = vmatprep.mubr.msk.f32.mxu0 %vm1095_vm6, %v3581_v41 }
 0xdfb   :  { %v10869_v49 = vpop.f32.mrf.mxu1  ;;  %10879 = vmatmul.mubr.msk.f32.vlgmr.msra.gmra.mxu0 %vm1095_vm6, %v10866_v63 }
 0xdfc   :  { %10901 = vmatpush3.msra.mxu0 %v12897_v23 }
 0xdfd   :  { %10902 = vmatprep.subr.mxu0 %v12968_v17  ;;  %v3591_v15 = vpop.f32.mrf.mxu1 }
 0xdfe   :  { %10903 = vmatpush3.msra.mxu0 %v12968_v17  ;;  %10881 = vmatprep.mubr.msk.f32.mxu0 %vm1095_vm6, %v3591_v15 }
 0xdff   :  { %v10872_v55 = vpop.f32.mrf.mxu1  ;;  %10882 = vmatmul.mubr.msk.f32.gmra.mxu0 %vm1095_vm6, %v10869_v49 }
 0xe01   :  { %v3601_v60 = vpop.f32.mrf.mxu1 }
 0xe02   :  { %10884 = vmatprep.mubr.msk.f32.mxu0 %vm1095_vm6, %v3601_v60 }
 0xe03   :  { %v10875_v51 = vpop.f32.mrf.mxu1  ;;  %10885 = vmatmul.mubr.msk.f32.gmra.mxu0 %vm1095_vm6, %v10872_v55 }
 0xe05   :  { %v3611_v62 = vpop.f32.mrf.mxu1 }
 0xe06   :  { %10887 = vmatprep.mubr.msk.f32.mxu0 %vm1095_vm6, %v3611_v62 }
 0xe07   :  { %10888 = vmatmul.mubr.msk.f32.gmra.mxu0 %vm1095_vm6, %v10875_v51 }
 0xebb   :  { %v10880_v7 = vpop.f32.mrf.mxu0 }
 0xebc   :  { %v3750_v54 = vmul.f32 %v10880_v7, %v13025_v28 }
 0xebd   :  { %v3710_v16 = vpop.f32.mrf.mxu0 }
 0xebe   :  { %v3749_v45 = vmul.f32 %v3710_v16, %v13023_v39 }
 0xebf   :  { %v10883_v38 = vpop.f32.mrf.mxu0 }
 0xec0   :  { %v3752_v20 = vmul.f32 %v10883_v38, %v13035_v58 }
 0xec1   :  { %v3720_v3 = vpop.f32.mrf.mxu0 }
 0xec2   :  { %v3751_v22 = vmul.f32 %v3720_v3, %v13033_v8 }
 0xec3   :  { %v10886_v11 = vpop.f32.mrf.mxu0 }
 0xec4   :  { %v3754_v47 = vadd.f32 %v10886_v11, %v3750_v54  ;;  %v13156_v54 = vld [vmem:[%s14275_s4 + $0x3f0] sm:$0xff]  ;;  %v4096_v11 = vld [vmem:[%s14275_s4 + $0x1c8] sm:$0xff] }
 0xec5   :  { %v3730_v2 = vpop.f32.mrf.mxu0  ;;  %4102 = vperm.xlu0 %11709, %v4096_v11  }
 0xec6   :  { %v3778_v33 = vmul.f32 %v3765_v9, %v3754_v47  ;;  %v3753_v35 = vadd.f32 %v3749_v45, %v3730_v2  ;;  %v4099_v45 = vld [vmem:[%s14275_s4 + $0x1e0] sm:$0xff]  ;;  %v4098_v47 = vld [vmem:[%s14275_s4 + $0x1d8] sm:$0xff]  ;;  %v13175_v2 = vld [vmem:[%s14275_s4 + $0x228] sm:$0xff] }
 0xec7   :  { %v10889_v1 = vpop.f32.mrf.mxu0 }
 0xec8   :  { %v3798_v0 = vadd.f32 %v3787_v53, %v3778_v33  ;;  %v3777_v18 = vmul.f32 %v3760_v6, %v3753_v35  ;;  %v3756_v52 = vadd.f32 %v10889_v1, %v3752_v20  ;;  %v13180_v20 = vld [vmem:[%s14275_s4 + $0x230] sm:$0xff]  ;;  %v13190_v33 = vld [vmem:[%s14275_s4 + $0x3e8] sm:$0xff] }
 0xec9   :  { %v3740_v31 = vpop.f32.mrf.mxu0  ;;  %4117 = vperm.xlu0 %11709, %v4099_v45  }
 0xeca   :  { %v9488_v28 = vmul.f32 -1.442695, %v3798_v0  ;;  %v3797_v14 = vadd.f32 %v3783_v5, %v3777_v18  ;;  %v3780_v42 = vmul.f32 %v3775_v12, %v3756_v52  ;;  %v3755_v46 = vadd.f32 %v3751_v22, %v3740_v31 }
 0xecc   :  { %11875 = vpow2.f32 %v9488_v28  ;;  %v9487_v39 = vmul.f32 -1.442695, %v3797_v14  ;;  %v3779_v40 = vmul.f32 %v3770_v4, %v3755_v46  ;;  %v3800_v57 = vadd.f32 %v3795_v37, %v3780_v42  ;;  %v4219_v42 = vld [vmem:[%s14275_s4 + $0x238] sm:$0xff]  ;;  %v4220_v46 = vld [vmem:[%s14275_s4 + $0x240] sm:$0xff] }
 0xecd   :  { %11712 = vset.pattern.permute.xlu0 %v14329_v48 }
 0xece   :  { %11877 = vpow2.f32 %v9487_v39  ;;  %v3799_v58 = vadd.f32 %v3791_v13, %v3779_v40  ;;  %v9490_v63 = vmul.f32 -1.442695, %v3800_v57  ;;  %v4097_v13 = vld [vmem:[%s14275_s4 + $0x1d0] sm:$0xff]  ;;  %v4334_v39 = vld [vmem:[%s14275_s4 + $0x1e8] sm:$0xff] }
 0xecf   :  { %4107 = vperm.xlu1 %11710, %v4097_v13   ;;  %v4335_v40 = vld [vmem:[%s14275_s4 + $0x1f0] sm:$0xff] }
 0xed0   :  { %v9489_v41 = vmul.f32 -1.442695, %v3799_v58  ;;  %11879 = vpow2.f32 %v9490_v63  ;;  %4806 = vperm.xlu0 %11712, %v4335_v40   ;;  %v13229_v63 = vld [vmem:[%s14275_s4 + $0x208] sm:$0xff] }
 0xed2   :  { %11881 = vpow2.f32 %v9489_v41  ;;  %v14331_v41 = vmov 64  }
 0xed3   :  { %4112 = vperm.xlu1 %11710, %v4098_v47  }
 0xed7   :  { %11711 = vset.pattern.permute.xlu1 %v14329_v48 }
 0xed8   :  { %4801 = vperm.xlu1 %11711, %v4334_v39  }
 0xed9   :  { %v11876_v8 = vpop.eup %11875 }
 0xeda   :  { %v3814_v49 = vadd.f32 1.0, %v11876_v8  ;;  %v13243_v8 = vld [vmem:[%s14275_s4 + $0x210] sm:$0xff] }
 0xedb   :  { %v11878_v15 = vpop.eup %11877 }
 0xedc   :  { %v3813_v55 = vadd.f32 1.0, %v11878_v15  ;;  %11883 = vrcp.f32 %v3814_v49  ;;  %11713 = vset.pattern.permute.xlu1 %v14328_v24  ;;  %v13250_v49 = vld [vmem:[%s14275_s4 + $0x218] sm:$0xff] }
 0xedd   :  { %v11880_v60 = vpop.eup %11879  ;;  %4824 = vperm.xlu1 %11713, %v4334_v39  }
 0xede   :  { %11885 = vrcp.f32 %v3813_v55  ;;  %v3816_v51 = vadd.f32 1.0, %v11880_v60 }
 0xedf   :  { %v11882_v62 = vpop.eup %11881 }
 0xee0   :  { %v3815_v6 = vadd.f32 1.0, %v11882_v62  ;;  %11887 = vrcp.f32 %v3816_v51 }
 0xee1   :  { %4828 = vperm.xlu1 %11713, %v4335_v40  }
 0xee2   :  { %11889 = vrcp.f32 %v3815_v6 }
 0xee5   :  { %11714 = vset.pattern.permute.xlu1 %v14329_v48 }
 0xee9   :  { %v11884_v9 = vpop.eup %11883 }
 0xeea   :  { %v3826_v16 = vmul.f32 %v11884_v9, %v3798_v0 }
 0xeeb   :  { %v11886_v53 = vpop.eup %11885 }
 0xeec   :  { %v3825_v7 = vmul.f32 %v11886_v53, %v3797_v14 }
 0xeed   :  { %v11888_v4 = vpop.eup %11887 }
 0xeee   :  { %10894 = vmatprep.mubr.msk.f32.mxu1 %vm111_vm0, %v3825_v7  ;;  %10904 = vmatprep.mubr.msk.f32.mxu0 %vm111_vm0, %v3825_v7  ;;  %v3828_v5 = vmul.f32 %v11888_v4, %v3800_v57  ;;  %v4336_v57 = vld [vmem:[%s14275_s4 + $0x1f8] sm:$0xff] }
 0xeef   :  { %v11890_v38 = vpop.eup %11889  ;;  %10895 = vmatmul.mubr.msk.f32.vlgmr.msra.gmra.mxu1 %vm111_vm0, %v3826_v16  ;;  %10905 = vmatmul.mubr.msk.f32.vlgmr.msra.gmra.mxu0 %vm111_vm0, %v3826_v16 }
 0xef0   :  { %10911 = vmatpush3.msra.mxu1 %v12879_v27  ;;  %v3827_v3 = vmul.f32 %v11890_v38, %v3799_v58  ;;  %4811 = vperm.xlu0 %11712, %v4336_v57   ;;  %v4337_v58 = vld [vmem:[%s14275_s4 + $0x200] sm:$0xff] }
 0xef1   :  { %10912 = vmatprep.subr.mxu1 %v12964_v61  ;;  %4816 = vperm.xlu1 %11714, %v4337_v58  }
 0xef2   :  { %10913 = vmatpush3.msra.mxu1 %v12964_v61  ;;  %10897 = vmatprep.mubr.msk.f32.mxu1 %vm111_vm0, %v3827_v3 }
 0xef3   :  { %10907 = vmatprep.mubr.msk.f32.mxu0 %vm111_vm0, %v3827_v3  ;;  %10950 = vmatprep.subr.mxu1 %v12673_v10 }
 0xef4   :  { %10898 = vmatmul.mubr.msk.f32.gmra.mxu1 %vm111_vm0, %v3828_v5  ;;  %10908 = vmatmul.mubr.msk.f32.gmra.mxu0 %vm111_vm0, %v3828_v5 }
 0xef5   :  { %10914 = vmatprep.mubr.msk.f32.mxu1 %vm111_vm0, %v3825_v7  ;;  %10944 = vmatprep.mubr.msk.f32.mxu0 %vm3194_vm11, %v4096_v11 }
 0xef6   :  { %11715 = vset.pattern.permute.xlu0 %v14328_v24  ;;  %11716 = vset.pattern.permute.xlu1 %v14328_v24 }
 0xef7   :  { %4832 = vperm.xlu0 %11715, %v4336_v57   ;;  %4836 = vperm.xlu1 %11716, %v4337_v58  }
 0xef8   :  { %10915 = vmatmul.mubr.msk.f32.vlgmr.msra.gmra.mxu1 %vm111_vm0, %v3826_v16 }
 0xef9   :  { %10951 = vmatpush3.msra.mxu1 %v12673_v10  ;;  %10917 = vmatprep.mubr.msk.f32.mxu1 %vm111_vm0, %v3827_v3 }
 0xefa   :  { %10952 = vmatprep.subr.mxu1 %v12675_v50 }
 0xefb   :  { %10953 = vmatpush3.msra.mxu1 %v12675_v50  ;;  %11718 = vset.pattern.permute.xlu0 %v14330_v26 }
 0xefc   :  { %10954 = vmatprep.subr.mxu1 %v12669_v25  ;;  %10918 = vmatmul.mubr.msk.f32.gmra.mxu1 %vm111_vm0, %v3828_v5 }
 0xefd   :  { %10955 = vmatpush3.msra.mxu1 %v12669_v25  ;;  %10966 = vmatprep.mubr.msk.f32.mxu1 %vm604_vm1, %v13175_v2 }
 0xefe   :  { %10956 = vmatprep.subr.mxu1 %v12671_v44  ;;  %5144 = vperm.xlu0 %11718, %v13229_v63  }
 0xeff   :  { %10957 = vmatpush3.msra.mxu1 %v12671_v44  ;;  %11717 = vset.pattern.permute.xlu1 %v14331_v41 }
 0xf00   :  { %10958 = vmatprep.subr.mxu1 %v12665_v19  ;;  %4223 = vperm.xlu1 %11717, %v13175_v2  }
 0xf01   :  { %10959 = vmatpush3.msra.mxu1 %v12665_v19 }
 0xf02   :  { %10960 = vmatprep.subr.mxu1 %v12667_v34  ;;  %11720 = vset.pattern.permute.xlu0 %v14331_v41 }
 0xf03   :  { %10961 = vmatpush3.msra.mxu1 %v12667_v34  ;;  %4233 = vperm.xlu0 %11720, %v4219_v42  }
 0xf04   :  { %10962 = vmatprep.subr.mxu1 %v12661_v32  ;;  %4228 = vperm.xlu1 %11717, %v13180_v20  }
 0xf05   :  { %10963 = vmatpush3.msra.mxu1 %v12661_v32 }
 0xf06   :  { %10964 = vmatprep.subr.mxu1 %v12663_v21 }
 0xf07   :  { %10965 = vmatpush3.msra.mxu1 %v12663_v21  ;;  %11722 = vset.pattern.permute.xlu0 %v14330_v26 }
 0xf08   :  { %10972 = vmatprep.subr.mxu1 %v13156_v54  ;;  %10967 = vmatmul.mubr.msk.f32.vlgmr.msra.gmra.mxu1 %vm604_vm1, %v13180_v20 }
 0xf09   :  { %10973 = vmatpush3.msra.mxu1 %v13156_v54  ;;  %10969 = vmatprep.mubr.msk.f32.mxu1 %vm604_vm1, %v4219_v42 }
 0xf0a   :  { %10974 = vmatprep.subr.mxu1 %v13190_v33  ;;  %11719 = vset.pattern.permute.xlu1 %v14330_v26 }
 0xf0b   :  { %10975 = vmatpush3.msra.mxu1 %v13190_v33  ;;  %5149 = vperm.xlu1 %11719, %v13243_v8  }
 0xf0c   :  { %11021 = vmatprep.subr.msk.mxu1 %vm1120_vm3, %v12893_v43  ;;  %10970 = vmatmul.mubr.msk.f32.gmra.mxu1 %vm604_vm1, %v4220_v46 }
 0xf0f   :  { %5154 = vperm.xlu1 %11719, %v13250_v49  }
 0xf13   :  { %11721 = vset.pattern.permute.xlu1 %v14331_v41 }
 0xf14   :  { %4238 = vperm.xlu1 %11721, %v4220_v46  }
 0xf18   :  { %11723 = vset.pattern.permute.xlu1 %v14329_v48 }
 0xf40   :  { %v4103_v15 = vpop.permute.xlu0 %4102 }
 0xf44   :  { %v4118_v53 = vpop.permute.xlu0 %4117 }
 0xf4a   :  { %v4108_v55 = vpop.permute.xlu1 %4107 }
 0xf4e   :  { %v4113_v4 = vpop.permute.xlu1 %4112 }
 0xfaf   :  { %v10896_v35 = vpop.f32.mrf.mxu1  ;;  %v10906_v18 = vpop.f32.mrf.mxu0 }
 0xfb1   :  { %v3907_v1 = vpop.f32.mrf.mxu1  ;;  %v3992_v37 = vpop.f32.mrf.mxu0 }
 0xfb4   :  { %v10899_v12 = vpop.f32.mrf.mxu1  ;;  %v10909_v14 = vpop.f32.mrf.mxu0 }
 0xfb6   :  { %v3917_v22 = vpop.f32.mrf.mxu1  ;;  %v4002_v43 = vpop.f32.mrf.mxu0 }
 0xfb8   :  { %v10916_v0 = vpop.f32.mrf.mxu1 }
 0xfba   :  { %v4077_v52 = vpop.f32.mrf.mxu1 }
 0xfbc   :  { %v10919_v31 = vpop.f32.mrf.mxu1 }
 0xfbd   :  { %10920 = vmatprep.subr.mxu0 %v10919_v31 }
 0xfbe   :  { %v4087_v28 = vpop.f32.mrf.mxu1  ;;  %10921 = vmatpush3.msra.mxu0 %v10919_v31 }
 0xfbf   :  { %10922 = vmatprep.subr.mxu0 %v4087_v28 }
 0xfc0   :  { %10923 = vmatpush3.msra.mxu0 %v4087_v28  ;;  %v13313_v28 = vld [vmem:[%s14275_s4 + $0x400] sm:$0xff] }
 0xfc1   :  { %10924 = vmatprep.subr.mxu0 %v10916_v0 }
 0xfc2   :  { %10925 = vmatpush3.msra.mxu0 %v10916_v0 }
 0xfc3   :  { %10926 = vmatprep.subr.mxu0 %v4077_v52 }
 0xfc4   :  { %10927 = vmatpush3.msra.mxu0 %v4077_v52 }
 0xfc5   :  { %10928 = vmatprep.subr.mxu0 %v10909_v14 }
 0xfc6   :  { %10929 = vmatpush3.msra.mxu0 %v10909_v14  ;;  %v13320_v14 = vld [vmem:[%s14275_s4 + $0x408] sm:$0xff] }
 0xfc7   :  { %10930 = vmatprep.subr.mxu0 %v4002_v43 }
 0xfc8   :  { %10931 = vmatpush3.msra.mxu0 %v4002_v43 }
 0xfc9   :  { %10932 = vmatprep.subr.mxu0 %v10906_v18 }
 0xfca   :  { %10933 = vmatpush3.msra.mxu0 %v10906_v18 }
 0xfcb   :  { %10934 = vmatprep.subr.mxu0 %v3992_v37 }
 0xfcc   :  { %10935 = vmatpush3.msra.mxu0 %v3992_v37 }
 0xfcd   :  { %10936 = vmatprep.subr.mxu0 %v10899_v12 }
 0xfce   :  { %10937 = vmatpush3.msra.mxu0 %v10899_v12 }
 0xfcf   :  { %10938 = vmatprep.subr.mxu0 %v3917_v22 }
 0xfd0   :  { %10939 = vmatpush3.msra.mxu0 %v3917_v22 }
 0xfd1   :  { %10940 = vmatprep.subr.mxu0 %v10896_v35 }
 0xfd2   :  { %10941 = vmatpush3.msra.mxu0 %v10896_v35 }
 0xfd3   :  { %10942 = vmatprep.subr.mxu0 %v3907_v1 }
 0xfd4   :  { %10943 = vmatpush3.msra.mxu0 %v3907_v1 }
 0xfd5   :  { %10945 = vmatmul.mubr.msk.f32.vlgmr.msra.gmra.mxu0 %vm3194_vm11, %v4097_v13  ;;  %10988 = vmatprep.subr.mxu0 %v14327_v56 }
 0xfd6   :  { %10947 = vmatprep.mubr.msk.f32.mxu0 %vm3194_vm11, %v4098_v47  ;;  %v13295_v47 = vpop.f32.mrf.mxu1 }
 0xfd8   :  { %v13297_v2 = vpop.f32.mrf.mxu1 }
 0xfd9   :  { %10948 = vmatmul.mubr.msk.f32.gmra.mxu0 %vm3194_vm11, %v4099_v45 }
 0xfda   :  { %11004 = vmatprep.mubr.msk.f32.mxu0 %vm12017_vm2, %v14327_v56  ;;  %v13299_v20 = vpop.f32.mrf.mxu1 }
 0xfdc   :  { %v13301_v35 = vpop.f32.mrf.mxu1 }
0x1095   :  { %v10946_v60 = vpop.f32.mrf.mxu0 }
0x1096   :  { %v4200_v51 = vadd.f32 %v10946_v60, %v4108_v55 }
0x1097   :  { %v4194_v62 = vpop.f32.mrf.mxu0 }
0x1098   :  { %v4195_v6 = vadd.f32 %v4194_v62, %v4103_v15  ;;  %v13259_v16 = vadd.f32 %v4200_v51, %v12828_v36 }
0x1099   :  { %v10949_v9 = vpop.f32.mrf.mxu0 }
0x109a   :  { %v13256_v7 = vadd.f32 %v4195_v6, %v12826_v29  ;;  %14333 = vst [vmem:[#allocation14_spill] sm:$0xff] %v13259_v16  ;;  %v4210_v38 = vadd.f32 %v10949_v9, %v4118_v53  ;;  %v13271_v29 = vld [vmem:[%s14275_s4 + $0x3f8] sm:$0x3]  ;;  %v4339_v13 = vmul.f32 %v13259_v16, %v13259_v16  ;;  %v13328_v6 = vld [vmem:[%s14275_s4 + $0x410] sm:$0xff] }
0x109b   :  { %v4204_v3 = vpop.f32.mrf.mxu0  ;;  %v13335_v9 = vld [vmem:[%s14275_s4 + $0x3d0] sm:$0xff]  ;;  %v13342_v53 = vld [vmem:[%s14275_s4 + $0x418] sm:$0xff] }
0x109c   :  { %14332 = vst [vmem:[#allocation13_spill] sm:$0xff] %v13256_v7  ;;  %v4205_v5 = vadd.f32 %v4204_v3, %v4113_v4  ;;  %10976 = vmatprep.mubr.msk.f32.mxu1 %vm111_vm0, %v13256_v7  ;;  %v13276_v36 = vadd.f32 %v4210_v38, %v12836_v59  ;;  %v13349_v4 = vld [vmem:[%s14275_s4 + $0x3c8] sm:$0xff]  ;;  %v13356_v38 = vld [vmem:[%s14275_s4 + $0x420] sm:$0xff] }
0x109d   :  { %10977 = vmatmul.mubr.msk.f32.vlgmr.msra.gmra.mxu1 %vm111_vm0, %v13259_v16  ;;  %v13364_v3 = vld [vmem:[%s14275_s4 + $0x428] sm:$0xff] }
0x109e   :  { %v13266_v11 = vadd.f32 %v4205_v5, %v12834_v30  ;;  %11022 = vmatpush3.msk.msra.mxu1 %vm1120_vm3, %v13271_v29  ;;  %v4338_v30 = vmul.f32 %v13256_v7, %v13256_v7  ;;  %v4341_v45 = vmul.f32 %v13276_v36, %v13276_v36  ;;  %v13371_v5 = vld [vmem:[%s14275_s4 + $0x430] sm:$0xff] }
0x109f   :  { %11045 = vmatprep.subr.mxu1 %v12897_v23 }
0x10a0   :  { %10979 = vmatprep.mubr.msk.f32.mxu1 %vm111_vm0, %v13266_v11  ;;  %v4340_v59 = vmul.f32 %v13266_v11, %v13266_v11 }
0x10a1   :  { %10980 = vmatmul.mubr.msk.f32.gmra.mxu1 %vm111_vm0, %v13276_v36 }
0x10a2   :  { %10982 = vmatprep.mubr.msk.f32.mxu1 %vm111_vm0, %v4338_v30  ;;  %v13378_v30 = vld [vmem:[%s14275_s4 + $0x438] sm:$0xff] }
0x10a5   :  { %10983 = vmatmul.mubr.msk.f32.gmra.mxu1 %vm111_vm0, %v4339_v13  ;;  %v13385_v13 = vld [vmem:[%s14275_s4 + $0x440] sm:$0xff] }
0x10a6   :  { %10985 = vmatprep.mubr.msk.f32.mxu1 %vm111_vm0, %v4340_v59 }
0x10a9   :  { %10986 = vmatmul.mubr.msk.f32.gmra.mxu1 %vm111_vm0, %v4341_v45 }
0x115d   :  { %v10978_v1 = vpop.f32.mrf.mxu1 }
0x115f   :  { %v4432_v12 = vpop.f32.mrf.mxu1 }
0x1161   :  { %v10981_v22 = vpop.f32.mrf.mxu1 }
0x1163   :  { %v4442_v0 = vpop.f32.mrf.mxu1 }
0x1165   :  { %v10984_v18 = vpop.f32.mrf.mxu1 }
0x1167   :  { %v4452_v52 = vpop.f32.mrf.mxu1 }
0x1169   :  { %v10987_v31 = vpop.f32.mrf.mxu1 }
0x116a   :  { %10989 = vmatpush3.msra.mxu0 %v10987_v31  ;;  %v4802_v31 = vpop.permute.xlu1 %4801 }
0x116b   :  { %v4462_v37 = vpop.f32.mrf.mxu1  ;;  %10990 = vmatprep.subr.mxu0 %v14327_v56 }
0x116c   :  { %10991 = vmatpush3.msra.mxu0 %v4462_v37 }
0x116d   :  { %10992 = vmatprep.subr.mxu0 %v14327_v56 }
0x116e   :  { %10993 = vmatpush3.msra.mxu0 %v10984_v18  ;;  %v4825_v37 = vpop.permute.xlu1 %4824 }
0x116f   :  { %10994 = vmatprep.subr.mxu0 %v14327_v56 }
0x1170   :  { %10995 = vmatpush3.msra.mxu0 %v4452_v52 }
0x1171   :  { %10996 = vmatprep.subr.mxu0 %v14327_v56 }
0x1172   :  { %10997 = vmatpush3.msra.mxu0 %v10981_v22 }
0x1173   :  { %10998 = vmatprep.subr.mxu0 %v14327_v56 }
0x1174   :  { %10999 = vmatpush3.msra.mxu0 %v4442_v0 }
0x1175   :  { %11000 = vmatprep.subr.mxu0 %v14327_v56 }
0x1176   :  { %11001 = vmatpush3.msra.mxu0 %v10978_v1 }
0x1177   :  { %11002 = vmatprep.subr.mxu0 %v14327_v56 }
0x1178   :  { %11003 = vmatpush3.msra.mxu0 %v4432_v12 }
0x1179   :  { %11005 = vmatmul.mubr.msk.f32.vlgmr.msra.gmra.mxu0 %vm604_vm1, %v13313_v28 }
0x117a   :  { %11009 = vmatprep.mubr.msk.f32.mxu0 %vm2550_vm10, %v13320_v14 }
0x1239   :  { %v4537_v43 = vpop.f32.mrf.mxu0 }
0x123a   :  { %v4541_v42 = vmul.f32 %v4537_v43, %v4537_v43  ;;  %v4548_v15 = vsub.f32 0.0, %v4537_v43 }
0x123b   :  { %v11006_v46 = vpop.f32.mrf.mxu0 }
0x123c   :  { %v4543_v39 = vrot.slane %v4541_v42, 4  ;;  %v4829_v46 = vpop.permute.xlu1 %4828 }
0x123e   :  { %v4545_v40 = vsub.f32 %v4537_v43, %v4543_v39 }
0x1240   :  { %v4546_v57 = vadd.f32 1e-05, %v4545_v40  ;;  %v4807_v40 = vpop.permute.xlu0 %4806 }
0x1242   :  { %11891 = vrsqrt.f32 %v4546_v57 }
0x124f   :  { %v11892_v58 = vpop.eup %11891 }
0x1250   :  { %v4550_v55 = vrot.slane %v11892_v58, 4 }
0x1252   :  { %v4552_v60 = vmul.f32 %v4550_v55, %v4548_v15 }
0x1254   :  { %v4554_v51 = vrot.slane %v4552_v60, 4 }
0x1256   :  { %v4556_v62 = vsel %vm1309_vm4, %v4550_v55, %v4554_v51  ;;  %v4817_v51 = vpop.permute.xlu1 %4816 }
0x1257   :  { %11007 = vmatprep.subr.mxu0 %v4556_v62 }
0x1258   :  { %11008 = vmatpush3.msra.mxu0 %v4556_v62 }
0x1259   :  { %11010 = vmatmul.mubr.msk.f32.vlgmr.msra.gmra.mxu0 %vm2550_vm10, %v13328_v6  ;;  %11035 = vmatprep.subr.mxu0 %v13335_v9 }
0x125a   :  { %11036 = vmatpush3.msra.mxu0 %v13335_v9  ;;  %11012 = vmatprep.mubr.msk.f32.mxu0 %vm2550_vm10, %v13342_v53 }
0x125b   :  { %11037 = vmatprep.subr.mxu0 %v13349_v4 }
0x125c   :  { %11038 = vmatpush3.msra.mxu0 %v13349_v4 }
0x125d   :  { %11013 = vmatmul.mubr.msk.f32.gmra.mxu0 %vm2550_vm10, %v13356_v38  ;;  %11055 = vmatprep.subr.mxu0 %v12879_v27 }
0x125e   :  { %11015 = vmatprep.mubr.msk.f32.mxu0 %vm2550_vm10, %v13364_v3 }
0x1261   :  { %11016 = vmatmul.mubr.msk.f32.gmra.mxu0 %vm2550_vm10, %v13371_v5 }
0x1262   :  { %11018 = vmatprep.mubr.msk.f32.mxu0 %vm2550_vm10, %v13378_v30 }
0x1265   :  { %11019 = vmatmul.mubr.msk.f32.gmra.mxu0 %vm2550_vm10, %v13385_v13 }
0x1319   :  { %v11011_v59 = vpop.f32.mrf.mxu0 }
0x131b   :  { %v4623_v45 = vpop.f32.mrf.mxu0 }
0x131c   :  { %11023 = vmatprep.mubr.msk.f32.mxu1 %vm1095_vm6, %v4623_v45 }
0x131d   :  { %v11014_v1 = vpop.f32.mrf.mxu0  ;;  %11024 = vmatmul.mubr.msk.f32.vlgmr.msra.gmra.mxu1 %vm1095_vm6, %v11011_v59 }
0x131e   :  { %11046 = vmatpush3.msra.mxu1 %v12897_v23 }
0x131f   :  { %11047 = vmatprep.subr.mxu1 %v12968_v17  ;;  %v4633_v12 = vpop.f32.mrf.mxu0 }
0x1320   :  { %11048 = vmatpush3.msra.mxu1 %v12968_v17  ;;  %11026 = vmatprep.mubr.msk.f32.mxu1 %vm1095_vm6, %v4633_v12  ;;  %v4812_v12 = vpop.permute.xlu0 %4811 }
0x1321   :  { %v11017_v22 = vpop.f32.mrf.mxu0  ;;  %11027 = vmatmul.mubr.msk.f32.gmra.mxu1 %vm1095_vm6, %v11014_v1 }
0x1323   :  { %v4643_v0 = vpop.f32.mrf.mxu0 }
0x1324   :  { %11029 = vmatprep.mubr.msk.f32.mxu1 %vm1095_vm6, %v4643_v0 }
0x1325   :  { %v11020_v18 = vpop.f32.mrf.mxu0  ;;  %11030 = vmatmul.mubr.msk.f32.gmra.mxu1 %vm1095_vm6, %v11017_v22 }
0x1327   :  { %v4653_v52 = vpop.f32.mrf.mxu0 }
0x1328   :  { %11032 = vmatprep.mubr.msk.f32.mxu1 %vm1095_vm6, %v4653_v52 }
0x1329   :  { %11033 = vmatmul.mubr.msk.f32.gmra.mxu1 %vm1095_vm6, %v11020_v18 }
0x13dd   :  { %v11025_v43 = vpop.f32.mrf.mxu1 }
0x13de   :  { %v4792_v58 = vmul.f32 %v11025_v43, %v13259_v16 }
0x13df   :  { %v4752_v42 = vpop.f32.mrf.mxu1 }
0x13e0   :  { %v4791_v55 = vmul.f32 %v4752_v42, %v13256_v7  ;;  %v4837_v42 = vpop.permute.xlu1 %4836 }
0x13e1   :  { %v11028_v39 = vpop.f32.mrf.mxu1 }
0x13e2   :  { %v4794_v59 = vmul.f32 %v11028_v39, %v13276_v36  ;;  %v4833_v39 = vpop.permute.xlu0 %4832 }
0x13e3   :  { %v4762_v57 = vpop.f32.mrf.mxu1 }
0x13e4   :  { %v4793_v0 = vmul.f32 %v4762_v57, %v13266_v11 }
0x13e5   :  { %v11031_v15 = vpop.f32.mrf.mxu1 }
0x13e6   :  { %v4796_v60 = vadd.f32 %v11031_v15, %v4792_v58 }
0x13e7   :  { %v4772_v62 = vpop.f32.mrf.mxu1 }
0x13e8   :  { %v4820_v45 = vmul.f32 %v4807_v40, %v4796_v60  ;;  %v4795_v1 = vadd.f32 %v4791_v55, %v4772_v62 }
0x13e9   :  { %v11034_v22 = vpop.f32.mrf.mxu1 }
0x13ea   :  { %v4840_v18 = vadd.f32 %v4829_v46, %v4820_v45  ;;  %v4819_v52 = vmul.f32 %v4802_v31, %v4795_v1  ;;  %v4798_v41 = vadd.f32 %v11034_v22, %v4794_v59 }
0x13eb   :  { %v4782_v21 = vpop.f32.mrf.mxu1 }
0x13ec   :  { %v9538_v32 = vmul.f32 -1.442695, %v4840_v18  ;;  %v4839_v43 = vadd.f32 %v4825_v37, %v4819_v52  ;;  %v4822_v16 = vmul.f32 %v4817_v51, %v4798_v41  ;;  %v4797_v34 = vadd.f32 %v4793_v0, %v4782_v21 }
0x13ee   :  { %11893 = vpow2.f32 %v9538_v32  ;;  %v9537_v58 = vmul.f32 -1.442695, %v4839_v43  ;;  %v4842_v15 = vadd.f32 %v4837_v42, %v4822_v16  ;;  %v4821_v7 = vmul.f32 %v4812_v12, %v4797_v34 }
0x13f0   :  { %11895 = vpow2.f32 %v9537_v58  ;;  %v9540_v40 = vmul.f32 -1.442695, %v4842_v15  ;;  %v4841_v55 = vadd.f32 %v4833_v39, %v4821_v7 }
0x13f2   :  { %11897 = vpow2.f32 %v9540_v40  ;;  %v9539_v60 = vmul.f32 -1.442695, %v4841_v55 }
0x13f4   :  { %11899 = vpow2.f32 %v9539_v60 }
0x13fb   :  { %v11894_v46 = vpop.eup %11893 }
0x13fc   :  { %v4856_v31 = vadd.f32 1.0, %v11894_v46 }
0x13fd   :  { %v11896_v57 = vpop.eup %11895 }
0x13fe   :  { %v4855_v62 = vadd.f32 1.0, %v11896_v57  ;;  %11901 = vrcp.f32 %v4856_v31  ;;  %v5145_v31 = vpop.permute.xlu0 %5144 }
0x13ff   :  { %v11898_v59 = vpop.eup %11897 }
0x1400   :  { %11903 = vrcp.f32 %v4855_v62  ;;  %v4858_v21 = vadd.f32 1.0, %v11898_v59 }
0x1401   :  { %v11900_v41 = vpop.eup %11899 }
0x1402   :  { %v4857_v32 = vadd.f32 1.0, %v11900_v41  ;;  %11905 = vrcp.f32 %v4858_v21  ;;  %v4234_v62 = vpop.permute.xlu0 %4233 }
0x1404   :  { %11907 = vrcp.f32 %v4857_v32 }
0x140b   :  { %v11902_v34 = vpop.eup %11901 }
0x140c   :  { %v4868_v51 = vmul.f32 %v11902_v34, %v4840_v18 }
0x140d   :  { %v11904_v16 = vpop.eup %11903 }
0x140e   :  { %v4867_v37 = vmul.f32 %v11904_v16, %v4839_v43 }
0x140f   :  { %v11906_v7 = vpop.eup %11905 }
0x1410   :  { %11039 = vmatprep.mubr.msk.f32.mxu0 %vm111_vm0, %v4867_v37  ;;  %11049 = vmatprep.mubr.msk.f32.mxu1 %vm111_vm0, %v4867_v37  ;;  %v4870_v12 = vmul.f32 %v11906_v7, %v4842_v15 }
0x1411   :  { %v11908_v45 = vpop.eup %11907  ;;  %11040 = vmatmul.mubr.msk.f32.vlgmr.msra.gmra.mxu0 %vm111_vm0, %v4868_v51  ;;  %11050 = vmatmul.mubr.msk.f32.vlgmr.msra.gmra.mxu1 %vm111_vm0, %v4868_v51 }
0x1412   :  { %v4869_v1 = vmul.f32 %v11908_v45, %v4841_v55  ;;  %11056 = vmatpush3.msra.mxu0 %v12879_v27  ;;  %v4224_v55 = vpop.permute.xlu1 %4223 }
0x1413   :  { %11057 = vmatprep.subr.mxu0 %v12964_v61  ;;  %v4316_v32 = vadd.f32 %v13297_v2, %v4224_v55 }
0x1414   :  { %11058 = vmatpush3.msra.mxu0 %v12964_v61  ;;  %11042 = vmatprep.mubr.msk.f32.mxu0 %vm111_vm0, %v4869_v1 }
0x1415   :  { %11052 = vmatprep.mubr.msk.f32.mxu1 %vm111_vm0, %v4869_v1  ;;  %11043 = vmatmul.mubr.msk.f32.gmra.mxu0 %vm111_vm0, %v4870_v12 }
0x1416   :  { %11053 = vmatmul.mubr.msk.f32.gmra.mxu1 %vm111_vm0, %v4870_v12  ;;  %11059 = vmatprep.mubr.msk.f32.mxu0 %vm111_vm0, %v4867_v37  ;;  %v4229_v60 = vpop.permute.xlu1 %4228 }
0x1417   :  { %11089 = vmatprep.mubr.msk.f32.mxu1 %vm3194_vm11, %v13229_v63  ;;  %11095 = vmatprep.subr.mxu0 %v13156_v54  ;;  %v5141_v63 = vld [vmem:[%s14275_s4 + $0x220] sm:$0xff] }
0x1418   :  { %5159 = vperm.xlu0 %11722, %v5141_v63  }
0x1419   :  { %11060 = vmatmul.mubr.msk.f32.vlgmr.msra.gmra.mxu0 %vm111_vm0, %v4868_v51 }
0x141a   :  { %11062 = vmatprep.mubr.msk.f32.mxu0 %vm111_vm0, %v4869_v1  ;;  %11096 = vmatpush3.msra.mxu0 %v13156_v54  ;;  %v5150_v46 = vpop.permute.xlu1 %5149  ;;  %v4326_v1 = vadd.f32 %v13301_v35, %v4234_v62 }
0x141b   :  { %11097 = vmatprep.subr.mxu0 %v13190_v33 }
0x141c   :  { %11098 = vmatpush3.msra.mxu0 %v13190_v33  ;;  %11724 = vset.pattern.permute.xlu0 %v14328_v24 }
0x141d   :  { %11063 = vmatmul.mubr.msk.f32.gmra.mxu0 %vm111_vm0, %v4870_v12  ;;  %11111 = vmatprep.subr.mxu0 %v14327_v56 }
0x141e   :  { %v5155_v57 = vpop.permute.xlu1 %5154 }
0x1422   :  { %v4239_v37 = vpop.permute.xlu1 %4238 }
0x1423   :  { %v4331_v2 = vadd.f32 %v13299_v20, %v4239_v37 }
0x1493   :  { %v5160_v34 = vpop.permute.xlu0 %5159 }
0x14d1   :  { %v11041_v22 = vpop.f32.mrf.mxu0  ;;  %v11051_v43 = vpop.f32.mrf.mxu1 }
0x14d3   :  { %v4949_v0 = vpop.f32.mrf.mxu0  ;;  %v5034_v33 = vpop.f32.mrf.mxu1 }
0x14d5   :  { %v11044_v18 = vpop.f32.mrf.mxu0 }
0x14d6   :  { %v11054_v39 = vpop.f32.mrf.mxu1 }
0x14d7   :  { %v4959_v52 = vpop.f32.mrf.mxu0 }
0x14d8   :  { %v5044_v40 = vpop.f32.mrf.mxu1 }
0x14d9   :  { %v11061_v54 = vpop.f32.mrf.mxu0 }
0x14db   :  { %v5119_v42 = vpop.f32.mrf.mxu0 }
0x14dd   :  { %v11064_v58 = vpop.f32.mrf.mxu0 }
0x14de   :  { %11065 = vmatprep.subr.mxu1 %v11064_v58 }
0x14df   :  { %v5129_v15 = vpop.f32.mrf.mxu0  ;;  %11066 = vmatpush3.msra.mxu1 %v11064_v58 }
0x14e0   :  { %11067 = vmatprep.subr.mxu1 %v5129_v15 }
0x14e1   :  { %11068 = vmatpush3.msra.mxu1 %v5129_v15 }
0x14e2   :  { %11069 = vmatprep.subr.mxu1 %v11061_v54 }
0x14e3   :  { %11070 = vmatpush3.msra.mxu1 %v11061_v54 }
0x14e4   :  { %11071 = vmatprep.subr.mxu1 %v5119_v42 }
0x14e5   :  { %11072 = vmatpush3.msra.mxu1 %v5119_v42 }
0x14e6   :  { %11073 = vmatprep.subr.mxu1 %v11054_v39 }
0x14e7   :  { %11074 = vmatpush3.msra.mxu1 %v11054_v39 }
0x14e8   :  { %11075 = vmatprep.subr.mxu1 %v5044_v40 }
0x14e9   :  { %11076 = vmatpush3.msra.mxu1 %v5044_v40 }
0x14ea   :  { %11077 = vmatprep.subr.mxu1 %v11051_v43 }
0x14eb   :  { %11078 = vmatpush3.msra.mxu1 %v11051_v43 }
0x14ec   :  { %11079 = vmatprep.subr.mxu1 %v5034_v33 }
0x14ed   :  { %11080 = vmatpush3.msra.mxu1 %v5034_v33 }
0x14ee   :  { %11081 = vmatprep.subr.mxu1 %v11044_v18 }
0x14ef   :  { %11082 = vmatpush3.msra.mxu1 %v11044_v18 }
0x14f0   :  { %11083 = vmatprep.subr.mxu1 %v4959_v52 }
0x14f1   :  { %11084 = vmatpush3.msra.mxu1 %v4959_v52 }
0x14f2   :  { %11085 = vmatprep.subr.mxu1 %v11041_v22 }
0x14f3   :  { %11086 = vmatpush3.msra.mxu1 %v11041_v22 }
0x14f4   :  { %11087 = vmatprep.subr.mxu1 %v4949_v0 }
0x14f5   :  { %11088 = vmatpush3.msra.mxu1 %v4949_v0 }
0x14f6   :  { %11090 = vmatmul.mubr.msk.f32.vlgmr.msra.gmra.mxu1 %vm3194_vm11, %v13243_v8 }
0x14f7   :  { %11092 = vmatprep.mubr.msk.f32.mxu1 %vm3194_vm11, %v13250_v49  ;;  %v4321_v49 = vadd.f32 %v13295_v47, %v4229_v60 }
0x14fa   :  { %11093 = vmatmul.mubr.msk.f32.gmra.mxu1 %vm3194_vm11, %v5141_v63 }
0x14fb   :  { %11132 = vmatprep.mubr.msk.f32.mxu1 %vm2550_vm10, %v13320_v14 }
0x15b6   :  { %v11091_v59 = vpop.f32.mrf.mxu1 }
0x15b7   :  { %v5242_v21 = vadd.f32 %v11091_v59, %v5150_v46 }
0x15b8   :  { %v5236_v41 = vpop.f32.mrf.mxu1 }
0x15b9   :  { %v5237_v8 = vadd.f32 %v5236_v41, %v5145_v31  ;;  %v13441_v14 = vadd.f32 %v5242_v21, %v4321_v49 }
0x15ba   :  { %v11094_v16 = vpop.f32.mrf.mxu1 }
0x15bb   :  { %v13439_v51 = vadd.f32 %v5237_v8, %v4316_v32  ;;  %v5252_v7 = vadd.f32 %v11094_v16, %v5160_v34  ;;  %v5264_v20 = vmul.f32 %v13441_v14, %v13441_v14 }
0x15bc   :  { %v5246_v45 = vpop.f32.mrf.mxu1 }
0x15bd   :  { %v5247_v12 = vadd.f32 %v5246_v45, %v5155_v57  ;;  %11099 = vmatprep.mubr.msk.f32.mxu0 %vm111_vm0, %v13439_v51  ;;  %v13451_v63 = vadd.f32 %v5252_v7, %v4331_v2  ;;  %v5263_v22 = vmul.f32 %v13439_v51, %v13439_v51 }
0x15be   :  { %11100 = vmatmul.mubr.msk.f32.vlgmr.msra.gmra.mxu0 %vm111_vm0, %v13441_v14 }
0x15bf   :  { %v13449_v47 = vadd.f32 %v5247_v12, %v4326_v1  ;;  %v5266_v0 = vmul.f32 %v13451_v63, %v13451_v63 }
0x15c1   :  { %11102 = vmatprep.mubr.msk.f32.mxu0 %vm111_vm0, %v13449_v47  ;;  %v5265_v35 = vmul.f32 %v13449_v47, %v13449_v47 }
0x15c2   :  { %11103 = vmatmul.mubr.msk.f32.gmra.mxu0 %vm111_vm0, %v13451_v63 }
0x15c3   :  { %11105 = vmatprep.mubr.msk.f32.mxu0 %vm111_vm0, %v5263_v22 }
0x15c6   :  { %11106 = vmatmul.mubr.msk.f32.gmra.mxu0 %vm111_vm0, %v5264_v20 }
0x15c7   :  { %11108 = vmatprep.mubr.msk.f32.mxu0 %vm111_vm0, %v5265_v35 }
0x15ca   :  { %11109 = vmatmul.mubr.msk.f32.gmra.mxu0 %vm111_vm0, %v5266_v0 }
0x15cb   :  { %11127 = vmatprep.mubr.msk.f32.mxu0 %vm12017_vm2, %v14327_v56 }
0x167e   :  { %v11101_v18 = vpop.f32.mrf.mxu0 }
0x1680   :  { %v5357_v52 = vpop.f32.mrf.mxu0 }
0x1682   :  { %v11104_v54 = vpop.f32.mrf.mxu0 }
0x1684   :  { %v5367_v43 = vpop.f32.mrf.mxu0 }
0x1686   :  { %v11107_v42 = vpop.f32.mrf.mxu0 }
0x1688   :  { %v5377_v58 = vpop.f32.mrf.mxu0 }
0x168a   :  { %v11110_v33 = vpop.f32.mrf.mxu0 }
0x168b   :  { %11112 = vmatpush3.msra.mxu0 %v11110_v33 }
0x168c   :  { %v5387_v15 = vpop.f32.mrf.mxu0  ;;  %11113 = vmatprep.subr.mxu0 %v14327_v56 }
0x168d   :  { %11114 = vmatpush3.msra.mxu0 %v5387_v15 }
0x168e   :  { %11115 = vmatprep.subr.mxu0 %v14327_v56 }
0x168f   :  { %11116 = vmatpush3.msra.mxu0 %v11107_v42 }
0x1690   :  { %11117 = vmatprep.subr.mxu0 %v14327_v56 }
0x1691   :  { %11118 = vmatpush3.msra.mxu0 %v5377_v58 }
0x1692   :  { %11119 = vmatprep.subr.mxu0 %v14327_v56 }
0x1693   :  { %11120 = vmatpush3.msra.mxu0 %v11104_v54 }
0x1694   :  { %11121 = vmatprep.subr.mxu0 %v14327_v56 }
0x1695   :  { %11122 = vmatpush3.msra.mxu0 %v5367_v43 }
0x1696   :  { %11123 = vmatprep.subr.mxu0 %v14327_v56 }
0x1697   :  { %11124 = vmatpush3.msra.mxu0 %v11101_v18 }
0x1698   :  { %11125 = vmatprep.subr.mxu0 %v14327_v56 }
0x1699   :  { %11126 = vmatpush3.msra.mxu0 %v5357_v52 }
0x169a   :  { %11128 = vmatmul.mubr.msk.f32.vlgmr.msra.gmra.mxu0 %vm604_vm1, %v13313_v28  ;;  %11144 = vmatprep.subr.msk.mxu0 %vm1120_vm3, %v13271_v29 }
0x169b   :  { %11145 = vmatpush3.msk.msra.mxu0 %vm1120_vm3, %v13271_v29 }
0x169c   :  { %11168 = vmatprep.subr.mxu0 %v12897_v23 }
0x175a   :  { %v5462_v39 = vpop.f32.mrf.mxu0 }
0x175b   :  { %v5466_v40 = vmul.f32 %v5462_v39, %v5462_v39  ;;  %v5473_v62 = vsub.f32 0.0, %v5462_v39 }
0x175c   :  { %v11129_v55 = vpop.f32.mrf.mxu0 }
0x175d   :  { %v5468_v60 = vrot.slane %v5466_v40, 4 }
0x175f   :  { %v5470_v46 = vsub.f32 %v5462_v39, %v5468_v60 }
0x1761   :  { %v5471_v31 = vadd.f32 1e-05, %v5470_v46 }
0x1763   :  { %11909 = vrsqrt.f32 %v5471_v31 }
0x1770   :  { %v11910_v57 = vpop.eup %11909 }
0x1771   :  { %v5475_v59 = vrot.slane %v11910_v57, 4 }
0x1773   :  { %v5477_v21 = vmul.f32 %v5475_v59, %v5473_v62 }
0x1775   :  { %v5479_v28 = vrot.slane %v5477_v21, 4 }
0x1777   :  { %v5481_v41 = vsel %vm1309_vm4, %v5475_v59, %v5479_v28 }
0x1778   :  { %11130 = vmatprep.subr.mxu1 %v5481_v41 }
0x1779   :  { %11131 = vmatpush3.msra.mxu1 %v5481_v41 }
0x177a   :  { %11133 = vmatmul.mubr.msk.f32.vlgmr.msra.gmra.mxu1 %vm2550_vm10, %v13328_v6  ;;  %11158 = vmatprep.subr.mxu1 %v13335_v9  ;;  %v5259_v6 = vld [vmem:[%s14275_s4 + $0x248] sm:$0xff] }
0x177b   :  { %11159 = vmatpush3.msra.mxu1 %v13335_v9  ;;  %11135 = vmatprep.mubr.msk.f32.mxu1 %vm2550_vm10, %v13342_v53  ;;  %v5260_v9 = vld [vmem:[%s14275_s4 + $0x250] sm:$0xff]  ;;  %v5262_v53 = vld [vmem:[%s14275_s4 + $0x260] sm:$0xff] }
0x177c   :  { %11160 = vmatprep.subr.mxu1 %v13349_v4  ;;  %5726 = vperm.xlu1 %11723, %v5259_v6  }
0x177d   :  { %11161 = vmatpush3.msra.mxu1 %v13349_v4  ;;  %5749 = vperm.xlu0 %11724, %v5259_v6   ;;  %v5261_v4 = vld [vmem:[%s14275_s4 + $0x258] sm:$0xff] }
0x177e   :  { %11136 = vmatmul.mubr.msk.f32.gmra.mxu1 %vm2550_vm10, %v13356_v38  ;;  %11178 = vmatprep.subr.mxu1 %v12879_v27 }
0x177f   :  { %11138 = vmatprep.mubr.msk.f32.mxu1 %vm2550_vm10, %v13364_v3 }
0x1780   :  { %5731 = vperm.xlu1 %11723, %v5260_v9  }
0x1781   :  { %11727 = vset.pattern.permute.xlu0 %v14329_v48 }
0x1782   :  { %11139 = vmatmul.mubr.msk.f32.gmra.mxu1 %vm2550_vm10, %v13371_v5  ;;  %5741 = vperm.xlu0 %11727, %v5262_v53  }
0x1783   :  { %11141 = vmatprep.mubr.msk.f32.mxu1 %vm2550_vm10, %v13378_v30 }
0x1784   :  { %11725 = vset.pattern.permute.xlu1 %v14328_v24 }
0x1785   :  { %5753 = vperm.xlu1 %11725, %v5260_v9  }
0x1786   :  { %11142 = vmatmul.mubr.msk.f32.gmra.mxu1 %vm2550_vm10, %v13385_v13  ;;  %11729 = vset.pattern.permute.xlu0 %v14330_v26 }
0x1789   :  { %11726 = vset.pattern.permute.xlu1 %v14329_v48 }
0x178a   :  { %5736 = vperm.xlu1 %11726, %v5261_v4  }
0x178e   :  { %11728 = vset.pattern.permute.xlu1 %v14328_v24 }
0x178f   :  { %5757 = vperm.xlu1 %11728, %v5261_v4  }
0x1793   :  { %5761 = vperm.xlu1 %11728, %v5262_v53  }
0x1797   :  { %11730 = vset.pattern.permute.xlu1 %v14330_v26 }
0x17f7   :  { %v5727_v49 = vpop.permute.xlu1 %5726 }
0x17f8   :  { %v5750_v22 = vpop.permute.xlu0 %5749 }
0x17fb   :  { %v5732_v16 = vpop.permute.xlu1 %5731 }
0x17fd   :  { %v5742_v15 = vpop.permute.xlu0 %5741 }
0x1800   :  { %v5754_v37 = vpop.permute.xlu1 %5753 }
0x1805   :  { %v5737_v1 = vpop.permute.xlu1 %5736 }
0x180a   :  { %v5758_v0 = vpop.permute.xlu1 %5757 }
0x180e   :  { %v5762_v31 = vpop.permute.xlu1 %5761 }
0x183a   :  { %v11134_v38 = vpop.f32.mrf.mxu1 }
0x183c   :  { %v5548_v3 = vpop.f32.mrf.mxu1 }
0x183d   :  { %11146 = vmatprep.mubr.msk.f32.mxu0 %vm1095_vm6, %v5548_v3 }
0x183e   :  { %v11137_v5 = vpop.f32.mrf.mxu1  ;;  %11147 = vmatmul.mubr.msk.f32.vlgmr.msra.gmra.mxu0 %vm1095_vm6, %v11134_v38 }
0x183f   :  { %11169 = vmatpush3.msra.mxu0 %v12897_v23 }
0x1840   :  { %11170 = vmatprep.subr.mxu0 %v12968_v17  ;;  %v5558_v30 = vpop.f32.mrf.mxu1 }
0x1841   :  { %11171 = vmatpush3.msra.mxu0 %v12968_v17  ;;  %11149 = vmatprep.mubr.msk.f32.mxu0 %vm1095_vm6, %v5558_v30 }
0x1842   :  { %v11140_v13 = vpop.f32.mrf.mxu1  ;;  %11150 = vmatmul.mubr.msk.f32.gmra.mxu0 %vm1095_vm6, %v11137_v5 }
0x1844   :  { %v5568_v32 = vpop.f32.mrf.mxu1 }
0x1845   :  { %11152 = vmatprep.mubr.msk.f32.mxu0 %vm1095_vm6, %v5568_v32 }
0x1846   :  { %v11143_v8 = vpop.f32.mrf.mxu1  ;;  %11153 = vmatmul.mubr.msk.f32.gmra.mxu0 %vm1095_vm6, %v11140_v13 }
0x1848   :  { %v5578_v34 = vpop.f32.mrf.mxu1 }
0x1849   :  { %11155 = vmatprep.mubr.msk.f32.mxu0 %vm1095_vm6, %v5578_v34 }
0x184a   :  { %11156 = vmatmul.mubr.msk.f32.gmra.mxu0 %vm1095_vm6, %v11143_v8 }
0x18fe   :  { %v11148_v7 = vpop.f32.mrf.mxu0 }
0x18ff   :  { %v5717_v20 = vmul.f32 %v11148_v7, %v13441_v14 }
0x1900   :  { %v5677_v45 = vpop.f32.mrf.mxu0 }
0x1901   :  { %v5716_v18 = vmul.f32 %v5677_v45, %v13439_v51  ;;  %v14335_v45 = vld [vmem:[#allocation10_spill] sm:$0xff] }
0x1902   :  { %v11151_v12 = vpop.f32.mrf.mxu0 }
0x1903   :  { %v5719_v43 = vmul.f32 %v11151_v12, %v13451_v63  ;;  %v6065_v12 = vld [vmem:[%s14275_s4 + $0x278] sm:$0xff] }
0x1904   :  { %v5687_v2 = vpop.f32.mrf.mxu0 }
0x1905   :  { %v5718_v39 = vmul.f32 %v5687_v2, %v13449_v47  ;;  %v13591_v2 = vld [vmem:[%s14275_s4 + $0x308] sm:$0xff] }
0x1906   :  { %v11154_v35 = vpop.f32.mrf.mxu0 }
0x1907   :  { %v5721_v52 = vadd.f32 %v11154_v35, %v5717_v20 }
0x1908   :  { %v5697_v54 = vpop.f32.mrf.mxu0 }
0x1909   :  { %v5745_v42 = vmul.f32 %v5732_v16, %v5721_v52  ;;  %v5720_v58 = vadd.f32 %v5716_v18, %v5697_v54 }
0x190a   :  { %v11157_v33 = vpop.f32.mrf.mxu0 }
0x190b   :  { %v5765_v40 = vadd.f32 %v5754_v37, %v5745_v42  ;;  %v5744_v55 = vmul.f32 %v5727_v49, %v5720_v58  ;;  %v5723_v60 = vadd.f32 %v11157_v33, %v5719_v43 }
0x190c   :  { %v5707_v46 = vpop.f32.mrf.mxu0 }
0x190d   :  { %v9584_v14 = vmul.f32 -1.442695, %v5765_v40  ;;  %v5764_v57 = vadd.f32 %v5750_v22, %v5744_v55  ;;  %v5747_v62 = vmul.f32 %v5742_v15, %v5723_v60  ;;  %v5722_v59 = vadd.f32 %v5718_v39, %v5707_v46  ;;  %v6189_v39 = vld [vmem:[%s14275_s4 + $0x310] sm:$0xff]  ;;  %v13614_v55 = vld [vmem:[%s14275_s4 + $0x3e8] sm:$0xff]  ;;  %v6191_v60 = vld [vmem:[%s14275_s4 + $0x320] sm:$0xff] }
0x190e   :  { %v6305_v46 = vld [vmem:[%s14275_s4 + $0x288] sm:$0xff] }
0x190f   :  { %11911 = vpow2.f32 %v9584_v14  ;;  %v9583_v51 = vmul.f32 -1.442695, %v5764_v57  ;;  %v5746_v21 = vmul.f32 %v5737_v1, %v5722_v59  ;;  %v5767_v28 = vadd.f32 %v5762_v31, %v5747_v62  ;;  %v6066_v1 = vld [vmem:[%s14275_s4 + $0x280] sm:$0xff]  ;;  %v6306_v31 = vld [vmem:[%s14275_s4 + $0x290] sm:$0xff]  ;;  %v6311_v59 = vld [vmem:[%s14275_s4 + $0x2b8] sm:$0xff] }
0x1910   :  { %v6308_v14 = vld [vmem:[%s14275_s4 + $0x2a0] sm:$0xff]  ;;  %v6310_v62 = vld [vmem:[%s14275_s4 + $0x2b0] sm:$0xff] }
0x1911   :  { %11913 = vpow2.f32 %v9583_v51  ;;  %v5766_v63 = vadd.f32 %v5758_v0, %v5746_v21  ;;  %v9586_v41 = vmul.f32 -1.442695, %v5767_v28  ;;  %v6312_v51 = vld [vmem:[%s14275_s4 + $0x2c0] sm:$0xff]  ;;  %v13661_v21 = vld [vmem:[%s14275_s4 + $0x2e8] sm:$0xff] }
0x1913   :  { %v9585_v6 = vmul.f32 -1.442695, %v5766_v63  ;;  %11915 = vpow2.f32 %v9586_v41 }
0x1915   :  { %11917 = vpow2.f32 %v9585_v6 }
0x191c   :  { %v11912_v47 = vpop.eup %11911 }
0x191d   :  { %v5781_v9 = vadd.f32 1.0, %v11912_v47 }
0x191e   :  { %v11914_v53 = vpop.eup %11913 }
0x191f   :  { %v5780_v4 = vadd.f32 1.0, %v11914_v53  ;;  %11919 = vrcp.f32 %v5781_v9 }
0x1920   :  { %v11916_v38 = vpop.eup %11915 }
0x1921   :  { %11921 = vrcp.f32 %v5780_v4  ;;  %v5783_v3 = vadd.f32 1.0, %v11916_v38  ;;  %v14338_v38 = vld [vmem:[#allocation13_spill] sm:$0xff] }
0x1922   :  { %v11918_v5 = vpop.eup %11917 }
0x1923   :  { %v5782_v30 = vadd.f32 1.0, %v11918_v5  ;;  %11923 = vrcp.f32 %v5783_v3 }
0x1925   :  { %11925 = vrcp.f32 %v5782_v30  ;;  %v14339_v30 = vld [vmem:[#allocation14_spill] sm:$0xff] }
0x192c   :  { %v11920_v13 = vpop.eup %11919 }
0x192d   :  { %v5793_v34 = vmul.f32 %v11920_v13, %v5765_v40  ;;  %v6190_v40 = vld [vmem:[%s14275_s4 + $0x318] sm:$0xff] }
0x192e   :  { %v11922_v32 = vpop.eup %11921 }
0x192f   :  { %v5792_v8 = vmul.f32 %v11922_v32, %v5764_v57  ;;  %v6309_v57 = vld [vmem:[%s14275_s4 + $0x2a8] sm:$0xff] }
0x1930   :  { %v11924_v49 = vpop.eup %11923 }
0x1931   :  { %11162 = vmatprep.mubr.msk.f32.mxu1 %vm111_vm0, %v5792_v8  ;;  %11172 = vmatprep.mubr.msk.f32.mxu0 %vm111_vm0, %v5792_v8  ;;  %v5795_v7 = vmul.f32 %v11924_v49, %v5767_v28  ;;  %v14337_v28 = vmov 64  }
0x1932   :  { %v11926_v16 = vpop.eup %11925  ;;  %11163 = vmatmul.mubr.msk.f32.vlgmr.msra.gmra.mxu1 %vm111_vm0, %v5793_v34  ;;  %11173 = vmatmul.mubr.msk.f32.vlgmr.msra.gmra.mxu0 %vm111_vm0, %v5793_v34 }
0x1933   :  { %v5794_v37 = vmul.f32 %v11926_v16, %v5766_v63  ;;  %11179 = vmatpush3.msra.mxu1 %v12879_v27 }
0x1934   :  { %11180 = vmatprep.subr.mxu1 %v12964_v61 }
0x1935   :  { %11181 = vmatpush3.msra.mxu1 %v12964_v61  ;;  %11165 = vmatprep.mubr.msk.f32.mxu1 %vm111_vm0, %v5794_v37 }
0x1936   :  { %11175 = vmatprep.mubr.msk.f32.mxu0 %vm111_vm0, %v5794_v37  ;;  %11218 = vmatprep.subr.mxu1 %v12673_v10 }
0x1937   :  { %11166 = vmatmul.mubr.msk.f32.gmra.mxu1 %vm111_vm0, %v5795_v7  ;;  %11176 = vmatmul.mubr.msk.f32.gmra.mxu0 %vm111_vm0, %v5795_v7 }
0x1938   :  { %11182 = vmatprep.mubr.msk.f32.mxu1 %vm111_vm0, %v5792_v8 }
0x193b   :  { %11183 = vmatmul.mubr.msk.f32.vlgmr.msra.gmra.mxu1 %vm111_vm0, %v5793_v34 }
0x193c   :  { %11219 = vmatpush3.msra.mxu1 %v12673_v10  ;;  %11185 = vmatprep.mubr.msk.f32.mxu1 %vm111_vm0, %v5794_v37  ;;  %v14334_v10 = vld [vmem:[#allocation12_spill] sm:$0xff]  ;;  %v13684_v37 = vld [vmem:[%s14275_s4 + $0x3f8] sm:$0x3] }
0x193d   :  { %11220 = vmatprep.subr.mxu1 %v12675_v50 }
0x193e   :  { %11221 = vmatpush3.msra.mxu1 %v12675_v50  ;;  %v14336_v50 = vld [vmem:[#allocation11_spill] sm:$0xff] }
0x193f   :  { %11222 = vmatprep.subr.mxu1 %v12669_v25  ;;  %11186 = vmatmul.mubr.msk.f32.gmra.mxu1 %vm111_vm0, %v5795_v7 }
0x1940   :  { %11223 = vmatpush3.msra.mxu1 %v12669_v25  ;;  %v13572_v25 = vld [vmem:[%s14275_s4 + $0x3f0] sm:$0xff]  ;;  %11234 = vmatprep.mubr.msk.f32.mxu1 %vm604_vm1, %v13591_v2 }
0x1941   :  { %11224 = vmatprep.subr.mxu1 %v12671_v44 }
0x1942   :  { %11225 = vmatpush3.msra.mxu1 %v12671_v44  ;;  %v6064_v44 = vld [vmem:[%s14275_s4 + $0x270] sm:$0xff] }
0x1943   :  { %11226 = vmatprep.subr.mxu1 %v12665_v19  ;;  %6074 = vperm.xlu1 %11730, %v6064_v44  }
0x1944   :  { %11227 = vmatpush3.msra.mxu1 %v12665_v19  ;;  %v6063_v19 = vld [vmem:[%s14275_s4 + $0x268] sm:$0xff] }
0x1945   :  { %11228 = vmatprep.subr.mxu1 %v14334_v10  ;;  %11212 = vmatprep.mubr.msk.f32.mxu0 %vm3194_vm11, %v6063_v19 }
0x1946   :  { %11229 = vmatpush3.msra.mxu1 %v14334_v10  ;;  %6069 = vperm.xlu0 %11729, %v6063_v19   ;;  %v13695_v10 = vmul.f32 0.70710677, %v14338_v38  ;;  %v13712_v19 = vmul.f32 0.70710677, %v13276_v36 }
0x1947   :  { %11230 = vmatprep.subr.mxu1 %v14335_v45  ;;  %6079 = vperm.xlu1 %11730, %v6065_v12  }
0x1948   :  { %11231 = vmatpush3.msra.mxu1 %v14335_v45  ;;  %v13702_v45 = vmul.f32 0.70710677, %v14339_v30 }
0x1949   :  { %11232 = vmatprep.subr.mxu1 %v14336_v50 }
0x194a   :  { %11233 = vmatpush3.msra.mxu1 %v14336_v50  ;;  %6084 = vperm.xlu0 %11729, %v6066_v1   ;;  %v13705_v50 = vmul.f32 0.70710677, %v13266_v11 }
0x194b   :  { %11240 = vmatprep.subr.mxu1 %v13572_v25  ;;  %11731 = vset.pattern.permute.xlu1 %v14329_v48 }
0x194c   :  { %11235 = vmatmul.mubr.msk.f32.vlgmr.msra.gmra.mxu1 %vm604_vm1, %v6189_v39  ;;  %7004 = vperm.xlu1 %11731, %v6305_v46  }
0x194d   :  { %11241 = vmatpush3.msra.mxu1 %v13572_v25  ;;  %11237 = vmatprep.mubr.msk.f32.mxu1 %vm604_vm1, %v6190_v40 }
0x194e   :  { %11734 = vset.pattern.permute.xlu0 %v14328_v24  ;;  %11242 = vmatprep.subr.mxu1 %v13614_v55 }
0x194f   :  { %11243 = vmatpush3.msra.mxu1 %v13614_v55 }
0x1950   :  { %11238 = vmatmul.mubr.msk.f32.gmra.mxu1 %vm604_vm1, %v6191_v60  ;;  %11329 = vmatprep.subr.msk.mxu1 %vm1120_vm3, %v13271_v29  ;;  %v6307_v29 = vld [vmem:[%s14275_s4 + $0x298] sm:$0xff] }
0x1951   :  { %11732 = vset.pattern.permute.xlu1 %v14328_v24  ;;  %7059 = vperm.xlu0 %11734, %v6307_v29  }
0x1952   :  { %7051 = vperm.xlu1 %11732, %v6305_v46  }
0x1955   :  { %11735 = vset.pattern.permute.xlu0 %v14329_v48 }
0x1956   :  { %7055 = vperm.xlu1 %11732, %v6306_v31   ;;  %7009 = vperm.xlu0 %11735, %v6306_v31  }
0x195a   :  { %11733 = vset.pattern.permute.xlu1 %v14329_v48  ;;  %7014 = vperm.xlu0 %11735, %v6307_v29  }
0x195b   :  { %7019 = vperm.xlu1 %11733, %v6308_v14  }
0x195e   :  { %7029 = vperm.xlu0 %11735, %v6310_v62  }
0x195f   :  { %11736 = vset.pattern.permute.xlu1 %v14328_v24 }
0x1960   :  { %7063 = vperm.xlu1 %11736, %v6308_v14  }
0x1962   :  { %7034 = vperm.xlu0 %11735, %v6311_v59  }
0x1964   :  { %11737 = vset.pattern.permute.xlu1 %v14329_v48 }
0x1965   :  { %7024 = vperm.xlu1 %11737, %v6309_v57  }
0x1966   :  { %11740 = vset.pattern.permute.xlu0 %v14328_v24 }
0x1967   :  { %7075 = vperm.xlu0 %11740, %v6311_v59  }
0x1969   :  { %11738 = vset.pattern.permute.xlu1 %v14328_v24 }
0x196a   :  { %7067 = vperm.xlu1 %11738, %v6309_v57  }
0x196b   :  { %11743 = vset.pattern.permute.xlu0 %v14337_v28 }
0x196c   :  { %7495 = vperm.xlu0 %11743, %v13661_v21  }
0x196e   :  { %7071 = vperm.xlu1 %11738, %v6310_v62  }
0x1970   :  { %6204 = vperm.xlu0 %11743, %v6190_v40  }
0x1972   :  { %11739 = vset.pattern.permute.xlu1 %v14329_v48 }
0x1973   :  { %7039 = vperm.xlu1 %11739, %v6312_v51  }
0x1974   :  { %6209 = vperm.xlu0 %11743, %v6191_v60  }
0x1977   :  { %11741 = vset.pattern.permute.xlu1 %v14328_v24 }
0x1978   :  { %7079 = vperm.xlu1 %11741, %v6312_v51   ;;  %11744 = vset.pattern.permute.xlu0 %v14329_v48  ;;  %v44_v51 = vld [vmem:[%s14275_s4 + $0x448] sm:$0xff] }
0x197c   :  { %11742 = vset.pattern.permute.xlu1 %v14337_v28 }
0x197d   :  { %6194 = vperm.xlu1 %11742, %v13591_v2   ;;  %v6318_v2 = vmul.f32 %v13702_v45, %v13702_v45 }
0x1981   :  { %6199 = vperm.xlu1 %11742, %v6189_v39  }
0x19be   :  { %v6075_v41 = vpop.permute.xlu1 %6074 }
0x19c1   :  { %v6070_v63 = vpop.permute.xlu0 %6069 }
0x19c2   :  { %v6080_v8 = vpop.permute.xlu1 %6079 }
0x19c5   :  { %v6085_v5 = vpop.permute.xlu0 %6084 }
0x19f2   :  { %v11164_v22 = vpop.f32.mrf.mxu1  ;;  %v11174_v52 = vpop.f32.mrf.mxu0 }
0x19f4   :  { %v5874_v20 = vpop.f32.mrf.mxu1  ;;  %v5959_v42 = vpop.f32.mrf.mxu0 }
0x19f7   :  { %v11167_v35 = vpop.f32.mrf.mxu1  ;;  %v11177_v33 = vpop.f32.mrf.mxu0 }
0x19f9   :  { %v5884_v0 = vpop.f32.mrf.mxu1  ;;  %v5969_v15 = vpop.f32.mrf.mxu0 }
0x19fb   :  { %v11184_v18 = vpop.f32.mrf.mxu1 }
0x19fd   :  { %v6044_v54 = vpop.f32.mrf.mxu1 }
0x19ff   :  { %v11187_v43 = vpop.f32.mrf.mxu1 }
0x1a00   :  { %11188 = vmatprep.subr.mxu0 %v11187_v43 }
0x1a01   :  { %v6054_v58 = vpop.f32.mrf.mxu1  ;;  %11189 = vmatpush3.msra.mxu0 %v11187_v43 }
0x1a02   :  { %11190 = vmatprep.subr.mxu0 %v6054_v58 }
0x1a03   :  { %11191 = vmatpush3.msra.mxu0 %v6054_v58 }
0x1a04   :  { %11192 = vmatprep.subr.mxu0 %v11184_v18 }
0x1a05   :  { %11193 = vmatpush3.msra.mxu0 %v11184_v18 }
0x1a06   :  { %11194 = vmatprep.subr.mxu0 %v6044_v54 }
0x1a07   :  { %11195 = vmatpush3.msra.mxu0 %v6044_v54 }
0x1a08   :  { %11196 = vmatprep.subr.mxu0 %v11177_v33 }
0x1a09   :  { %11197 = vmatpush3.msra.mxu0 %v11177_v33 }
0x1a0a   :  { %11198 = vmatprep.subr.mxu0 %v5969_v15 }
0x1a0b   :  { %11199 = vmatpush3.msra.mxu0 %v5969_v15 }
0x1a0c   :  { %11200 = vmatprep.subr.mxu0 %v11174_v52 }
0x1a0d   :  { %11201 = vmatpush3.msra.mxu0 %v11174_v52 }
0x1a0e   :  { %11202 = vmatprep.subr.mxu0 %v5959_v42 }
0x1a0f   :  { %11203 = vmatpush3.msra.mxu0 %v5959_v42 }
0x1a10   :  { %11204 = vmatprep.subr.mxu0 %v11167_v35 }
0x1a11   :  { %11205 = vmatpush3.msra.mxu0 %v11167_v35  ;;  %v13740_v35 = vpop.f32.mrf.mxu1 }
0x1a12   :  { %11206 = vmatprep.subr.mxu0 %v5884_v0 }
0x1a13   :  { %11207 = vmatpush3.msra.mxu0 %v5884_v0  ;;  %v13742_v0 = vpop.f32.mrf.mxu1 }
0x1a14   :  { %11208 = vmatprep.subr.mxu0 %v11164_v22 }
0x1a15   :  { %11209 = vmatpush3.msra.mxu0 %v11164_v22  ;;  %v6319_v22 = vmul.f32 %v13705_v50, %v13705_v50  ;;  %v13744_v18 = vpop.f32.mrf.mxu1 }
0x1a16   :  { %11210 = vmatprep.subr.mxu0 %v5874_v20 }
0x1a17   :  { %11211 = vmatpush3.msra.mxu0 %v5874_v20  ;;  %v6320_v20 = vmul.f32 %v13712_v19, %v13712_v19  ;;  %v13746_v52 = vpop.f32.mrf.mxu1 }
0x1a18   :  { %11213 = vmatmul.mubr.msk.f32.vlgmr.msra.gmra.mxu0 %vm3194_vm11, %v6064_v44  ;;  %11268 = vmatprep.subr.mxu0 %v14327_v56 }
0x1a19   :  { %11215 = vmatprep.mubr.msk.f32.mxu0 %vm3194_vm11, %v6065_v12  ;;  %v6317_v12 = vmul.f32 %v13695_v10, %v13695_v10 }
0x1a1c   :  { %11216 = vmatmul.mubr.msk.f32.gmra.mxu0 %vm3194_vm11, %v6066_v1 }
0x1a1d   :  { %11300 = vmatprep.mubr.msk.f32.mxu0 %vm12017_vm2, %v14327_v56 }
0x1ad8   :  { %v11214_v6 = vpop.f32.mrf.mxu0 }
0x1ad9   :  { %v6167_v47 = vadd.f32 %v11214_v6, %v6075_v41 }
0x1ada   :  { %v6161_v9 = vpop.f32.mrf.mxu0 }
0x1adb   :  { %v6162_v53 = vadd.f32 %v6161_v9, %v6070_v63  ;;  %v13672_v13 = vadd.f32 %v6167_v47, %v14339_v30  ;;  %v45_v63 = vld [vmem:[%s14275_s4 + $0x450] sm:$0xff] }
0x1adc   :  { %v11217_v4 = vpop.f32.mrf.mxu0 }
0x1add   :  { %v13669_v3 = vadd.f32 %v6162_v53, %v14338_v38  ;;  %v6177_v32 = vadd.f32 %v11217_v4, %v6085_v5 }
0x1ade   :  { %v6171_v34 = vpop.f32.mrf.mxu0 }
0x1adf   :  { %v6172_v49 = vadd.f32 %v6171_v34, %v6080_v8  ;;  %11244 = vmatprep.mubr.msk.f32.mxu1 %vm111_vm0, %v13669_v3  ;;  %v13689_v7 = vadd.f32 %v6177_v32, %v13276_v36  ;;  %v6313_v44 = vmul.f32 %v13669_v3, %v13669_v3 }
0x1ae0   :  { %11245 = vmatmul.mubr.msk.f32.vlgmr.msra.gmra.mxu1 %vm111_vm0, %v13672_v13 }
0x1ae1   :  { %v13679_v16 = vadd.f32 %v6172_v49, %v13266_v11  ;;  %11330 = vmatpush3.msk.msra.mxu1 %vm1120_vm3, %v13684_v37  ;;  %v6314_v11 = vmul.f32 %v13672_v13, %v13672_v13  ;;  %v6316_v36 = vmul.f32 %v13689_v7, %v13689_v7  ;;  %v46_v49 = vld [vmem:[%s14275_s4 + $0x458] sm:$0xff] }
0x1ae2   :  { %11371 = vmatprep.subr.mxu1 %v12897_v23 }
0x1ae3   :  { %11247 = vmatprep.mubr.msk.f32.mxu1 %vm111_vm0, %v13679_v16  ;;  %v6315_v1 = vmul.f32 %v13679_v16, %v13679_v16 }
0x1ae4   :  { %11248 = vmatmul.mubr.msk.f32.gmra.mxu1 %vm111_vm0, %v13689_v7 }
0x1ae5   :  { %11250 = vmatprep.mubr.msk.f32.mxu1 %vm111_vm0, %v13695_v10 }
0x1ae8   :  { %11251 = vmatmul.mubr.msk.f32.gmra.mxu1 %vm111_vm0, %v13702_v45 }
0x1ae9   :  { %11253 = vmatprep.mubr.msk.f32.mxu1 %vm111_vm0, %v13705_v50 }
0x1aec   :  { %11254 = vmatmul.mubr.msk.f32.gmra.mxu1 %vm111_vm0, %v13712_v19 }
0x1aed   :  { %11256 = vmatprep.mubr.msk.f32.mxu1 %vm111_vm0, %v6313_v44  ;;  %v47_v44 = vld [vmem:[%s14275_s4 + $0x460] sm:$0xff] }
0x1af0   :  { %11257 = vmatmul.mubr.msk.f32.gmra.mxu1 %vm111_vm0, %v6314_v11  ;;  %v13781_v11 = vld [vmem:[%s14275_s4 + $0x3d0] sm:$0xff] }
0x1af1   :  { %11259 = vmatprep.mubr.msk.f32.mxu1 %vm111_vm0, %v6315_v1  ;;  %v48_v1 = vld [vmem:[%s14275_s4 + $0x468] sm:$0xff] }
0x1af4   :  { %11260 = vmatmul.mubr.msk.f32.gmra.mxu1 %vm111_vm0, %v6316_v36  ;;  %v13792_v36 = vld [vmem:[%s14275_s4 + $0x3c8] sm:$0xff] }
0x1af5   :  { %11262 = vmatprep.mubr.msk.f32.mxu1 %vm111_vm0, %v6317_v12  ;;  %v49_v12 = vld [vmem:[%s14275_s4 + $0x470] sm:$0xff] }
0x1af8   :  { %11263 = vmatmul.mubr.msk.f32.gmra.mxu1 %vm111_vm0, %v6318_v2  ;;  %v50_v2 = vld [vmem:[%s14275_s4 + $0x478] sm:$0xff] }
0x1af9   :  { %11265 = vmatprep.mubr.msk.f32.mxu1 %vm111_vm0, %v6319_v22  ;;  %v51_v22 = vld [vmem:[%s14275_s4 + $0x480] sm:$0xff] }
0x1afc   :  { %11266 = vmatmul.mubr.msk.f32.gmra.mxu1 %vm111_vm0, %v6320_v20  ;;  %v52_v20 = vld [vmem:[%s14275_s4 + $0x488] sm:$0xff] }
0x1ba0   :  { %v11246_v54 = vpop.f32.mrf.mxu1 }
0x1ba2   :  { %v6435_v43 = vpop.f32.mrf.mxu1 }
0x1ba4   :  { %v11249_v42 = vpop.f32.mrf.mxu1 }
0x1ba6   :  { %v6445_v58 = vpop.f32.mrf.mxu1 }
0x1ba8   :  { %v11252_v33 = vpop.f32.mrf.mxu1 }
0x1baa   :  { %v6455_v15 = vpop.f32.mrf.mxu1 }
0x1bac   :  { %v11255_v39 = vpop.f32.mrf.mxu1 }
0x1bae   :  { %v6465_v40 = vpop.f32.mrf.mxu1 }
0x1bb0   :  { %v11258_v60 = vpop.f32.mrf.mxu1 }
0x1bb2   :  { %v6475_v46 = vpop.f32.mrf.mxu1 }
0x1bb4   :  { %v11261_v31 = vpop.f32.mrf.mxu1 }
0x1bb6   :  { %v6485_v14 = vpop.f32.mrf.mxu1 }
0x1bb8   :  { %v11264_v29 = vpop.f32.mrf.mxu1 }
0x1bba   :  { %v6495_v57 = vpop.f32.mrf.mxu1 }
0x1bbc   :  { %v11267_v62 = vpop.f32.mrf.mxu1 }
0x1bbd   :  { %11269 = vmatpush3.msra.mxu0 %v11267_v62 }
0x1bbe   :  { %v6505_v59 = vpop.f32.mrf.mxu1  ;;  %11270 = vmatprep.subr.mxu0 %v14327_v56 }
0x1bbf   :  { %11271 = vmatpush3.msra.mxu0 %v6505_v59 }
0x1bc0   :  { %11272 = vmatprep.subr.mxu0 %v14327_v56 }
0x1bc1   :  { %11273 = vmatpush3.msra.mxu0 %v11264_v29 }
0x1bc2   :  { %11274 = vmatprep.subr.mxu0 %v14327_v56 }
0x1bc3   :  { %11275 = vmatpush3.msra.mxu0 %v6495_v57 }
0x1bc4   :  { %11276 = vmatprep.subr.mxu0 %v14327_v56 }
0x1bc5   :  { %11277 = vmatpush3.msra.mxu0 %v11261_v31 }
0x1bc6   :  { %11278 = vmatprep.subr.mxu0 %v14327_v56 }
0x1bc7   :  { %11279 = vmatpush3.msra.mxu0 %v6485_v14 }
0x1bc8   :  { %11280 = vmatprep.subr.mxu0 %v14327_v56 }
0x1bc9   :  { %11281 = vmatpush3.msra.mxu0 %v11258_v60 }
0x1bca   :  { %11282 = vmatprep.subr.mxu0 %v14327_v56 }
0x1bcb   :  { %11283 = vmatpush3.msra.mxu0 %v6475_v46 }
0x1bcc   :  { %11284 = vmatprep.subr.mxu0 %v14327_v56 }
0x1bcd   :  { %11285 = vmatpush3.msra.mxu0 %v11255_v39  ;;  %v59_v39 = vld [vmem:[%s14275_s4 + $0x4c0] sm:$0xff] }
0x1bce   :  { %11286 = vmatprep.subr.mxu0 %v14327_v56 }
0x1bcf   :  { %11287 = vmatpush3.msra.mxu0 %v6465_v40  ;;  %v60_v40 = vld [vmem:[%s14275_s4 + $0x4c8] sm:$0xff] }
0x1bd0   :  { %11288 = vmatprep.subr.mxu0 %v14327_v56 }
0x1bd1   :  { %11289 = vmatpush3.msra.mxu0 %v11252_v33  ;;  %v57_v33 = vld [vmem:[%s14275_s4 + $0x4b0] sm:$0xff] }
0x1bd2   :  { %11290 = vmatprep.subr.mxu0 %v14327_v56 }
0x1bd3   :  { %11291 = vmatpush3.msra.mxu0 %v6455_v15  ;;  %v58_v15 = vld [vmem:[%s14275_s4 + $0x4b8] sm:$0xff] }
0x1bd4   :  { %11292 = vmatprep.subr.mxu0 %v14327_v56 }
0x1bd5   :  { %11293 = vmatpush3.msra.mxu0 %v11249_v42  ;;  %v55_v42 = vld [vmem:[%s14275_s4 + $0x4a0] sm:$0xff] }
0x1bd6   :  { %11294 = vmatprep.subr.mxu0 %v14327_v56 }
0x1bd7   :  { %11295 = vmatpush3.msra.mxu0 %v6445_v58  ;;  %v56_v58 = vld [vmem:[%s14275_s4 + $0x4a8] sm:$0xff] }
0x1bd8   :  { %11296 = vmatprep.subr.mxu0 %v14327_v56 }
0x1bd9   :  { %11297 = vmatpush3.msra.mxu0 %v11246_v54  ;;  %v53_v54 = vld [vmem:[%s14275_s4 + $0x490] sm:$0xff] }
0x1bda   :  { %11298 = vmatprep.subr.mxu0 %v14327_v56 }
0x1bdb   :  { %11299 = vmatpush3.msra.mxu0 %v6435_v43  ;;  %v54_v43 = vld [vmem:[%s14275_s4 + $0x498] sm:$0xff] }
0x1bdc   :  { %11301 = vmatmul.mubr.f32.vlgmr.msra.gmra.mxu0 %v44_v51 }
0x1bdd   :  { %11305 = vmatprep.mubr.msk.f32.mxu0 %vm2550_vm10, %v45_v63 }
0x1c9c   :  { %v6580_v41 = vpop.f32.mrf.mxu0 }
0x1c9d   :  { %v6584_v6 = vmul.f32 %v6580_v41, %v6580_v41  ;;  %v6591_v5 = vsub.f32 0.0, %v6580_v41 }
0x1c9e   :  { %v11302_v47 = vpop.f32.mrf.mxu0 }
0x1c9f   :  { %v6586_v9 = vrot.slane %v6584_v6, 4 }
0x1ca1   :  { %v6588_v53 = vsub.f32 %v6580_v41, %v6586_v9 }
0x1ca3   :  { %v6589_v4 = vadd.f32 1e-05, %v6588_v53 }
0x1ca5   :  { %11927 = vrsqrt.f32 %v6589_v4 }
0x1cb2   :  { %v11928_v38 = vpop.eup %11927 }
0x1cb3   :  { %v6593_v30 = vrot.slane %v11928_v38, 4  ;;  %v7005_v38 = vpop.permute.xlu1 %7004 }
0x1cb5   :  { %v6595_v32 = vmul.f32 %v6593_v30, %v6591_v5 }
0x1cb7   :  { %v6597_v8 = vrot.slane %v6595_v32, 4  ;;  %v7052_v5 = vpop.permute.xlu1 %7051 }
0x1cb9   :  { %v6599_v34 = vsel %vm1309_vm4, %v6593_v30, %v6597_v8 }
0x1cba   :  { %11303 = vmatprep.subr.mxu0 %v6599_v34 }
0x1cbb   :  { %11304 = vmatpush3.msra.mxu0 %v6599_v34  ;;  %v7056_v30 = vpop.permute.xlu1 %7055 }
0x1cbc   :  { %11306 = vmatmul.mubr.msk.f32.vlgmr.msra.gmra.mxu0 %vm2550_vm10, %v46_v49  ;;  %11355 = vmatprep.subr.mxu0 %v13781_v11 }
0x1cbd   :  { %11356 = vmatpush3.msra.mxu0 %v13781_v11  ;;  %11308 = vmatprep.mubr.msk.f32.mxu0 %vm2550_vm10, %v47_v44  ;;  %v7060_v44 = vpop.permute.xlu0 %7059 }
0x1cbe   :  { %11357 = vmatprep.subr.mxu0 %v13792_v36 }
0x1cbf   :  { %11358 = vmatpush3.msra.mxu0 %v13792_v36  ;;  %v7020_v32 = vpop.permute.xlu1 %7019 }
0x1cc0   :  { %11309 = vmatmul.mubr.msk.f32.gmra.mxu0 %vm2550_vm10, %v48_v1  ;;  %11387 = vmatprep.subr.mxu0 %v12879_v27 }
0x1cc1   :  { %11311 = vmatprep.mubr.msk.f32.mxu0 %vm2550_vm10, %v49_v12 }
0x1cc3   :  { %v7064_v34 = vpop.permute.xlu1 %7063 }
0x1cc4   :  { %11312 = vmatmul.mubr.msk.f32.gmra.mxu0 %vm2550_vm10, %v50_v2 }
0x1cc5   :  { %11314 = vmatprep.mubr.msk.f32.mxu0 %vm2550_vm10, %v51_v22 }
0x1cc7   :  { %v7025_v2 = vpop.permute.xlu1 %7024 }
0x1cc8   :  { %11315 = vmatmul.mubr.msk.f32.gmra.mxu0 %vm2550_vm10, %v52_v20  ;;  %v7010_v20 = vpop.permute.xlu0 %7009 }
0x1cc9   :  { %11317 = vmatprep.mubr.msk.f32.mxu0 %vm2550_vm10, %v53_v54 }
0x1ccc   :  { %11318 = vmatmul.mubr.msk.f32.gmra.mxu0 %vm2550_vm10, %v54_v43 }
0x1ccd   :  { %11320 = vmatprep.mubr.msk.f32.mxu0 %vm2550_vm10, %v55_v42  ;;  %v7068_v42 = vpop.permute.xlu1 %7067 }
0x1cd0   :  { %11321 = vmatmul.mubr.msk.f32.gmra.mxu0 %vm2550_vm10, %v56_v58 }
0x1cd1   :  { %11323 = vmatprep.mubr.msk.f32.mxu0 %vm2550_vm10, %v57_v33 }
0x1cd4   :  { %11324 = vmatmul.mubr.msk.f32.gmra.mxu0 %vm2550_vm10, %v58_v15  ;;  %v7015_v15 = vpop.permute.xlu0 %7014 }
0x1cd5   :  { %11326 = vmatprep.mubr.msk.f32.mxu0 %vm2550_vm10, %v59_v39 }
0x1cd8   :  { %11327 = vmatmul.mubr.msk.f32.gmra.mxu0 %vm2550_vm10, %v60_v40 }
0x1d7c   :  { %v11307_v60 = vpop.f32.mrf.mxu0 }
0x1d7e   :  { %v6714_v46 = vpop.f32.mrf.mxu0 }
0x1d7f   :  { %11331 = vmatprep.mubr.msk.f32.mxu1 %vm1095_vm6, %v6714_v46 }
0x1d80   :  { %v11310_v31 = vpop.f32.mrf.mxu0  ;;  %11332 = vmatmul.mubr.msk.f32.vlgmr.msra.gmra.mxu1 %vm1095_vm6, %v11307_v60 }
0x1d81   :  { %11372 = vmatpush3.msra.mxu1 %v12897_v23 }
0x1d82   :  { %11373 = vmatprep.subr.mxu1 %v12968_v17  ;;  %v6724_v14 = vpop.f32.mrf.mxu0 }
0x1d83   :  { %11374 = vmatpush3.msra.mxu1 %v12968_v17  ;;  %11334 = vmatprep.mubr.msk.f32.mxu1 %vm1095_vm6, %v6724_v14 }
0x1d84   :  { %v11313_v29 = vpop.f32.mrf.mxu0  ;;  %11335 = vmatmul.mubr.msk.f32.gmra.mxu1 %vm1095_vm6, %v11310_v31  ;;  %7521 = vmatprep.subr.mxu1 %v14327_v56 }
0x1d86   :  { %v6734_v57 = vpop.f32.mrf.mxu0 }
0x1d87   :  { %11337 = vmatprep.mubr.msk.f32.mxu1 %vm1095_vm6, %v6734_v57  ;;  %v7072_v57 = vpop.permute.xlu1 %7071 }
0x1d88   :  { %v11316_v62 = vpop.f32.mrf.mxu0  ;;  %11338 = vmatmul.mubr.msk.f32.gmra.mxu1 %vm1095_vm6, %v11313_v29 }
0x1d8a   :  { %v6744_v59 = vpop.f32.mrf.mxu0 }
0x1d8b   :  { %11340 = vmatprep.mubr.msk.f32.mxu1 %vm1095_vm6, %v6744_v59 }
0x1d8c   :  { %v11319_v51 = vpop.f32.mrf.mxu0  ;;  %11341 = vmatmul.mubr.msk.f32.gmra.mxu1 %vm1095_vm6, %v11316_v62 }
0x1d8e   :  { %v6754_v63 = vpop.f32.mrf.mxu0 }
0x1d8f   :  { %11343 = vmatprep.mubr.msk.f32.mxu1 %vm1095_vm6, %v6754_v63 }
0x1d90   :  { %v11322_v41 = vpop.f32.mrf.mxu0  ;;  %11344 = vmatmul.mubr.msk.f32.gmra.mxu1 %vm1095_vm6, %v11319_v51 }
0x1d92   :  { %v6764_v6 = vpop.f32.mrf.mxu0 }
0x1d93   :  { %11346 = vmatprep.mubr.msk.f32.mxu1 %vm1095_vm6, %v6764_v6  ;;  %v7030_v6 = vpop.permute.xlu0 %7029 }
0x1d94   :  { %v11325_v47 = vpop.f32.mrf.mxu0  ;;  %11347 = vmatmul.mubr.msk.f32.gmra.mxu1 %vm1095_vm6, %v11322_v41 }
0x1d96   :  { %v6774_v9 = vpop.f32.mrf.mxu0 }
0x1d97   :  { %11349 = vmatprep.mubr.msk.f32.mxu1 %vm1095_vm6, %v6774_v9 }
0x1d98   :  { %v11328_v53 = vpop.f32.mrf.mxu0  ;;  %11350 = vmatmul.mubr.msk.f32.gmra.mxu1 %vm1095_vm6, %v11325_v47 }
0x1d9a   :  { %v6784_v4 = vpop.f32.mrf.mxu0 }
0x1d9b   :  { %11352 = vmatprep.mubr.msk.f32.mxu1 %vm1095_vm6, %v6784_v4 }
0x1d9c   :  { %11353 = vmatmul.mubr.msk.f32.gmra.mxu1 %vm1095_vm6, %v11328_v53 }
0x1e40   :  { %v11333_v8 = vpop.f32.mrf.mxu1 }
0x1e41   :  { %v6987_v33 = vmul.f32 %v11333_v8, %v13672_v13 }
0x1e42   :  { %v6907_v49 = vpop.f32.mrf.mxu1 }
0x1e43   :  { %v6986_v40 = vmul.f32 %v6907_v49, %v13669_v3 }
0x1e44   :  { %v11336_v1 = vpop.f32.mrf.mxu1 }
0x1e45   :  { %v6989_v31 = vmul.f32 %v11336_v1, %v13689_v7 }
0x1e46   :  { %v6917_v12 = vpop.f32.mrf.mxu1 }
0x1e47   :  { %v6988_v59 = vmul.f32 %v6917_v12, %v13679_v16 }
0x1e48   :  { %v11339_v22 = vpop.f32.mrf.mxu1 }
0x1e49   :  { %v6991_v49 = vmul.f32 %v11339_v22, %v13702_v45 }
0x1e4a   :  { %v6927_v54 = vpop.f32.mrf.mxu1 }
0x1e4b   :  { %v6990_v1 = vmul.f32 %v6927_v54, %v13695_v10 }
0x1e4c   :  { %v11342_v43 = vpop.f32.mrf.mxu1 }
0x1e4e   :  { %v6937_v58 = vpop.f32.mrf.mxu1 }
0x1e4f   :  { %v6992_v54 = vmul.f32 %v6937_v58, %v13705_v50 }
0x1e50   :  { %v11345_v39 = vpop.f32.mrf.mxu1 }
0x1e51   :  { %v6995_v60 = vadd.f32 %v11345_v39, %v6987_v33  ;;  %v7040_v33 = vpop.permute.xlu1 %7039  ;;  %v6993_v39 = vmul.f32 %v11342_v43, %v13712_v19 }
0x1e52   :  { %v6947_v46 = vpop.f32.mrf.mxu1 }
0x1e53   :  { %v7043_v14 = vmul.f32 %v7010_v20, %v6995_v60  ;;  %v6994_v29 = vadd.f32 %v6986_v40, %v6947_v46  ;;  %v7035_v46 = vpop.permute.xlu0 %7034 }
0x1e54   :  { %v11348_v62 = vpop.f32.mrf.mxu1 }
0x1e55   :  { %v13870_v51 = vadd.f32 %v7056_v30, %v7043_v14  ;;  %v7042_v63 = vmul.f32 %v7005_v38, %v6994_v29  ;;  %v6997_v41 = vadd.f32 %v11348_v62, %v6989_v31 }
0x1e56   :  { %v6957_v47 = vpop.f32.mrf.mxu1 }
0x1e57   :  { %v9657_v9 = vmul.f32 -1.442695, %v13870_v51  ;;  %v13873_v53 = vadd.f32 %v7052_v5, %v7042_v63  ;;  %v7045_v4 = vmul.f32 %v7020_v32, %v6997_v41  ;;  %v6996_v8 = vadd.f32 %v6988_v59, %v6957_v47 }
0x1e58   :  { %v11351_v20 = vpop.f32.mrf.mxu1 }
0x1e59   :  { %11929 = vpow2.f32 %v9657_v9  ;;  %v9656_v12 = vmul.f32 -1.442695, %v13873_v53  ;;  %v13878_v30 = vadd.f32 %v7064_v34, %v7045_v4  ;;  %v7044_v38 = vmul.f32 %v7015_v15, %v6996_v8 }
0x1e5a   :  { %v6999_v40 = vadd.f32 %v11351_v20, %v6991_v49  ;;  %v6967_v60 = vpop.f32.mrf.mxu1 }
0x1e5b   :  { %11931 = vpow2.f32 %v9656_v12  ;;  %v9659_v5 = vmul.f32 -1.442695, %v13878_v30  ;;  %v13882_v32 = vadd.f32 %v7060_v44, %v7044_v38  ;;  %v6998_v22 = vadd.f32 %v6990_v1, %v6967_v60  ;;  %v7080_v44 = vpop.permute.xlu1 %7079 }
0x1e5c   :  { %v7047_v31 = vmul.f32 %v7030_v6, %v6999_v40  ;;  %v11354_v14 = vpop.f32.mrf.mxu1  ;;  %v7076_v6 = vpop.permute.xlu0 %7075 }
0x1e5d   :  { %11933 = vpow2.f32 %v9659_v5  ;;  %v9658_v34 = vmul.f32 -1.442695, %v13882_v32  ;;  %v7046_v15 = vmul.f32 %v7025_v2, %v6998_v22  ;;  %v7001_v29 = vadd.f32 %v11354_v14, %v6993_v39 }
0x1e5e   :  { %v13886_v62 = vadd.f32 %v7072_v57, %v7047_v31  ;;  %v6977_v43 = vpop.f32.mrf.mxu1 }
0x1e5f   :  { %11935 = vpow2.f32 %v9658_v34  ;;  %v7086_v59 = vadd.f32 %v7068_v42, %v7046_v15  ;;  %v7049_v63 = vmul.f32 %v7040_v33, %v7001_v29  ;;  %v7000_v41 = vadd.f32 %v6992_v54, %v6977_v43 }
0x1e60   :  { %v9661_v47 = vmul.f32 -1.442695, %v13886_v62 }
0x1e61   :  { %v9660_v9 = vmul.f32 -1.442695, %v7086_v59  ;;  %v13889_v4 = vadd.f32 %v7080_v44, %v7049_v63  ;;  %v7048_v58 = vmul.f32 %v7035_v46, %v7000_v41 }
0x1e62   :  { %11937 = vpow2.f32 %v9661_v47 }
0x1e63   :  { %11939 = vpow2.f32 %v9660_v9  ;;  %v9663_v2 = vmul.f32 -1.442695, %v13889_v4  ;;  %v7088_v8 = vadd.f32 %v7076_v6, %v7048_v58 }
0x1e65   :  { %11941 = vpow2.f32 %v9663_v2  ;;  %v9662_v57 = vmul.f32 -1.442695, %v7088_v8 }
0x1e66   :  { %v11930_v49 = vpop.eup %11929 }
0x1e67   :  { %v7115_v1 = vadd.f32 1.0, %v11930_v49  ;;  %11943 = vpow2.f32 %v9662_v57 }
0x1e68   :  { %v11932_v42 = vpop.eup %11931 }
0x1e69   :  { %v7114_v20 = vadd.f32 1.0, %v11932_v42  ;;  %11945 = vrcp.f32 %v7115_v1 }
0x1e6a   :  { %v11934_v12 = vpop.eup %11933 }
0x1e6b   :  { %11947 = vrcp.f32 %v7114_v20  ;;  %v7117_v38 = vadd.f32 1.0, %v11934_v12 }
0x1e6c   :  { %v11936_v33 = vpop.eup %11935 }
0x1e6d   :  { %v7116_v39 = vadd.f32 1.0, %v11936_v33  ;;  %11949 = vrcp.f32 %v7117_v38 }
0x1e6f   :  { %v11938_v40 = vpop.eup %11937  ;;  %11951 = vrcp.f32 %v7116_v39 }
0x1e70   :  { %v11940_v60 = vpop.eup %11939  ;;  %v7119_v5 = vadd.f32 1.0, %v11938_v40 }
0x1e71   :  { %v7118_v22 = vadd.f32 1.0, %v11940_v60 }
0x1e72   :  { %v11942_v46 = vpop.eup %11941  ;;  %11953 = vrcp.f32 %v7119_v5 }
0x1e73   :  { %11955 = vrcp.f32 %v7118_v22  ;;  %v7121_v54 = vadd.f32 1.0, %v11942_v46 }
0x1e74   :  { %v11944_v31 = vpop.eup %11943 }
0x1e75   :  { %v7120_v14 = vadd.f32 1.0, %v11944_v31  ;;  %11957 = vrcp.f32 %v7121_v54 }
0x1e76   :  { %v11946_v34 = vpop.eup %11945 }
0x1e77   :  { %11959 = vrcp.f32 %v7120_v14  ;;  %v7139_v43 = vmul.f32 %v11946_v34, %v13870_v51 }
0x1e78   :  { %v11948_v15 = vpop.eup %11947 }
0x1e79   :  { %v7138_v29 = vmul.f32 %v11948_v15, %v13873_v53 }
0x1e7a   :  { %v11950_v63 = vpop.eup %11949 }
0x1e7b   :  { %11359 = vmatprep.mubr.msk.f32.mxu0 %vm111_vm0, %v7138_v29  ;;  %11375 = vmatprep.mubr.msk.f32.mxu1 %vm111_vm0, %v7138_v29  ;;  %v7141_v47 = vmul.f32 %v11950_v63, %v13878_v30  ;;  %v7486_v63 = vld [vmem:[%s14275_s4 + $0x2d0] sm:$0xff] }
0x1e7c   :  { %v11952_v41 = vpop.eup %11951  ;;  %11360 = vmatmul.mubr.msk.f32.vlgmr.msra.gmra.mxu0 %vm111_vm0, %v7139_v43  ;;  %11376 = vmatmul.mubr.msk.f32.vlgmr.msra.gmra.mxu1 %vm111_vm0, %v7139_v43 }
0x1e7d   :  { %v7140_v44 = vmul.f32 %v11952_v41, %v13882_v32  ;;  %11388 = vmatpush3.msra.mxu0 %v12879_v27  ;;  %v7487_v41 = vld [vmem:[%s14275_s4 + $0x2d8] sm:$0xff] }
0x1e7e   :  { %11389 = vmatprep.subr.mxu0 %v12964_v61 }
0x1e7f   :  { %v11954_v53 = vpop.eup %11953  ;;  %11390 = vmatpush3.msra.mxu0 %v12964_v61  ;;  %11362 = vmatprep.mubr.msk.f32.mxu0 %vm111_vm0, %v7140_v44 }
0x1e80   :  { %v11956_v51 = vpop.eup %11955  ;;  %11378 = vmatprep.mubr.msk.f32.mxu1 %vm111_vm0, %v7140_v44  ;;  %11363 = vmatmul.mubr.msk.f32.gmra.mxu0 %vm111_vm0, %v7141_v47  ;;  %v7143_v32 = vmul.f32 %v11954_v53, %v13886_v62  ;;  %v7496_v53 = vpop.permute.xlu0 %7495 }
0x1e81   :  { %v7142_v9 = vmul.f32 %v11956_v51, %v7086_v59  ;;  %11379 = vmatmul.mubr.msk.f32.gmra.mxu1 %vm111_vm0, %v7141_v47  ;;  %11403 = vmatprep.subr.mxu0 %v13572_v25 }
0x1e82   :  { %v11958_v30 = vpop.eup %11957 }
0x1e83   :  { %11365 = vmatprep.mubr.msk.f32.mxu0 %vm111_vm0, %v7142_v9  ;;  %11381 = vmatprep.mubr.msk.f32.mxu1 %vm111_vm0, %v7142_v9  ;;  %v7145_v2 = vmul.f32 %v11958_v30, %v13889_v4 }
0x1e84   :  { %v11960_v58 = vpop.eup %11959  ;;  %11366 = vmatmul.mubr.msk.f32.gmra.mxu0 %vm111_vm0, %v7143_v32 }
0x1e85   :  { %v7144_v6 = vmul.f32 %v11960_v58, %v7088_v8  ;;  %11382 = vmatmul.mubr.msk.f32.gmra.mxu1 %vm111_vm0, %v7143_v32 }
0x1e87   :  { %11368 = vmatprep.mubr.msk.f32.mxu0 %vm111_vm0, %v7144_v6  ;;  %11384 = vmatprep.mubr.msk.f32.mxu1 %vm111_vm0, %v7144_v6 }
0x1e88   :  { %11369 = vmatmul.mubr.msk.f32.gmra.mxu0 %vm111_vm0, %v7145_v2 }
0x1e89   :  { %11385 = vmatmul.mubr.msk.f32.gmra.mxu1 %vm111_vm0, %v7145_v2  ;;  %11391 = vmatprep.mubr.msk.f32.mxu0 %vm111_vm0, %v7138_v29 }
0x1e8a   :  { %9688 = vmatprep.mubr.msk.f32.mxu1 %vm604_vm1, %v13661_v21  ;;  %v13947_v21 = vld [vmem:[%s14275_s4 + $0x300] sm:$0xff] }
0x1e8c   :  { %11392 = vmatmul.mubr.msk.f32.vlgmr.msra.gmra.mxu0 %vm111_vm0, %v7139_v43  ;;  %v7485_v43 = vld [vmem:[%s14275_s4 + $0x2c8] sm:$0xff] }
0x1e8d   :  { %11394 = vmatprep.mubr.msk.f32.mxu0 %vm111_vm0, %v7140_v44  ;;  %11404 = vmatpush3.msra.mxu0 %v13572_v25  ;;  %v13935_v25 = vld [vmem:[%s14275_s4 + $0x2f0] sm:$0xff]  ;;  %v6195_v44 = vpop.permute.xlu1 %6194 }
0x1e8e   :  { %11405 = vmatprep.subr.mxu0 %v13614_v55  ;;  %7500 = vperm.xlu1 %11742, %v13935_v25  }
0x1e8f   :  { %11406 = vmatpush3.msra.mxu0 %v13614_v55  ;;  %v13941_v55 = vld [vmem:[%s14275_s4 + $0x2f8] sm:$0xff] }
0x1e90   :  { %11395 = vmatmul.mubr.msk.f32.gmra.mxu0 %vm111_vm0, %v7141_v47  ;;  %11419 = vmatprep.subr.mxu0 %v14327_v56 }
0x1e91   :  { %11397 = vmatprep.mubr.msk.f32.mxu0 %vm111_vm0, %v7142_v9  ;;  %v6200_v47 = vpop.permute.xlu1 %6199 }
0x1e92   :  { %7505 = vperm.xlu1 %11742, %v13941_v55  }
0x1e94   :  { %11398 = vmatmul.mubr.msk.f32.gmra.mxu0 %vm111_vm0, %v7143_v32  ;;  %v6287_v32 = vadd.f32 %v13742_v0, %v6195_v44 }
0x1e95   :  { %11400 = vmatprep.mubr.msk.f32.mxu0 %vm111_vm0, %v7144_v6 }
0x1e96   :  { %7510 = vperm.xlu1 %11742, %v13947_v21  }
0x1e98   :  { %11401 = vmatmul.mubr.msk.f32.gmra.mxu0 %vm111_vm0, %v7145_v2  ;;  %v6205_v2 = vpop.permute.xlu0 %6204 }
0x1e9a   :  { %11745 = vset.pattern.permute.xlu1 %v14329_v48 }
0x1f09   :  { %v7501_v51 = vpop.permute.xlu1 %7500 }
0x1f3c   :  { %v11361_v62 = vpop.f32.mrf.mxu0  ;;  %v11377_v59 = vpop.f32.mrf.mxu1 }
0x1f3e   :  { %v7236_v4 = vpop.f32.mrf.mxu0  ;;  %v7341_v8 = vpop.f32.mrf.mxu1 }
0x1f40   :  { %v11364_v57 = vpop.f32.mrf.mxu0 }
0x1f41   :  { %v11380_v49 = vpop.f32.mrf.mxu1 }
0x1f42   :  { %v7246_v1 = vpop.f32.mrf.mxu0 }
0x1f43   :  { %v7351_v42 = vpop.f32.mrf.mxu1 }
0x1f44   :  { %v11367_v20 = vpop.f32.mrf.mxu0 }
0x1f45   :  { %v11383_v12 = vpop.f32.mrf.mxu1 }
0x1f46   :  { %v7256_v38 = vpop.f32.mrf.mxu0 }
0x1f47   :  { %v7361_v33 = vpop.f32.mrf.mxu1 }
0x1f48   :  { %v11370_v39 = vpop.f32.mrf.mxu0 }
0x1f49   :  { %v11386_v40 = vpop.f32.mrf.mxu1 }
0x1f4a   :  { %7522 = vmatpush1.msra.mxu1 %v11386_v40  ;;  %v7266_v60 = vpop.f32.mrf.mxu0 }
0x1f4b   :  { %v7371_v5 = vpop.f32.mrf.mxu1  ;;  %7523 = vmatprep.subr.mxu1 %v14327_v56 }
0x1f4c   :  { %7524 = vmatpush1.msra.mxu1 %v7371_v5  ;;  %v11393_v22 = vpop.f32.mrf.mxu0 }
0x1f4d   :  { %7525 = vmatprep.subr.mxu1 %v14327_v56 }
0x1f4e   :  { %7526 = vmatpush1.msra.mxu1 %v11383_v12  ;;  %v7446_v46 = vpop.f32.mrf.mxu0 }
0x1f4f   :  { %7527 = vmatprep.subr.mxu1 %v14327_v56 }
0x1f50   :  { %7528 = vmatpush1.msra.mxu1 %v7361_v33  ;;  %v11396_v54 = vpop.f32.mrf.mxu0 }
0x1f51   :  { %7529 = vmatprep.subr.mxu1 %v14327_v56 }
0x1f52   :  { %7530 = vmatpush1.msra.mxu1 %v11380_v49  ;;  %v7456_v31 = vpop.f32.mrf.mxu0  ;;  %v6210_v49 = vpop.permute.xlu0 %6209 }
0x1f53   :  { %7531 = vmatprep.subr.mxu1 %v14327_v56  ;;  %v6302_v12 = vadd.f32 %v13744_v18, %v6210_v49  ;;  %v7613_v49 = vld [vmem:[%s14275_s4 + $0x340] sm:$0xff] }
0x1f54   :  { %7532 = vmatpush1.msra.mxu1 %v7351_v42  ;;  %v11399_v14 = vpop.f32.mrf.mxu0 }
0x1f55   :  { %7533 = vmatprep.subr.mxu1 %v14327_v56 }
0x1f56   :  { %7534 = vmatpush1.msra.mxu1 %v11377_v59  ;;  %v7466_v34 = vpop.f32.mrf.mxu0 }
0x1f57   :  { %7535 = vmatprep.subr.mxu1 %v14327_v56 }
0x1f58   :  { %7536 = vmatpush1.msra.mxu1 %v7341_v8  ;;  %v11402_v15 = vpop.f32.mrf.mxu0 }
0x1f59   :  { %7537 = vmatprep.subr.mxu1 %v14327_v56 }
0x1f5a   :  { %7538 = vmatpush1.msra.mxu1 %v11370_v39  ;;  %v7476_v29 = vpop.f32.mrf.mxu0 }
0x1f5b   :  { %7539 = vmatprep.subr.mxu1 %v14327_v56 }
0x1f5c   :  { %7540 = vmatpush1.msra.mxu1 %v7266_v60 }
0x1f5d   :  { %7541 = vmatprep.subr.mxu1 %v14327_v56 }
0x1f5e   :  { %7542 = vmatpush1.msra.mxu1 %v11367_v20 }
0x1f5f   :  { %7543 = vmatprep.subr.mxu1 %v14327_v56 }
0x1f60   :  { %7544 = vmatpush1.msra.mxu1 %v7256_v38 }
0x1f61   :  { %7545 = vmatprep.subr.mxu1 %v14327_v56 }
0x1f62   :  { %7546 = vmatpush1.msra.mxu1 %v11364_v57  ;;  %v6297_v57 = vadd.f32 %v13746_v52, %v6205_v2 }
0x1f63   :  { %7547 = vmatprep.subr.mxu1 %v14327_v56 }
0x1f64   :  { %7548 = vmatpush1.msra.mxu1 %v7246_v1 }
0x1f65   :  { %7549 = vmatprep.subr.mxu1 %v14327_v56 }
0x1f66   :  { %7550 = vmatpush1.msra.mxu1 %v11361_v62  ;;  %v7506_v62 = vpop.permute.xlu1 %7505 }
0x1f67   :  { %7551 = vmatprep.subr.mxu1 %v14327_v56 }
0x1f68   :  { %7552 = vmatpush1.msra.mxu1 %v7236_v4 }
0x1f69   :  { %7569 = vmatprep.subr.mxu1 %v14327_v56 }
0x1f6a   :  { %7570 = vmatpush2.msra.mxu1 %v11402_v15 }
0x1f6b   :  { %7571 = vmatprep.subr.mxu1 %v14327_v56 }
0x1f6c   :  { %7572 = vmatpush2.msra.mxu1 %v7476_v29  ;;  %v11999_v29 = vld [vmem:[%s14275_s4 + $0x400] sm:$0xff] }
0x1f6d   :  { %7573 = vmatprep.subr.mxu1 %v14327_v56 }
0x1f6e   :  { %7574 = vmatpush2.msra.mxu1 %v11399_v14 }
0x1f6f   :  { %7575 = vmatprep.subr.mxu1 %v14327_v56 }
0x1f70   :  { %7576 = vmatpush2.msra.mxu1 %v7466_v34 }
0x1f71   :  { %7577 = vmatprep.subr.mxu1 %v14327_v56 }
0x1f72   :  { %7578 = vmatpush2.msra.mxu1 %v11396_v54 }
0x1f73   :  { %7579 = vmatprep.subr.mxu1 %v14327_v56 }
0x1f74   :  { %7580 = vmatpush2.msra.mxu1 %v7456_v31 }
0x1f75   :  { %7581 = vmatprep.subr.mxu1 %v14327_v56 }
0x1f76   :  { %7582 = vmatpush2.msra.mxu1 %v11393_v22 }
0x1f77   :  { %7583 = vmatprep.subr.mxu1 %v14327_v56 }
0x1f78   :  { %7584 = vmatpush2.msra.mxu1 %v7446_v46 }
0x1f79   :  { %7586 = vmatmul.mubr.f32.vlgmr.msra.gmra.mxu1 %v7485_v43  ;;  %11452 = vmatprep.subr.msk.mxu1 %vm1120_vm3, %v13684_v37  ;;  %v12000_v43 = vld [vmem:[%s14275_s4 + $0x408] sm:$0xff] }
0x1f7a   :  { %11453 = vmatpush3.msk.msra.mxu1 %vm1120_vm3, %v13684_v37  ;;  %9689 = vmatprep.mubr.msk.f32.mxu1 %vm604_vm1, %v13935_v25  ;;  %v7488_v37 = vld [vmem:[%s14275_s4 + $0x2e0] sm:$0xff] }
0x1f7b   :  { %11486 = vmatprep.subr.mxu1 %v12879_v27 }
0x1f7d   :  { %7591 = vmatmul.mubr.f32.gmra.mxu1 %v7486_v63 }
0x1f7e   :  { %9690 = vmatprep.mubr.msk.f32.mxu1 %vm604_vm1, %v13941_v55  ;;  %v6292_v55 = vadd.f32 %v13740_v35, %v6200_v47  ;;  %v7511_v35 = vpop.permute.xlu1 %7510 }
0x1f81   :  { %7596 = vmatmul.mubr.f32.gmra.mxu1 %v7487_v41 }
0x1f82   :  { %9691 = vmatprep.mubr.msk.f32.mxu1 %vm604_vm1, %v13947_v21 }
0x1f85   :  { %7601 = vmatmul.mubr.f32.gmra.mxu1 %v7488_v37 }
0x2039   :  { %v7587_v9 = vpop.f32.mrf.mxu1 }
0x203a   :  { %v7588_v30 = vadd.f32 %v7587_v9, %v7496_v53 }
0x203b   :  { %v7589_v58 = vpop.f32.mrf.mxu1 }
0x203c   :  { %v13998_v6 = vadd.f32 %v7588_v30, %v6287_v32 }
0x203d   :  { %v7592_v25 = vpop.f32.mrf.mxu1 }
0x203e   :  { %v7593_v21 = vadd.f32 %v7592_v25, %v7501_v51  ;;  %11407 = vmatprep.mubr.msk.f32.mxu0 %vm111_vm0, %v13998_v6  ;;  %v7614_v52 = vmul.f32 %v13998_v6, %v13998_v6  ;;  %v12001_v25 = vld [vmem:[%s14275_s4 + $0x410] sm:$0xff] }
0x203f   :  { %v7594_v59 = vpop.f32.mrf.mxu1 }
0x2040   :  { %v14003_v4 = vadd.f32 %v7593_v21, %v6292_v55  ;;  %v12002_v55 = vld [vmem:[%s14275_s4 + $0x418] sm:$0xff]  ;;  %v12003_v21 = vld [vmem:[%s14275_s4 + $0x420] sm:$0xff] }
0x2041   :  { %v7597_v8 = vpop.f32.mrf.mxu1  ;;  %v12007_v59 = vld [vmem:[%s14275_s4 + $0x440] sm:$0xff] }
0x2042   :  { %v7598_v0 = vadd.f32 %v7597_v8, %v7506_v62  ;;  %11408 = vmatmul.mubr.msk.f32.vlgmr.msra.gmra.mxu0 %vm111_vm0, %v14003_v4  ;;  %v7615_v40 = vmul.f32 %v14003_v4, %v14003_v4  ;;  %v12005_v62 = vld [vmem:[%s14275_s4 + $0x430] sm:$0xff] }
0x2043   :  { %v7599_v1 = vpop.f32.mrf.mxu1  ;;  %v7611_v8 = vld [vmem:[%s14275_s4 + $0x330] sm:$0xff] }
0x2044   :  { %v14008_v42 = vadd.f32 %v7598_v0, %v6297_v57  ;;  %v7610_v57 = vld [vmem:[%s14275_s4 + $0x328] sm:$0xff]  ;;  %8082 = vperm.xlu1 %11745, %v7611_v8   ;;  %v7612_v0 = vld [vmem:[%s14275_s4 + $0x338] sm:$0xff] }
0x2045   :  { %v7602_v20 = vpop.f32.mrf.mxu1  ;;  %8077 = vperm.xlu0 %11744, %v7610_v57  }
0x2046   :  { %v7603_v38 = vadd.f32 %v7602_v20, %v7511_v35  ;;  %11410 = vmatprep.mubr.msk.f32.mxu0 %vm111_vm0, %v14008_v42  ;;  %v7616_v18 = vmul.f32 %v14008_v42, %v14008_v42 }
0x2047   :  { %v7604_v33 = vpop.f32.mrf.mxu1 }
0x2048   :  { %v14013_v39 = vadd.f32 %v7603_v38, %v6302_v12  ;;  %11746 = vset.pattern.permute.xlu1 %v14328_v24 }
0x2049   :  { %11747 = vset.pattern.permute.xlu0 %v14328_v24  ;;  %8100 = vperm.xlu1 %11746, %v7610_v57  }
0x204a   :  { %11411 = vmatmul.mubr.msk.f32.gmra.mxu0 %vm111_vm0, %v14013_v39  ;;  %v7617_v60 = vmul.f32 %v14013_v39, %v14013_v39  ;;  %8104 = vperm.xlu0 %11747, %v7611_v8  }
0x204b   :  { %11413 = vmatprep.mubr.msk.f32.mxu0 %vm111_vm0, %v7614_v52 }
0x204d   :  { %11748 = vset.pattern.permute.xlu1 %v14329_v48 }
0x204e   :  { %11414 = vmatmul.mubr.msk.f32.gmra.mxu0 %vm111_vm0, %v7615_v40  ;;  %8108 = vperm.xlu0 %11747, %v7612_v0  }
0x204f   :  { %11416 = vmatprep.mubr.msk.f32.mxu0 %vm111_vm0, %v7616_v18  ;;  %8087 = vperm.xlu1 %11748, %v7612_v0  }
0x2052   :  { %11417 = vmatmul.mubr.msk.f32.gmra.mxu0 %vm111_vm0, %v7617_v60  ;;  %11750 = vset.pattern.permute.xlu0 %v14330_v26 }
0x2053   :  { %11435 = vmatprep.mubr.msk.f32.mxu0 %vm12017_vm2, %v14327_v56  ;;  %8092 = vperm.xlu1 %11748, %v7613_v49  }
0x2057   :  { %11749 = vset.pattern.permute.xlu1 %v14328_v24 }
0x2058   :  { %8112 = vperm.xlu1 %11749, %v7613_v49  }
0x205c   :  { %11751 = vset.pattern.permute.xlu1 %v14337_v28 }
0x2102   :  { %v11409_v5 = vpop.f32.mrf.mxu0 }
0x2104   :  { %v7708_v22 = vpop.f32.mrf.mxu0 }
0x210a   :  { %v11412_v46 = vpop.f32.mrf.mxu0 }
0x210c   :  { %v7718_v54 = vpop.f32.mrf.mxu0 }
0x210e   :  { %v11415_v31 = vpop.f32.mrf.mxu0 }
0x2110   :  { %v7728_v14 = vpop.f32.mrf.mxu0 }
0x2112   :  { %v11418_v34 = vpop.f32.mrf.mxu0 }
0x2113   :  { %11420 = vmatpush3.msra.mxu0 %v11418_v34 }
0x2114   :  { %v7738_v15 = vpop.f32.mrf.mxu0  ;;  %11421 = vmatprep.subr.mxu0 %v14327_v56 }
0x2115   :  { %11422 = vmatpush3.msra.mxu0 %v7738_v15 }
0x2116   :  { %11423 = vmatprep.subr.mxu0 %v14327_v56 }
0x2117   :  { %11424 = vmatpush3.msra.mxu0 %v11415_v31 }
0x2118   :  { %11425 = vmatprep.subr.mxu0 %v14327_v56 }
0x2119   :  { %11426 = vmatpush3.msra.mxu0 %v7728_v14 }
0x211a   :  { %11427 = vmatprep.subr.mxu0 %v14327_v56 }
0x211b   :  { %11428 = vmatpush3.msra.mxu0 %v11412_v46 }
0x211c   :  { %11429 = vmatprep.subr.mxu0 %v14327_v56 }
0x211d   :  { %11430 = vmatpush3.msra.mxu0 %v7718_v54 }
0x211e   :  { %11431 = vmatprep.subr.mxu0 %v14327_v56 }
0x211f   :  { %11432 = vmatpush3.msra.mxu0 %v11409_v5 }
0x2120   :  { %11433 = vmatprep.subr.mxu0 %v14327_v56 }
0x2121   :  { %11434 = vmatpush3.msra.mxu0 %v7708_v22  ;;  %v8078_v22 = vpop.permute.xlu0 %8077 }
0x2122   :  { %11436 = vmatmul.mubr.msk.f32.vlgmr.msra.gmra.mxu0 %vm604_vm1, %v11999_v29 }
0x2123   :  { %11440 = vmatprep.mubr.msk.f32.mxu0 %vm2550_vm10, %v12000_v43 }
0x21e2   :  { %v7813_v63 = vpop.f32.mrf.mxu0 }
0x21e3   :  { %v7817_v41 = vmul.f32 %v7813_v63, %v7813_v63  ;;  %v7824_v9 = vsub.f32 0.0, %v7813_v63 }
0x21e4   :  { %v11437_v37 = vpop.f32.mrf.mxu0 }
0x21e5   :  { %v7819_v44 = vrot.slane %v7817_v41, 4  ;;  %v8105_v41 = vpop.permute.xlu0 %8104 }
0x21e7   :  { %v7821_v47 = vsub.f32 %v7813_v63, %v7819_v44 }
0x21e9   :  { %v7822_v53 = vadd.f32 1e-05, %v7821_v47 }
0x21eb   :  { %11961 = vrsqrt.f32 %v7822_v53 }
0x21f8   :  { %v11962_v51 = vpop.eup %11961 }
0x21f9   :  { %v7826_v32 = vrot.slane %v11962_v51, 4 }
0x21fb   :  { %v7828_v30 = vmul.f32 %v7826_v32, %v7824_v9 }
0x21fd   :  { %v7830_v58 = vrot.slane %v7828_v30, 4 }
0x21ff   :  { %v7832_v2 = vsel %vm1309_vm4, %v7826_v32, %v7830_v58 }
0x2200   :  { %11438 = vmatprep.subr.mxu0 %v7832_v2 }
0x2201   :  { %11439 = vmatpush3.msra.mxu0 %v7832_v2 }
0x2202   :  { %11441 = vmatmul.mubr.msk.f32.vlgmr.msra.gmra.mxu0 %vm2550_vm10, %v12001_v25  ;;  %11466 = vmatprep.subr.mxu0 %v13781_v11 }
0x2203   :  { %11467 = vmatpush3.msra.mxu0 %v13781_v11  ;;  %11443 = vmatprep.mubr.msk.f32.mxu0 %vm2550_vm10, %v12002_v55  ;;  %v12004_v11 = vld [vmem:[%s14275_s4 + $0x428] sm:$0xff] }
0x2204   :  { %11468 = vmatprep.subr.mxu0 %v13792_v36 }
0x2205   :  { %11469 = vmatpush3.msra.mxu0 %v13792_v36  ;;  %v12006_v36 = vld [vmem:[%s14275_s4 + $0x438] sm:$0xff] }
0x2206   :  { %11444 = vmatmul.mubr.msk.f32.gmra.mxu0 %vm2550_vm10, %v12003_v21  ;;  %11476 = vmatprep.subr.mxu0 %v12897_v23 }
0x2207   :  { %11446 = vmatprep.mubr.msk.f32.mxu0 %vm2550_vm10, %v12004_v11 }
0x220a   :  { %11447 = vmatmul.mubr.msk.f32.gmra.mxu0 %vm2550_vm10, %v12005_v62 }
0x220b   :  { %11449 = vmatprep.mubr.msk.f32.mxu0 %vm2550_vm10, %v12006_v36 }
0x220e   :  { %11450 = vmatmul.mubr.msk.f32.gmra.mxu0 %vm2550_vm10, %v12007_v59 }
0x22c2   :  { %v11442_v1 = vpop.f32.mrf.mxu0 }
0x22c4   :  { %v7899_v35 = vpop.f32.mrf.mxu0 }
0x22c5   :  { %11454 = vmatprep.mubr.msk.f32.mxu1 %vm1095_vm6, %v7899_v35 }
0x22c6   :  { %v11445_v20 = vpop.f32.mrf.mxu0  ;;  %11455 = vmatmul.mubr.msk.f32.vlgmr.msra.gmra.mxu1 %vm1095_vm6, %v11442_v1 }
0x22c7   :  { %11487 = vmatpush3.msra.mxu1 %v12879_v27  ;;  %v8083_v27 = vpop.permute.xlu1 %8082 }
0x22c8   :  { %11488 = vmatprep.subr.mxu1 %v12964_v61  ;;  %v7909_v48 = vpop.f32.mrf.mxu0 }
0x22c9   :  { %11489 = vmatpush3.msra.mxu1 %v12964_v61  ;;  %11457 = vmatprep.mubr.msk.f32.mxu1 %vm1095_vm6, %v7909_v48 }
0x22ca   :  { %11526 = vmatprep.subr.mxu1 %v13712_v19  ;;  %v11448_v24 = vpop.f32.mrf.mxu0  ;;  %11458 = vmatmul.mubr.msk.f32.gmra.mxu1 %vm1095_vm6, %v11445_v20 }
0x22cb   :  { %v8101_v61 = vpop.permute.xlu1 %8100 }
0x22cc   :  { %v7919_v12 = vpop.f32.mrf.mxu0 }
0x22cd   :  { %11460 = vmatprep.mubr.msk.f32.mxu1 %vm1095_vm6, %v7919_v12 }
0x22ce   :  { %v11451_v38 = vpop.f32.mrf.mxu0  ;;  %11461 = vmatmul.mubr.msk.f32.gmra.mxu1 %vm1095_vm6, %v11448_v24 }
0x22cf   :  { %v8088_v60 = vpop.permute.xlu1 %8087 }
0x22d0   :  { %v7929_v33 = vpop.f32.mrf.mxu0 }
0x22d1   :  { %11463 = vmatprep.mubr.msk.f32.mxu1 %vm1095_vm6, %v7929_v33 }
0x22d2   :  { %11464 = vmatmul.mubr.msk.f32.gmra.mxu1 %vm1095_vm6, %v11451_v38 }
0x22d3   :  { %v8093_v15 = vpop.permute.xlu1 %8092 }
0x22d7   :  { %v8113_v32 = vpop.permute.xlu1 %8112 }
0x2386   :  { %v11456_v52 = vpop.f32.mrf.mxu1 }
0x2387   :  { %v8068_v46 = vmul.f32 %v11456_v52, %v14003_v4 }
0x2388   :  { %v8028_v40 = vpop.f32.mrf.mxu1 }
0x2389   :  { %v8067_v31 = vmul.f32 %v8028_v40, %v13998_v6 }
0x238a   :  { %v11459_v18 = vpop.f32.mrf.mxu1 }
0x238b   :  { %v8070_v29 = vmul.f32 %v11459_v18, %v14013_v39  ;;  %v8109_v39 = vpop.permute.xlu0 %8108 }
0x238c   :  { %v8038_v5 = vpop.f32.mrf.mxu1 }
0x238d   :  { %v8069_v44 = vmul.f32 %v8038_v5, %v14008_v42 }
0x238e   :  { %v11462_v54 = vpop.f32.mrf.mxu1 }
0x238f   :  { %v8072_v14 = vadd.f32 %v11462_v54, %v8068_v46 }
0x2390   :  { %v8048_v34 = vpop.f32.mrf.mxu1 }
0x2391   :  { %v8071_v43 = vadd.f32 %v8067_v31, %v8048_v34  ;;  %v8096_v63 = vmul.f32 %v8083_v27, %v8072_v14 }
0x2392   :  { %v11465_v37 = vpop.f32.mrf.mxu1 }
0x2393   :  { %v8095_v47 = vmul.f32 %v8078_v22, %v8071_v43  ;;  %v8116_v53 = vadd.f32 %v8105_v41, %v8096_v63  ;;  %v8074_v51 = vadd.f32 %v11465_v37, %v8070_v29 }
0x2394   :  { %v8058_v9 = vpop.f32.mrf.mxu1 }
0x2395   :  { %v8115_v4 = vadd.f32 %v8101_v61, %v8095_v47  ;;  %v9719_v30 = vmul.f32 -1.442695, %v8116_v53  ;;  %v8073_v58 = vadd.f32 %v8069_v44, %v8058_v9  ;;  %v8098_v6 = vmul.f32 %v8093_v15, %v8074_v51 }
0x2397   :  { %v9718_v2 = vmul.f32 -1.442695, %v8115_v4  ;;  %11963 = vpow2.f32 %v9719_v30  ;;  %v8118_v25 = vadd.f32 %v8113_v32, %v8098_v6  ;;  %v8097_v55 = vmul.f32 %v8088_v60, %v8073_v58 }
0x2399   :  { %11965 = vpow2.f32 %v9718_v2  ;;  %v9721_v21 = vmul.f32 -1.442695, %v8118_v25  ;;  %v8117_v11 = vadd.f32 %v8109_v39, %v8097_v55 }
0x239b   :  { %11967 = vpow2.f32 %v9721_v21  ;;  %v9720_v62 = vmul.f32 -1.442695, %v8117_v11 }
0x239d   :  { %11969 = vpow2.f32 %v9720_v62 }
0x23a4   :  { %v11964_v42 = vpop.eup %11963 }
0x23a5   :  { %v8132_v36 = vadd.f32 1.0, %v11964_v42 }
0x23a6   :  { %v11966_v59 = vpop.eup %11965 }
0x23a7   :  { %v8131_v8 = vadd.f32 1.0, %v11966_v59  ;;  %11971 = vrcp.f32 %v8132_v36 }
0x23a8   :  { %v11968_v57 = vpop.eup %11967 }
0x23a9   :  { %11973 = vrcp.f32 %v8131_v8  ;;  %v8134_v0 = vadd.f32 1.0, %v11968_v57 }
0x23aa   :  { %v11970_v49 = vpop.eup %11969 }
0x23ab   :  { %v8133_v1 = vadd.f32 1.0, %v11970_v49  ;;  %11975 = vrcp.f32 %v8134_v0 }
0x23ad   :  { %11977 = vrcp.f32 %v8133_v1 }
0x23b4   :  { %v11972_v35 = vpop.eup %11971 }
0x23b5   :  { %v8144_v24 = vmul.f32 %v11972_v35, %v8116_v53  ;;  %v12008_v35 = vld [vmem:[%s14275_s4 + $0x3a0] sm:$0xff] }
0x23b6   :  { %v11974_v20 = vpop.eup %11973 }
0x23b7   :  { %v8143_v48 = vmul.f32 %v11974_v20, %v8115_v4  ;;  %v12009_v20 = vld [vmem:[%s14275_s4 + $0x398] sm:$0xff] }
0x23b8   :  { %v11976_v12 = vpop.eup %11975 }
0x23b9   :  { %11470 = vmatprep.mubr.msk.f32.mxu0 %vm111_vm0, %v8143_v48  ;;  %11490 = vmatprep.mubr.msk.f32.mxu1 %vm111_vm0, %v8143_v48  ;;  %v8146_v27 = vmul.f32 %v11976_v12, %v8118_v25  ;;  %v14340_v12 = vld [vmem:[#allocation6_spill] sm:$0xff] }
0x23ba   :  { %v11978_v38 = vpop.eup %11977  ;;  %11471 = vmatmul.mubr.msk.f32.vlgmr.msra.gmra.mxu0 %vm111_vm0, %v8144_v24  ;;  %11491 = vmatmul.mubr.msk.f32.vlgmr.msra.gmra.mxu1 %vm111_vm0, %v8144_v24 }
0x23bb   :  { %v8145_v33 = vmul.f32 %v11978_v38, %v8117_v11  ;;  %11477 = vmatpush3.msra.mxu0 %v12897_v23  ;;  %11527 = vmatpush3.msra.mxu1 %v13712_v19  ;;  %v8531_v23 = vld [vmem:[%s14275_s4 + $0x368] sm:$0xff]  ;;  %v8417_v19 = vld [vmem:[%s14275_s4 + $0x360] sm:$0xff]  ;;  %v8933_v38 = vld [vmem:[%s14275_s4 + $0x130] sm:$0xff] }
0x23bc   :  { %11478 = vmatprep.subr.mxu0 %v12968_v17  ;;  %11528 = vmatprep.subr.mxu1 %v13705_v50 }
0x23bd   :  { %11479 = vmatpush3.msra.mxu0 %v12968_v17  ;;  %11529 = vmatpush3.msra.mxu1 %v13705_v50  ;;  %v8532_v17 = vld [vmem:[%s14275_s4 + $0x370] sm:$0xff]  ;;  %v30_v50 = vld [vmem:[%s14275_s4 + $0x3d8] sm:$0xff] }
0x23be   :  { %11473 = vmatprep.mubr.msk.f32.mxu0 %vm111_vm0, %v8145_v33  ;;  %11493 = vmatprep.mubr.msk.f32.mxu1 %vm111_vm0, %v8145_v33 }
0x23bf   :  { %11530 = vmatprep.subr.mxu1 %v13702_v45  ;;  %11474 = vmatmul.mubr.msk.f32.gmra.mxu0 %vm111_vm0, %v8146_v27 }
0x23c0   :  { %11494 = vmatmul.mubr.msk.f32.gmra.mxu1 %vm111_vm0, %v8146_v27  ;;  %11480 = vmatprep.mubr.msk.f32.mxu0 %vm111_vm0, %v8143_v48  ;;  %v12010_v48 = vld [vmem:[%s14275_s4 + $0x390] sm:$0xff] }
0x23c1   :  { %11531 = vmatpush3.msra.mxu1 %v13702_v45  ;;  %11542 = vmatprep.mubr.msk.f32.mxu1 %vm604_vm1, %v8531_v23  ;;  %v31_v45 = vld [vmem:[%s14275_s4 + $0x3e0] sm:$0xff] }
0x23c2   :  { %11532 = vmatprep.subr.mxu1 %v13695_v10  ;;  %8537 = vperm.xlu1 %11751, %v8531_v23  }
0x23c3   :  { %11533 = vmatpush3.msra.mxu1 %v13695_v10  ;;  %11481 = vmatmul.mubr.msk.f32.vlgmr.msra.gmra.mxu0 %vm111_vm0, %v8144_v24  ;;  %v14174_v10 = vld [vmem:[%s14275_s4 + $0x358] sm:$0xff]  ;;  %v12011_v24 = vld [vmem:[%s14275_s4 + $0x388] sm:$0xff] }
0x23c4   :  { %11534 = vmatprep.subr.mxu1 %v13689_v7  ;;  %11483 = vmatprep.mubr.msk.f32.mxu0 %vm111_vm0, %v8145_v33 }
0x23c5   :  { %11535 = vmatpush3.msra.mxu1 %v13689_v7  ;;  %v8534_v7 = vld [vmem:[%s14275_s4 + $0x380] sm:$0xff] }
0x23c6   :  { %11536 = vmatprep.subr.mxu1 %v13679_v16  ;;  %11752 = vset.pattern.permute.xlu1 %v14330_v26 }
0x23c7   :  { %11537 = vmatpush3.msra.mxu1 %v13679_v16  ;;  %11484 = vmatmul.mubr.msk.f32.gmra.mxu0 %vm111_vm0, %v8146_v27  ;;  %v8533_v16 = vld [vmem:[%s14275_s4 + $0x378] sm:$0xff] }
0x23c8   :  { %11538 = vmatprep.subr.mxu1 %v13672_v13 }
0x23c9   :  { %11539 = vmatpush3.msra.mxu1 %v13672_v13  ;;  %v8414_v13 = vld [vmem:[%s14275_s4 + $0x348] sm:$0xff] }
0x23ca   :  { %11540 = vmatprep.subr.mxu1 %v13669_v3  ;;  %11520 = vmatprep.mubr.msk.f32.mxu0 %vm3194_vm11, %v8414_v13 }
0x23cb   :  { %11541 = vmatpush3.msra.mxu1 %v13669_v3  ;;  %v14159_v3 = vld [vmem:[%s14275_s4 + $0x350] sm:$0xff]  ;;  %8420 = vperm.xlu0 %11750, %v8414_v13  }
0x23cc   :  { %11543 = vmatmul.mubr.msk.f32.vlgmr.msra.gmra.mxu1 %vm604_vm1, %v8532_v17  ;;  %8425 = vperm.xlu1 %11752, %v14159_v3  }
0x23cd   :  { %11545 = vmatprep.mubr.msk.f32.mxu1 %vm604_vm1, %v8533_v16  ;;  %11548 = vmatprep.subr.mxu1 %v31_v45 }
0x23ce   :  { %11549 = vmatpush3.msra.mxu1 %v31_v45 }
0x23cf   :  { %11753 = vset.pattern.permute.xlu0 %v14337_v28  ;;  %11550 = vmatprep.subr.mxu1 %v30_v50 }
0x23d0   :  { %11546 = vmatmul.mubr.msk.f32.gmra.mxu1 %vm604_vm1, %v8534_v7  ;;  %8430 = vperm.xlu1 %11752, %v14174_v10  }
0x23d1   :  { %8542 = vperm.xlu0 %11753, %v8532_v17   ;;  %11551 = vmatpush3.msra.mxu1 %v30_v50 }
0x23d4   :  { %11754 = vset.pattern.permute.xlu1 %v14337_v28  ;;  %v14196_v28 = vld [vmem:[%s14275_s4 + $0x138] sm:$0xff] }
0x23d5   :  { %8547 = vperm.xlu1 %11754, %v8533_v16   ;;  %11755 = vset.pattern.permute.xlu0 %v14330_v26 }
0x23d6   :  { %8435 = vperm.xlu0 %11755, %v8417_v19  }
0x23d9   :  { %8552 = vperm.xlu1 %11754, %v8534_v7  }
0x23da   :  { %8842 = vrot.lane.b32.xlu0 %v30_v50, %s12014_s11 }
0x23dd   :  { %8844 = vrot.lane.b32.xlu1 %v31_v45, %s12014_s11 }
0x23de   :  { %11756 = vset.pattern.permute.xlu1 %v14330_v26  ;;  %8751 = vrot.lane.b32.xlu0 %v30_v50, %s12015_s12 }
0x23e1   :  { %8753 = vrot.lane.b32.xlu1 %v31_v45, %s12015_s12 }
0x23e2   :  { %8942 = vperm.xlu0 %11755, %v14196_v28  }
0x23e5   :  { %8937 = vperm.xlu1 %11756, %v8933_v38  }
0x243d   :  { %v8538_v34 = vpop.permute.xlu1 %8537 }
0x2446   :  { %v8421_v37 = vpop.permute.xlu0 %8420 }
0x2447   :  { %v8426_v15 = vpop.permute.xlu1 %8425 }
0x244b   :  { %v8431_v29 = vpop.permute.xlu1 %8430 }
0x244c   :  { %v8543_v44 = vpop.permute.xlu0 %8542 }
0x2450   :  { %v8548_v43 = vpop.permute.xlu1 %8547 }
0x2451   :  { %v8436_v47 = vpop.permute.xlu0 %8435 }
0x2454   :  { %v8553_v63 = vpop.permute.xlu1 %8552 }
0x2455   :  { %v8843_v53 = vpop.permute.xlu0 %8842 }
0x2458   :  { %v8845_v41 = vpop.permute.xlu1 %8844 }
0x2459   :  { %11568 = vmatprep.subr.mxu1 %v8845_v41  ;;  %v8752_v9 = vpop.permute.xlu0 %8751 }
0x245c   :  { %v8754_v51 = vpop.permute.xlu1 %8753 }
0x247a   :  { %v11472_v61 = vpop.f32.mrf.mxu0  ;;  %v11492_v52 = vpop.f32.mrf.mxu1 }
0x247c   :  { %v8225_v40 = vpop.f32.mrf.mxu0  ;;  %v8395_v18 = vpop.f32.mrf.mxu1 }
0x247f   :  { %v11475_v60 = vpop.f32.mrf.mxu0 }
0x2480   :  { %v11495_v5 = vpop.f32.mrf.mxu1 }
0x2481   :  { %11496 = vmatprep.subr.mxu0 %v11495_v5  ;;  %v8235_v22 = vpop.f32.mrf.mxu0 }
0x2482   :  { %v8405_v26 = vpop.f32.mrf.mxu1  ;;  %11497 = vmatpush3.msra.mxu0 %v11495_v5 }
0x2483   :  { %11498 = vmatprep.subr.mxu0 %v8405_v26  ;;  %v11482_v46 = vpop.f32.mrf.mxu0 }
0x2484   :  { %11499 = vmatpush3.msra.mxu0 %v8405_v26  ;;  %v14343_v26 = vld [vmem:[#allocation9_spill] sm:$0xff] }
0x2485   :  { %11500 = vmatprep.subr.mxu0 %v11492_v52  ;;  %v8310_v54 = vpop.f32.mrf.mxu0 }
0x2486   :  { %11501 = vmatpush3.msra.mxu0 %v11492_v52  ;;  %v8938_v52 = vpop.permute.xlu1 %8937 }
0x2487   :  { %11502 = vmatprep.subr.mxu0 %v8395_v18  ;;  %v11485_v31 = vpop.f32.mrf.mxu0 }
0x2488   :  { %11503 = vmatpush3.msra.mxu0 %v8395_v18  ;;  %v8943_v18 = vpop.permute.xlu0 %8942 }
0x2489   :  { %11504 = vmatprep.subr.mxu0 %v11485_v31  ;;  %v8320_v14 = vpop.f32.mrf.mxu0 }
0x248a   :  { %11505 = vmatpush3.msra.mxu0 %v11485_v31  ;;  %v14346_v31 = vld [vmem:[#allocation4_spill] sm:$0xff] }
0x248b   :  { %11506 = vmatprep.subr.mxu0 %v8320_v14 }
0x248c   :  { %11507 = vmatpush3.msra.mxu0 %v8320_v14  ;;  %v11544_v32 = vpop.f32.mrf.mxu1  ;;  %v14347_v14 = vld [vmem:[#allocation5_spill] sm:$0xff] }
0x248d   :  { %11508 = vmatprep.subr.mxu0 %v11482_v46  ;;  %v8635_v6 = vadd.f32 %v11544_v32, %v8543_v44 }
0x248e   :  { %11509 = vmatpush3.msra.mxu0 %v11482_v46  ;;  %v8629_v4 = vpop.f32.mrf.mxu1  ;;  %v14344_v46 = vld [vmem:[#allocation2_spill] sm:$0xff] }
0x248f   :  { %11510 = vmatprep.subr.mxu0 %v8310_v54  ;;  %v8630_v55 = vadd.f32 %v8629_v4, %v8538_v34  ;;  %v9255_v34 = vld [vmem:[%s14275_s4 + $0x140] sm:$0xf] }
0x2490   :  { %11511 = vmatpush3.msra.mxu0 %v8310_v54  ;;  %v11547_v58 = vpop.f32.mrf.mxu1  ;;  %v14345_v54 = vld [vmem:[#allocation3_spill] sm:$0xff] }
0x2491   :  { %11512 = vmatprep.subr.mxu0 %v11475_v60  ;;  %v8645_v36 = vadd.f32 %v11547_v58, %v8553_v63 }
0x2492   :  { %11513 = vmatpush3.msra.mxu0 %v11475_v60  ;;  %v8639_v11 = vpop.f32.mrf.mxu1 }
0x2493   :  { %11514 = vmatprep.subr.mxu0 %v8235_v22  ;;  %v8640_v57 = vadd.f32 %v8639_v11, %v8548_v43 }
0x2494   :  { %11515 = vmatpush3.msra.mxu0 %v8235_v22  ;;  %v14342_v22 = vld [vmem:[#allocation8_spill] sm:$0xff] }
0x2495   :  { %11516 = vmatprep.subr.mxu0 %v11472_v61 }
0x2496   :  { %11517 = vmatpush3.msra.mxu0 %v11472_v61 }
0x2497   :  { %11518 = vmatprep.subr.mxu0 %v8225_v40 }
0x2498   :  { %11519 = vmatpush3.msra.mxu0 %v8225_v40 }
0x2499   :  { %11521 = vmatmul.mubr.msk.f32.vlgmr.msra.gmra.mxu0 %vm3194_vm11, %v14159_v3  ;;  %11558 = vmatprep.subr.mxu0 %v8754_v51 }
0x249a   :  { %11523 = vmatprep.mubr.msk.f32.mxu0 %vm3194_vm11, %v14174_v10  ;;  %11559 = vmatpush3.msra.mxu0 %v8754_v51 }
0x249b   :  { %11560 = vmatprep.subr.mxu0 %v8752_v9 }
0x249c   :  { %11561 = vmatpush3.msra.mxu0 %v8752_v9 }
0x249d   :  { %11524 = vmatmul.mubr.msk.f32.gmra.mxu0 %vm3194_vm11, %v8417_v19 }
0x2559   :  { %v11522_v30 = vpop.f32.mrf.mxu0 }
0x255a   :  { %v8518_v2 = vadd.f32 %v11522_v30, %v8426_v15  ;;  %v12025_v15 = vmov 48  }
0x255b   :  { %v8512_v25 = vpop.f32.mrf.mxu0  ;;  %11757 = vset.pattern.permute.xlu1 %v12025_v15  ;;  %11758 = vset.pattern.permute.xlu0 %v12025_v15 }
0x255c   :  { %v8513_v39 = vadd.f32 %v8512_v25, %v8421_v37  ;;  %v8649_v42 = vadd.f32 %v8635_v6, %v8518_v2  ;;  %9258 = vperm.xlu1 %11757, %v9255_v34  }
0x255d   :  { %v11525_v21 = vpop.f32.mrf.mxu0 }
0x255e   :  { %v8648_v62 = vadd.f32 %v8630_v55, %v8513_v39  ;;  %v8528_v59 = vadd.f32 %v11525_v21, %v8436_v47 }
0x255f   :  { %v8522_v8 = vpop.f32.mrf.mxu0 }
0x2560   :  { %v8523_v0 = vadd.f32 %v8522_v8, %v8431_v29  ;;  %11552 = vmatprep.mubr.msk.f32.mxu1 %vm111_vm0, %v8648_v62  ;;  %11562 = vmatprep.mubr.msk.f32.mxu0 %vm111_vm0, %v8648_v62  ;;  %v8651_v1 = vadd.f32 %v8645_v36, %v8528_v59 }
0x2561   :  { %11553 = vmatmul.mubr.msk.f32.vlgmr.msra.gmra.mxu1 %vm111_vm0, %v8649_v42  ;;  %11563 = vmatmul.mubr.msk.f32.vlgmr.msra.gmra.mxu0 %vm111_vm0, %v8649_v42 }
0x2562   :  { %v8650_v49 = vadd.f32 %v8640_v57, %v8523_v0  ;;  %11569 = vmatpush3.msra.mxu1 %v8845_v41 }
0x2563   :  { %11570 = vmatprep.subr.mxu1 %v8843_v53 }
0x2564   :  { %11555 = vmatprep.mubr.msk.f32.mxu1 %vm111_vm0, %v8650_v49  ;;  %11565 = vmatprep.mubr.msk.f32.mxu0 %vm111_vm0, %v8650_v49 }
0x2565   :  { %11556 = vmatmul.mubr.msk.f32.gmra.mxu1 %vm111_vm0, %v8651_v1  ;;  %11566 = vmatmul.mubr.msk.f32.gmra.mxu0 %vm111_vm0, %v8651_v1 }
0x2566   :  { %11572 = vmatprep.mubr.msk.f32.mxu1 %vm111_vm0, %v8648_v62  ;;  %11571 = vmatpush3.msra.mxu1 %v8843_v53 }
0x2567   :  { %11605 = vmatprep.subr.mxu1 %v12008_v35  ;;  %11602 = vmatprep.mubr.msk.f32.mxu0 %vm3194_vm11, %v8933_v38 }
0x2569   :  { %11573 = vmatmul.mubr.msk.f32.vlgmr.msra.gmra.mxu1 %vm111_vm0, %v8649_v42 }
0x256a   :  { %11606 = vmatpush3.msra.mxu1 %v12008_v35  ;;  %11575 = vmatprep.mubr.msk.f32.mxu1 %vm111_vm0, %v8650_v49 }
0x256b   :  { %11607 = vmatprep.subr.mxu1 %v12009_v20 }
0x256c   :  { %11608 = vmatpush3.msra.mxu1 %v12009_v20 }
0x256d   :  { %11609 = vmatprep.subr.mxu1 %v12010_v48  ;;  %11576 = vmatmul.mubr.msk.f32.gmra.mxu1 %vm111_vm0, %v8651_v1 }
0x256e   :  { %11610 = vmatpush3.msra.mxu1 %v12010_v48 }
0x256f   :  { %11611 = vmatprep.subr.mxu1 %v12011_v24 }
0x2570   :  { %11612 = vmatpush3.msra.mxu1 %v12011_v24 }
0x2571   :  { %11616 = vmatprep.subr.mxu1 %v14340_v12 }
0x25d7   :  { %v9259_v47 = vpop.permute.xlu1 %9258 }
0x2621   :  { %v11554_v33 = vpop.f32.mrf.mxu1  ;;  %v11564_v3 = vpop.f32.mrf.mxu0 }
0x2623   :  { %v8730_v27 = vpop.f32.mrf.mxu1  ;;  %v8823_v10 = vpop.f32.mrf.mxu0 }
0x2625   :  { %v11557_v23 = vpop.f32.mrf.mxu1  ;;  %v11567_v50 = vpop.f32.mrf.mxu0 }
0x2627   :  { %v8740_v17 = vpop.f32.mrf.mxu1  ;;  %v8833_v19 = vpop.f32.mrf.mxu0 }
0x2629   :  { %v11574_v13 = vpop.f32.mrf.mxu1 }
0x262b   :  { %v8914_v16 = vpop.f32.mrf.mxu1 }
0x262d   :  { %v11577_v7 = vpop.f32.mrf.mxu1 }
0x262e   :  { %11578 = vmatprep.subr.mxu0 %v11577_v7 }
0x262f   :  { %v8924_v45 = vpop.f32.mrf.mxu1  ;;  %11579 = vmatpush3.msra.mxu0 %v11577_v7 }
0x2630   :  { %11580 = vmatprep.subr.mxu0 %v8924_v45 }
0x2631   :  { %11581 = vmatpush3.msra.mxu0 %v8924_v45 }
0x2632   :  { %11582 = vmatprep.subr.mxu0 %v11574_v13 }
0x2633   :  { %11583 = vmatpush3.msra.mxu0 %v11574_v13 }
0x2634   :  { %11584 = vmatprep.subr.mxu0 %v8914_v16 }
0x2635   :  { %11585 = vmatpush3.msra.mxu0 %v8914_v16 }
0x2636   :  { %11586 = vmatprep.subr.mxu0 %v11567_v50 }
0x2637   :  { %11587 = vmatpush3.msra.mxu0 %v11567_v50 }
0x2638   :  { %11588 = vmatprep.subr.mxu0 %v8833_v19 }
0x2639   :  { %11589 = vmatpush3.msra.mxu0 %v8833_v19 }
0x263a   :  { %11590 = vmatprep.subr.mxu0 %v11564_v3 }
0x263b   :  { %11591 = vmatpush3.msra.mxu0 %v11564_v3 }
0x263c   :  { %11592 = vmatprep.subr.mxu0 %v8823_v10 }
0x263d   :  { %11593 = vmatpush3.msra.mxu0 %v8823_v10 }
0x263e   :  { %11594 = vmatprep.subr.mxu0 %v11557_v23 }
0x263f   :  { %11595 = vmatpush3.msra.mxu0 %v11557_v23 }
0x2640   :  { %11596 = vmatprep.subr.mxu0 %v8740_v17 }
0x2641   :  { %11597 = vmatpush3.msra.mxu0 %v8740_v17 }
0x2642   :  { %11598 = vmatprep.subr.mxu0 %v11554_v33 }
0x2643   :  { %11599 = vmatpush3.msra.mxu0 %v11554_v33 }
0x2644   :  { %11600 = vmatprep.subr.mxu0 %v8730_v27 }
0x2645   :  { %11601 = vmatpush3.msra.mxu0 %v8730_v27 }
0x2646   :  { %11603 = vmatmul.mubr.msk.f32.vlgmr.msra.gmra.mxu0 %vm3194_vm11, %v14196_v28  ;;  %11638 = vmatprep.subr.mxu0 %v14327_v56  ;;  %v14341_v28 = vld [vmem:[#allocation7_spill] sm:$0xff] }
0x2647   :  { %11650 = vmatprep.mubr.msk.f32.mxu0 %vm12017_vm2, %v14327_v56 }
0x2706   :  { %v11604_v61 = vpop.f32.mrf.mxu0 }
0x2707   :  { %v9021_v5 = vadd.f32 %v11604_v61, %v8943_v18 }
0x2708   :  { %v9015_v40 = vpop.f32.mrf.mxu0 }
0x2709   :  { %v9016_v60 = vadd.f32 %v9015_v40, %v8938_v52 }
0x270b   :  { %11613 = vmatprep.mubr.msk.f32.mxu1 %vm1311_vm5, %v9016_v60 }
0x270c   :  { %11614 = vmatmul.mubr.msk.f32.vlgmr.msra.gmra.mxu1 %vm1311_vm5, %v9021_v5 }
0x270d   :  { %11617 = vmatpush3.msra.mxu1 %v14340_v12  ;;  %11624 = vmatprep.mubr.msk.f32.mxu1 %vm1311_vm5, %v9016_v60 }
0x270e   :  { %11618 = vmatprep.subr.mxu1 %v14341_v28 }
0x270f   :  { %11619 = vmatpush3.msra.mxu1 %v14341_v28 }
0x2710   :  { %11620 = vmatprep.subr.mxu1 %v14342_v22 }
0x2711   :  { %11621 = vmatpush3.msra.mxu1 %v14342_v22 }
0x2712   :  { %11622 = vmatprep.subr.mxu1 %v14343_v26 }
0x2713   :  { %11623 = vmatpush3.msra.mxu1 %v14343_v26 }
0x2714   :  { %11625 = vmatmul.mubr.msk.f32.vlgmr.msra.gmra.mxu1 %vm1311_vm5, %v9021_v5  ;;  %11627 = vmatprep.subr.mxu1 %v14344_v46 }
0x2715   :  { %11628 = vmatpush3.msra.mxu1 %v14344_v46  ;;  %11635 = vmatprep.mubr.msk.f32.mxu1 %vm1311_vm5, %v9016_v60 }
0x2716   :  { %11629 = vmatprep.subr.mxu1 %v14345_v54 }
0x2717   :  { %11630 = vmatpush3.msra.mxu1 %v14345_v54 }
0x2718   :  { %11631 = vmatprep.subr.mxu1 %v14346_v31 }
0x2719   :  { %11632 = vmatpush3.msra.mxu1 %v14346_v31 }
0x271a   :  { %11633 = vmatprep.subr.mxu1 %v14347_v14 }
0x271b   :  { %11634 = vmatpush3.msra.mxu1 %v14347_v14 }
0x271c   :  { %11636 = vmatmul.mubr.msk.f32.vlgmr.msra.gmra.mxu1 %vm1311_vm5, %v9021_v5 }
0x27cc   :  { %v11615_v29 = vpop.f32.mrf.mxu1 }
0x27ce   :  { %v9096_v43 = vpop.f32.mrf.mxu1 }
0x27d4   :  { %v11626_v63 = vpop.f32.mrf.mxu1 }
0x27d6   :  { %v9171_v41 = vpop.f32.mrf.mxu1 }
0x27dc   :  { %v11637_v37 = vpop.f32.mrf.mxu1 }
0x27dd   :  { %11639 = vmatpush3.msra.mxu0 %v11637_v37 }
0x27de   :  { %v9246_v44 = vpop.f32.mrf.mxu1  ;;  %11640 = vmatprep.subr.mxu0 %v14327_v56 }
0x27df   :  { %11641 = vmatpush3.msra.mxu0 %v9246_v44 }
0x27e0   :  { %11642 = vmatprep.subr.mxu0 %v14327_v56 }
0x27e1   :  { %11643 = vmatpush3.msra.mxu0 %v11626_v63 }
0x27e2   :  { %11644 = vmatprep.subr.mxu0 %v14327_v56 }
0x27e3   :  { %11645 = vmatpush3.msra.mxu0 %v9171_v41 }
0x27e4   :  { %11646 = vmatprep.subr.mxu0 %v14327_v56 }
0x27e5   :  { %11647 = vmatpush3.msra.mxu0 %v11615_v29 }
0x27e6   :  { %11648 = vmatprep.subr.mxu0 %v14327_v56 }
0x27e7   :  { %11649 = vmatpush3.msra.mxu0 %v9096_v43 }
0x27e8   :  { %11651 = vmatmul.mubr.msk.f32.vlgmr.msra.gmra.mxu0 %vm9261_vm12, %v9255_v34 }
0x28a8   :  { %v9330_v53 = vpop.f32.mrf.mxu0 }
0x28a9   :  { %v9331_v51 = vadd.f32 %v9330_v53, %v9259_v47 }
0x28aa   :  { %v11652_v9 = vpop.f32.mrf.mxu0 }
0x28ab   :  { %v9334_v32 = vsel %vm1309_vm4, %v9331_v51, 0.0 }
0x28ac   :  { %v9335_v4 = vsel %vm1311_vm5, %v9334_v32, 0.0 }
0x28ad   :  { %9336 = vst [vmem:[%s14278_s5] sm:$0xff] %v9335_v4 }

</bundles_post_ra>
